<compile_context>
chip_gen: v7x
topology: tpu7x:2x2x1
jax: 0.10.0
libtpu: 0.0.40
codegen_flags: <defaults>
</compile_context>

<pallas_src>
import jax
import jax.numpy as jnp
from jax.experimental import pallas as pl
from jax.experimental.pallas import tpu as pltpu


def _round_up(x, m):
    return ((x + m - 1) // m) * m


def _cdiv(a, b):
    return -(-a // b)


def _hier_attn_kernel(x_ref, wt_ref, ccol_ref, wkt_ref, ck_ref, o_ref):
    # x_ref   : (F, D, TB)   batch tile, batch in lanes (compute dtype: bf16 or f32)
    # wt_ref  : (L*H, D)     all per-layer kernels, row (l*H+h) = W_l[:, h] (compute dtype)
    # ccol_ref: (L*H, 1)     per-layer contexts stacked, f32
    # wkt_ref : (H, D, 1)    final attention kernel (transposed), f32
    # ck_ref  : (H, 1)       final attention context, f32
    # o_ref   : (D, TB)      lane-dense output slab, f32
    n_fields, dim, tb = x_ref.shape
    lh = wt_ref.shape[0]
    hidden = wkt_ref.shape[0]
    n_layers = lh // hidden
    f32 = jnp.float32

    wt = wt_ref[...]                                           # (L*H, D)
    # Grid-invariant lane-broadcasts of the tiny weights, hoisted (materialised once).
    cb = jnp.broadcast_to(ccol_ref[...], (lh, tb))             # (L*H, TB) f32
    wkb = jnp.broadcast_to(wkt_ref[...], (hidden, dim, tb))    # (H, D, TB) f32
    ckb = jnp.broadcast_to(ck_ref[...], (hidden, tb))          # (H, TB)   f32

    # ---- per-field hiddens + per-layer attention logits -------------------------
    # One MXU matmul per field: (L*H, D) @ (D, TB) with TB in lanes.  The L attention
    # logits are a VPU multiply + sublane reduce (no tiny-N MXU push).
    xs = []                      # per-field x, f32, (D, TB)
    aw = []                      # aw[f][l] : (1, TB) f32 logits
    for f in range(n_fields):
        x_f = x_ref[f]                                         # (D, TB), free outer slice
        xs.append(x_f.astype(f32))
        h_f = jnp.dot(wt, x_f, preferred_element_type=f32)     # (L*H, TB), f32 accumulate
        h_f = jnp.maximum(h_f, 0.0)
        hw = h_f * cb
        aw.append([jnp.sum(hw[l * hidden:(l + 1) * hidden, :], axis=0, keepdims=True)
                   for l in range(n_layers)])

    # ---- exact field softmax per layer (streaming max/sum over the F pieces) ----
    e = []                       # unnormalised exponentials, e[l][f] : (1, TB)
    inv = []                     # 1 / denominator, per layer : (1, TB)
    for l in range(n_layers):
        m_l = aw[0][l]
        for f in range(1, n_fields):
            m_l = jnp.maximum(m_l, aw[f][l])
        e_l = [jnp.exp(aw[f][l] - m_l) for f in range(n_fields)]
        s_l = e_l[0]
        for f in range(1, n_fields):
            s_l = s_l + e_l[f]
        e.append(e_l)
        inv.append(1.0 / s_l)                                  # exact reciprocal

    # ---- hierarchical scan (exact hoisting):  u_l = (score_l . x) * (1 + sum_{j<l} u_j)
    # The final-attention logit for each layer summary is folded into the loop and
    # computed on the VPU/XLU in f32 (no (L*TB, H) intermediate, no extra MXU use).
    acc = jnp.ones((dim, tb), f32)
    us = []
    fw = []
    for l in range(n_layers):
        num = e[l][0] * xs[0]                                  # (1,TB) sublane splat * (D,TB)
        for f in range(1, n_fields):
            num = num + e[l][f] * xs[f]
        u_l = (num * inv[l]) * acc                             # (D, TB)
        us.append(u_l)
        acc = acc + u_l
        ah_l = jnp.maximum(jnp.sum(wkb * u_l[None, :, :], axis=1), 0.0)   # (H, TB)
        fw.append(jnp.sum(ah_l * ckb, axis=0, keepdims=True))             # (1, TB)

    # ---- exact softmax over the L layer summaries + weighted combination --------
    fm = fw[0]
    for l in range(1, n_layers):
        fm = jnp.maximum(fm, fw[l])
    fe = [jnp.exp(fw[l] - fm) for l in range(n_layers)]
    fden = fe[0]
    for l in range(1, n_layers):
        fden = fden + fe[l]
    out = fe[0] * us[0]
    for l in range(1, n_layers):
        out = out + fe[l] * us[l]
    o_ref[...] = out * (1.0 / fden)                            # (D, TB) lane-dense store


def hierarchical_attn_agg(inputs, kernels_w, contexts_w, attn_kernel_w,
                          attn_context_w, *, batch_tile=1024,
                          compute_dtype=jnp.bfloat16):
    """inputs: (B, F, D) float32.
    kernels_w: (L, D, H), contexts_w: (L, H),
    attn_kernel_w: (D, H), attn_context_w: (H,).
    Returns: (B, D) float32.

    compute_dtype controls the dtype of the MXU operands and of the x HBM stream
    (bf16 default: native MXU operands, half the memory traffic; f32 accumulation
    and all VPU math stay f32)."""
    B, F, D = inputs.shape
    L, _, H = kernels_w.shape

    # Weight layouts prepared (and cast) once in the wrapper, not per grid step.
    wt = jnp.transpose(kernels_w, (0, 2, 1)).reshape(L * H, D).astype(compute_dtype)
    ccol = contexts_w.reshape(L * H, 1).astype(jnp.float32)
    wkt = jnp.transpose(attn_kernel_w, (1, 0)).reshape(H, D, 1).astype(jnp.float32)
    ckcol = attn_context_w.reshape(H, 1).astype(jnp.float32)

    # Batch tiling: tb is a multiple of 128 (lane density of every post-matmul tensor
    # and of the output store), capped by batch_tile (VMEM budget; keep <= ~1-2K on
    # v7x's 64 MiB VMEM), and clamped so the grid has >= 2 steps whenever there are
    # at least two full 128-row tiles of work (v7x has 2 TensorCores).
    bt = max(128, _round_up(int(batch_tile), 128))
    b128 = _round_up(max(B, 1), 128)
    tb = min(bt, b128)
    if b128 >= 2 * 128:
        tb = min(tb, _round_up(_cdiv(b128, 2), 128))
    b_pad = _round_up(B, tb)

    # Batch-in-lanes input layout: (F, D, B_pad), batch last.  Zero padding keeps the
    # padded rows finite (uniform softmax, zero output) and they are sliced off below.
    x = inputs.astype(compute_dtype)
    x = jnp.transpose(x, (1, 2, 0))
    if b_pad != B:
        x = jnp.pad(x, ((0, 0), (0, 0), (0, b_pad - B)))

    # Explicit VMEM budget (per-step estimate with double buffering + f32 intermediates),
    # clamped to stay within v7x's 64 MiB physical VMEM.
    xbytes = 2 if compute_dtype == jnp.bfloat16 else 4
    per_row = (2 * F * D * xbytes + 2 * D * 4
               + 4 * (2 * F * D + (L + 1) * D + H * D + L * H + H + 4 * L * F))
    weights_bytes = 4 * (L * H * D + L * H + H * D + H)
    vmem_limit = int(min(60 * 2 ** 20,
                         max(32 * 2 ** 20, int(1.5 * (tb * per_row + weights_bytes)))))

    out = pl.pallas_call(
        _hier_attn_kernel,
        out_shape=jax.ShapeDtypeStruct((D, b_pad), jnp.float32),
        grid=(b_pad // tb,),
        in_specs=[
            pl.BlockSpec((F, D, tb), lambda b: (0, 0, b)),
            pl.BlockSpec((L * H, D), lambda b: (0, 0)),
            pl.BlockSpec((L * H, 1), lambda b: (0, 0)),
            pl.BlockSpec((H, D, 1), lambda b: (0, 0, 0)),
            pl.BlockSpec((H, 1), lambda b: (0, 0)),
        ],
        out_specs=pl.BlockSpec((D, tb), lambda b: (0, b)),
        compiler_params=pltpu.CompilerParams(
            dimension_semantics=("parallel",),
            vmem_limit_bytes=vmem_limit),
    )(x, wt, ccol, wkt, ckcol)

    # Kernel emits a lane-dense (D, B_pad) slab; transpose back to (B, D) for the caller.
    return out[:, :B].T


def _reference(inputs, kernels_w, contexts_w, attn_kernel_w, attn_context_w):
    """Plain-JAX reference mirroring the PyTorch forward (no hoisting).
    Contractions use HIGHEST precision so the check is true f32 on any backend."""
    hp = jax.lax.Precision.HIGHEST
    L = kernels_w.shape[0]
    x = inputs.astype(jnp.float32)
    hrep = x
    u_list = []
    for i in range(L):
        h = jax.nn.relu(jnp.einsum("bfd,dh->bfh", x, kernels_w[i], precision=hp))
        aw = jnp.einsum("bfh,h->bf", h, contexts_w[i], precision=hp)[..., None]   # (B, F, 1)
        score = jax.nn.softmax(aw, axis=1)
        u = jnp.einsum("bof,bfd->bod", jnp.swapaxes(score, 1, 2), hrep, precision=hp)
        u_list.append(u)
        hrep = u * x + hrep
    A = jnp.concatenate(u_list, axis=1)                                            # (B, L, D)
    ah = jax.nn.relu(jnp.einsum("bld,dh->blh", A, attn_kernel_w, precision=hp))
    fwt = jnp.einsum("blh,h->bl", ah, attn_context_w, precision=hp)[..., None]     # (B, L, 1)
    fs = jax.nn.softmax(fwt, axis=1)
    out = jnp.einsum("bol,bld->bod", jnp.swapaxes(fs, 1, 2), A, precision=hp)
    return jnp.squeeze(out, axis=1)


if __name__ == "__main__":
    B, F, D, H, L = 2, 8, 32, 16, 4   # batch, fields, dim(=in_shape), hidden_size, n_layers

    key = jax.random.PRNGKey(0)
    keys = jax.random.split(key, 2 * L + 3)

    def bf16_round(a):
        # Demo data is kept exactly representable in bf16, so the single MXU matmul
        # (the only op whose operand precision depends on the backend / compute_dtype)
        # is exact in every configuration and the parity check is precision-robust.
        return a.astype(jnp.bfloat16).astype(jnp.float32)

    def xavier_normal(k, shape_out_in):
        # nn.init.xavier_normal_ for a torch Linear weight of shape (out, in).
        fan_out, fan_in = shape_out_in
        std = (2.0 / (fan_in + fan_out)) ** 0.5
        return std * jax.random.normal(k, shape_out_in, dtype=jnp.float32)

    inputs = bf16_round(jax.random.normal(keys[0], (B, F, D), dtype=jnp.float32))
    # torch Linear(in_shape, hidden) weight is (H, D); we store the transpose (D, H).
    kernels_w = bf16_round(jnp.stack(
        [xavier_normal(keys[1 + i], (H, D)).T for i in range(L)], axis=0))         # (L, D, H)
    # torch Linear(hidden, 1) weight is (1, H); stored as (H,) per layer.
    contexts_w = bf16_round(jnp.stack(
        [xavier_normal(keys[1 + L + i], (1, H))[0] for i in range(L)], axis=0))    # (L, H)
    attn_kernel_w = bf16_round(xavier_normal(keys[1 + 2 * L], (H, D)).T)           # (D, H)
    attn_context_w = bf16_round(xavier_normal(keys[2 + 2 * L], (1, H))[0])         # (H,)

    # 1) small batch, single grid step, default bf16 MXU operands.
    out = jax.block_until_ready(hierarchical_attn_agg(
        inputs, kernels_w, contexts_w, attn_kernel_w, attn_context_w))
    ref = jax.block_until_ready(_reference(
        inputs, kernels_w, contexts_w, attn_kernel_w, attn_context_w))
    assert out.shape == (B, D)
    assert jnp.allclose(out, ref, atol=2e-3, rtol=2e-3), "mismatch vs reference"

    # 2) batch not a multiple of the tile -> zero padding + multi-step grid,
    #    exercised for both the bf16 and the f32 compute paths.
    B2 = 200
    inputs2 = bf16_round(jax.random.normal(jax.random.PRNGKey(1), (B2, F, D),
                                           dtype=jnp.float32))
    ref2 = jax.block_until_ready(_reference(
        inputs2, kernels_w, contexts_w, attn_kernel_w, attn_context_w))

    out2 = jax.block_until_ready(hierarchical_attn_agg(
        inputs2, kernels_w, contexts_w, attn_kernel_w, attn_context_w,
        batch_tile=128, compute_dtype=jnp.bfloat16))
    assert out2.shape == (B2, D)
    assert jnp.allclose(out2, ref2, atol=2e-3, rtol=2e-3), "mismatch vs reference (tiled, bf16)"

    out3 = jax.block_until_ready(hierarchical_attn_agg(
        inputs2, kernels_w, contexts_w, attn_kernel_w, attn_context_w,
        batch_tile=128, compute_dtype=jnp.float32))
    assert jnp.allclose(out3, ref2, atol=2e-3, rtol=2e-3), "mismatch vs reference (tiled, f32)"

    print("KERNEL_OK")
</pallas_src>

<mosaic_0001>
module attributes {stable_mosaic.version = 11 : i64} {
  func.func @_hier_attn_kernel(%arg0: i32, %arg1: memref<8x32x128xbf16, #tpu.memory_space<vmem>>, %arg2: memref<64x32xbf16, #tpu.memory_space<vmem>>, %arg3: memref<64x1xf32, #tpu.memory_space<vmem>>, %arg4: memref<16x32x1xf32, #tpu.memory_space<vmem>>, %arg5: memref<16x1xf32, #tpu.memory_space<vmem>>, %arg6: memref<32x128xf32, #tpu.memory_space<vmem>>) attributes {dimension_semantics = [#tpu.dimension_semantics<parallel>], iteration_bounds = array<i64: 1>, scalar_prefetch = 0 : i64, scratch_operands = 0 : i64, tpu.core_type = #tpu.core_type<tc>, window_params = [{transform_indices = @transform_0, window_bounds = array<i64: 8, 32, 128>}, {pipeline_mode = #tpu.pipeline_mode<synchronous>, transform_indices = @transform_1, window_bounds = array<i64: 64, 32>}, {pipeline_mode = #tpu.pipeline_mode<synchronous>, transform_indices = @transform_2, window_bounds = array<i64: 64, 1>}, {pipeline_mode = #tpu.pipeline_mode<synchronous>, transform_indices = @transform_3, window_bounds = array<i64: 16, 32, 1>}, {pipeline_mode = #tpu.pipeline_mode<synchronous>, transform_indices = @transform_4, window_bounds = array<i64: 16, 1>}, {transform_indices = @transform_5, window_bounds = array<i64: 32, 128>}]} {
    %c0 = arith.constant 0 : index
    %c0_0 = arith.constant 0 : index
    %0 = vector.load %arg2[%c0, %c0_0] : memref<64x32xbf16, #tpu.memory_space<vmem>>, vector<64x32xbf16>
    %c0_1 = arith.constant 0 : index
    %c0_2 = arith.constant 0 : index
    %1 = vector.load %arg3[%c0_1, %c0_2] : memref<64x1xf32, #tpu.memory_space<vmem>>, vector<64x1xf32>
    %2 = vector.shape_cast %1 : vector<64x1xf32> to vector<64x1xf32>
    %3 = vector.broadcast %2 : vector<64x1xf32> to vector<64x128xf32>
    %c0_3 = arith.constant 0 : index
    %c0_4 = arith.constant 0 : index
    %c0_5 = arith.constant 0 : index
    %4 = vector.load %arg4[%c0_3, %c0_4, %c0_5] : memref<16x32x1xf32, #tpu.memory_space<vmem>>, vector<16x32x1xf32>
    %5 = vector.shape_cast %4 : vector<16x32x1xf32> to vector<16x32x1xf32>
    %6 = vector.broadcast %5 : vector<16x32x1xf32> to vector<16x32x128xf32>
    %c0_6 = arith.constant 0 : index
    %c0_7 = arith.constant 0 : index
    %7 = vector.load %arg5[%c0_6, %c0_7] : memref<16x1xf32, #tpu.memory_space<vmem>>, vector<16x1xf32>
    %8 = vector.shape_cast %7 : vector<16x1xf32> to vector<16x1xf32>
    %9 = vector.broadcast %8 : vector<16x1xf32> to vector<16x128xf32>
    %c0_8 = arith.constant 0 : index
    %c0_9 = arith.constant 0 : index
    %c0_10 = arith.constant 0 : index
    %10 = vector.load %arg1[%c0_8, %c0_9, %c0_10] : memref<8x32x128xbf16, #tpu.memory_space<vmem>>, vector<1x32x128xbf16>
    %11 = vector.shape_cast %10 : vector<1x32x128xbf16> to vector<32x128xbf16>
    %12 = arith.extf %11 : vector<32x128xbf16> to vector<32x128xf32>
    %cst = arith.constant dense<0.000000e+00> : vector<64x128xf32>
    %13 = tpu.matmul %0, %11, %cst {dimension_numbers = #tpu.dot_dimension_numbers<[1], [0], [0], [1], [0, 0, 1, 1], [], []>} : vector<64x32xbf16>, vector<32x128xbf16>, vector<64x128xf32> -> vector<64x128xf32>
    %cst_11 = arith.constant 0.000000e+00 : f32
    %14 = vector.broadcast %cst_11 : f32 to vector<64x128xf32>
    %15 = arith.maximumf %13, %14 : vector<64x128xf32>
    %16 = arith.mulf %15, %3 : vector<64x128xf32>
    %17 = vector.extract_strided_slice %16 {offsets = [0, 0], sizes = [16, 128], strides = [1, 1]} : vector<64x128xf32> to vector<16x128xf32>
    %cst_12 = arith.constant dense<0.000000e+00> : vector<128xf32>
    %18 = vector.multi_reduction <add>, %17, %cst_12 [0] : vector<16x128xf32> to vector<128xf32>
    %19 = vector.shape_cast %18 : vector<128xf32> to vector<1x128xf32>
    %20 = vector.extract_strided_slice %16 {offsets = [16, 0], sizes = [16, 128], strides = [1, 1]} : vector<64x128xf32> to vector<16x128xf32>
    %cst_13 = arith.constant dense<0.000000e+00> : vector<128xf32>
    %21 = vector.multi_reduction <add>, %20, %cst_13 [0] : vector<16x128xf32> to vector<128xf32>
    %22 = vector.shape_cast %21 : vector<128xf32> to vector<1x128xf32>
    %23 = vector.extract_strided_slice %16 {offsets = [32, 0], sizes = [16, 128], strides = [1, 1]} : vector<64x128xf32> to vector<16x128xf32>
    %cst_14 = arith.constant dense<0.000000e+00> : vector<128xf32>
    %24 = vector.multi_reduction <add>, %23, %cst_14 [0] : vector<16x128xf32> to vector<128xf32>
    %25 = vector.shape_cast %24 : vector<128xf32> to vector<1x128xf32>
    %26 = vector.extract_strided_slice %16 {offsets = [48, 0], sizes = [16, 128], strides = [1, 1]} : vector<64x128xf32> to vector<16x128xf32>
    %cst_15 = arith.constant dense<0.000000e+00> : vector<128xf32>
    %27 = vector.multi_reduction <add>, %26, %cst_15 [0] : vector<16x128xf32> to vector<128xf32>
    %28 = vector.shape_cast %27 : vector<128xf32> to vector<1x128xf32>
    %c1 = arith.constant 1 : index
    %c0_16 = arith.constant 0 : index
    %c0_17 = arith.constant 0 : index
    %29 = vector.load %arg1[%c1, %c0_16, %c0_17] : memref<8x32x128xbf16, #tpu.memory_space<vmem>>, vector<1x32x128xbf16>
    %30 = vector.shape_cast %29 : vector<1x32x128xbf16> to vector<32x128xbf16>
    %31 = arith.extf %30 : vector<32x128xbf16> to vector<32x128xf32>
    %cst_18 = arith.constant dense<0.000000e+00> : vector<64x128xf32>
    %32 = tpu.matmul %0, %30, %cst_18 {dimension_numbers = #tpu.dot_dimension_numbers<[1], [0], [0], [1], [0, 0, 1, 1], [], []>} : vector<64x32xbf16>, vector<32x128xbf16>, vector<64x128xf32> -> vector<64x128xf32>
    %cst_19 = arith.constant 0.000000e+00 : f32
    %33 = vector.broadcast %cst_19 : f32 to vector<64x128xf32>
    %34 = arith.maximumf %32, %33 : vector<64x128xf32>
    %35 = arith.mulf %34, %3 : vector<64x128xf32>
    %36 = vector.extract_strided_slice %35 {offsets = [0, 0], sizes = [16, 128], strides = [1, 1]} : vector<64x128xf32> to vector<16x128xf32>
    %cst_20 = arith.constant dense<0.000000e+00> : vector<128xf32>
    %37 = vector.multi_reduction <add>, %36, %cst_20 [0] : vector<16x128xf32> to vector<128xf32>
    %38 = vector.shape_cast %37 : vector<128xf32> to vector<1x128xf32>
    %39 = vector.extract_strided_slice %35 {offsets = [16, 0], sizes = [16, 128], strides = [1, 1]} : vector<64x128xf32> to vector<16x128xf32>
    %cst_21 = arith.constant dense<0.000000e+00> : vector<128xf32>
    %40 = vector.multi_reduction <add>, %39, %cst_21 [0] : vector<16x128xf32> to vector<128xf32>
    %41 = vector.shape_cast %40 : vector<128xf32> to vector<1x128xf32>
    %42 = vector.extract_strided_slice %35 {offsets = [32, 0], sizes = [16, 128], strides = [1, 1]} : vector<64x128xf32> to vector<16x128xf32>
    %cst_22 = arith.constant dense<0.000000e+00> : vector<128xf32>
    %43 = vector.multi_reduction <add>, %42, %cst_22 [0] : vector<16x128xf32> to vector<128xf32>
    %44 = vector.shape_cast %43 : vector<128xf32> to vector<1x128xf32>
    %45 = vector.extract_strided_slice %35 {offsets = [48, 0], sizes = [16, 128], strides = [1, 1]} : vector<64x128xf32> to vector<16x128xf32>
    %cst_23 = arith.constant dense<0.000000e+00> : vector<128xf32>
    %46 = vector.multi_reduction <add>, %45, %cst_23 [0] : vector<16x128xf32> to vector<128xf32>
    %47 = vector.shape_cast %46 : vector<128xf32> to vector<1x128xf32>
    %c2 = arith.constant 2 : index
    %c0_24 = arith.constant 0 : index
    %c0_25 = arith.constant 0 : index
    %48 = vector.load %arg1[%c2, %c0_24, %c0_25] : memref<8x32x128xbf16, #tpu.memory_space<vmem>>, vector<1x32x128xbf16>
    %49 = vector.shape_cast %48 : vector<1x32x128xbf16> to vector<32x128xbf16>
    %50 = arith.extf %49 : vector<32x128xbf16> to vector<32x128xf32>
    %cst_26 = arith.constant dense<0.000000e+00> : vector<64x128xf32>
    %51 = tpu.matmul %0, %49, %cst_26 {dimension_numbers = #tpu.dot_dimension_numbers<[1], [0], [0], [1], [0, 0, 1, 1], [], []>} : vector<64x32xbf16>, vector<32x128xbf16>, vector<64x128xf32> -> vector<64x128xf32>
    %cst_27 = arith.constant 0.000000e+00 : f32
    %52 = vector.broadcast %cst_27 : f32 to vector<64x128xf32>
    %53 = arith.maximumf %51, %52 : vector<64x128xf32>
    %54 = arith.mulf %53, %3 : vector<64x128xf32>
    %55 = vector.extract_strided_slice %54 {offsets = [0, 0], sizes = [16, 128], strides = [1, 1]} : vector<64x128xf32> to vector<16x128xf32>
    %cst_28 = arith.constant dense<0.000000e+00> : vector<128xf32>
    %56 = vector.multi_reduction <add>, %55, %cst_28 [0] : vector<16x128xf32> to vector<128xf32>
    %57 = vector.shape_cast %56 : vector<128xf32> to vector<1x128xf32>
    %58 = vector.extract_strided_slice %54 {offsets = [16, 0], sizes = [16, 128], strides = [1, 1]} : vector<64x128xf32> to vector<16x128xf32>
    %cst_29 = arith.constant dense<0.000000e+00> : vector<128xf32>
    %59 = vector.multi_reduction <add>, %58, %cst_29 [0] : vector<16x128xf32> to vector<128xf32>
    %60 = vector.shape_cast %59 : vector<128xf32> to vector<1x128xf32>
    %61 = vector.extract_strided_slice %54 {offsets = [32, 0], sizes = [16, 128], strides = [1, 1]} : vector<64x128xf32> to vector<16x128xf32>
    %cst_30 = arith.constant dense<0.000000e+00> : vector<128xf32>
    %62 = vector.multi_reduction <add>, %61, %cst_30 [0] : vector<16x128xf32> to vector<128xf32>
    %63 = vector.shape_cast %62 : vector<128xf32> to vector<1x128xf32>
    %64 = vector.extract_strided_slice %54 {offsets = [48, 0], sizes = [16, 128], strides = [1, 1]} : vector<64x128xf32> to vector<16x128xf32>
    %cst_31 = arith.constant dense<0.000000e+00> : vector<128xf32>
    %65 = vector.multi_reduction <add>, %64, %cst_31 [0] : vector<16x128xf32> to vector<128xf32>
    %66 = vector.shape_cast %65 : vector<128xf32> to vector<1x128xf32>
    %c3 = arith.constant 3 : index
    %c0_32 = arith.constant 0 : index
    %c0_33 = arith.constant 0 : index
    %67 = vector.load %arg1[%c3, %c0_32, %c0_33] : memref<8x32x128xbf16, #tpu.memory_space<vmem>>, vector<1x32x128xbf16>
    %68 = vector.shape_cast %67 : vector<1x32x128xbf16> to vector<32x128xbf16>
    %69 = arith.extf %68 : vector<32x128xbf16> to vector<32x128xf32>
    %cst_34 = arith.constant dense<0.000000e+00> : vector<64x128xf32>
    %70 = tpu.matmul %0, %68, %cst_34 {dimension_numbers = #tpu.dot_dimension_numbers<[1], [0], [0], [1], [0, 0, 1, 1], [], []>} : vector<64x32xbf16>, vector<32x128xbf16>, vector<64x128xf32> -> vector<64x128xf32>
    %cst_35 = arith.constant 0.000000e+00 : f32
    %71 = vector.broadcast %cst_35 : f32 to vector<64x128xf32>
    %72 = arith.maximumf %70, %71 : vector<64x128xf32>
    %73 = arith.mulf %72, %3 : vector<64x128xf32>
    %74 = vector.extract_strided_slice %73 {offsets = [0, 0], sizes = [16, 128], strides = [1, 1]} : vector<64x128xf32> to vector<16x128xf32>
    %cst_36 = arith.constant dense<0.000000e+00> : vector<128xf32>
    %75 = vector.multi_reduction <add>, %74, %cst_36 [0] : vector<16x128xf32> to vector<128xf32>
    %76 = vector.shape_cast %75 : vector<128xf32> to vector<1x128xf32>
    %77 = vector.extract_strided_slice %73 {offsets = [16, 0], sizes = [16, 128], strides = [1, 1]} : vector<64x128xf32> to vector<16x128xf32>
    %cst_37 = arith.constant dense<0.000000e+00> : vector<128xf32>
    %78 = vector.multi_reduction <add>, %77, %cst_37 [0] : vector<16x128xf32> to vector<128xf32>
    %79 = vector.shape_cast %78 : vector<128xf32> to vector<1x128xf32>
    %80 = vector.extract_strided_slice %73 {offsets = [32, 0], sizes = [16, 128], strides = [1, 1]} : vector<64x128xf32> to vector<16x128xf32>
    %cst_38 = arith.constant dense<0.000000e+00> : vector<128xf32>
    %81 = vector.multi_reduction <add>, %80, %cst_38 [0] : vector<16x128xf32> to vector<128xf32>
    %82 = vector.shape_cast %81 : vector<128xf32> to vector<1x128xf32>
    %83 = vector.extract_strided_slice %73 {offsets = [48, 0], sizes = [16, 128], strides = [1, 1]} : vector<64x128xf32> to vector<16x128xf32>
    %cst_39 = arith.constant dense<0.000000e+00> : vector<128xf32>
    %84 = vector.multi_reduction <add>, %83, %cst_39 [0] : vector<16x128xf32> to vector<128xf32>
    %85 = vector.shape_cast %84 : vector<128xf32> to vector<1x128xf32>
    %c4 = arith.constant 4 : index
    %c0_40 = arith.constant 0 : index
    %c0_41 = arith.constant 0 : index
    %86 = vector.load %arg1[%c4, %c0_40, %c0_41] : memref<8x32x128xbf16, #tpu.memory_space<vmem>>, vector<1x32x128xbf16>
    %87 = vector.shape_cast %86 : vector<1x32x128xbf16> to vector<32x128xbf16>
    %88 = arith.extf %87 : vector<32x128xbf16> to vector<32x128xf32>
    %cst_42 = arith.constant dense<0.000000e+00> : vector<64x128xf32>
    %89 = tpu.matmul %0, %87, %cst_42 {dimension_numbers = #tpu.dot_dimension_numbers<[1], [0], [0], [1], [0, 0, 1, 1], [], []>} : vector<64x32xbf16>, vector<32x128xbf16>, vector<64x128xf32> -> vector<64x128xf32>
    %cst_43 = arith.constant 0.000000e+00 : f32
    %90 = vector.broadcast %cst_43 : f32 to vector<64x128xf32>
    %91 = arith.maximumf %89, %90 : vector<64x128xf32>
    %92 = arith.mulf %91, %3 : vector<64x128xf32>
    %93 = vector.extract_strided_slice %92 {offsets = [0, 0], sizes = [16, 128], strides = [1, 1]} : vector<64x128xf32> to vector<16x128xf32>
    %cst_44 = arith.constant dense<0.000000e+00> : vector<128xf32>
    %94 = vector.multi_reduction <add>, %93, %cst_44 [0] : vector<16x128xf32> to vector<128xf32>
    %95 = vector.shape_cast %94 : vector<128xf32> to vector<1x128xf32>
    %96 = vector.extract_strided_slice %92 {offsets = [16, 0], sizes = [16, 128], strides = [1, 1]} : vector<64x128xf32> to vector<16x128xf32>
    %cst_45 = arith.constant dense<0.000000e+00> : vector<128xf32>
    %97 = vector.multi_reduction <add>, %96, %cst_45 [0] : vector<16x128xf32> to vector<128xf32>
    %98 = vector.shape_cast %97 : vector<128xf32> to vector<1x128xf32>
    %99 = vector.extract_strided_slice %92 {offsets = [32, 0], sizes = [16, 128], strides = [1, 1]} : vector<64x128xf32> to vector<16x128xf32>
    %cst_46 = arith.constant dense<0.000000e+00> : vector<128xf32>
    %100 = vector.multi_reduction <add>, %99, %cst_46 [0] : vector<16x128xf32> to vector<128xf32>
    %101 = vector.shape_cast %100 : vector<128xf32> to vector<1x128xf32>
    %102 = vector.extract_strided_slice %92 {offsets = [48, 0], sizes = [16, 128], strides = [1, 1]} : vector<64x128xf32> to vector<16x128xf32>
    %cst_47 = arith.constant dense<0.000000e+00> : vector<128xf32>
    %103 = vector.multi_reduction <add>, %102, %cst_47 [0] : vector<16x128xf32> to vector<128xf32>
    %104 = vector.shape_cast %103 : vector<128xf32> to vector<1x128xf32>
    %c5 = arith.constant 5 : index
    %c0_48 = arith.constant 0 : index
    %c0_49 = arith.constant 0 : index
    %105 = vector.load %arg1[%c5, %c0_48, %c0_49] : memref<8x32x128xbf16, #tpu.memory_space<vmem>>, vector<1x32x128xbf16>
    %106 = vector.shape_cast %105 : vector<1x32x128xbf16> to vector<32x128xbf16>
    %107 = arith.extf %106 : vector<32x128xbf16> to vector<32x128xf32>
    %cst_50 = arith.constant dense<0.000000e+00> : vector<64x128xf32>
    %108 = tpu.matmul %0, %106, %cst_50 {dimension_numbers = #tpu.dot_dimension_numbers<[1], [0], [0], [1], [0, 0, 1, 1], [], []>} : vector<64x32xbf16>, vector<32x128xbf16>, vector<64x128xf32> -> vector<64x128xf32>
    %cst_51 = arith.constant 0.000000e+00 : f32
    %109 = vector.broadcast %cst_51 : f32 to vector<64x128xf32>
    %110 = arith.maximumf %108, %109 : vector<64x128xf32>
    %111 = arith.mulf %110, %3 : vector<64x128xf32>
    %112 = vector.extract_strided_slice %111 {offsets = [0, 0], sizes = [16, 128], strides = [1, 1]} : vector<64x128xf32> to vector<16x128xf32>
    %cst_52 = arith.constant dense<0.000000e+00> : vector<128xf32>
    %113 = vector.multi_reduction <add>, %112, %cst_52 [0] : vector<16x128xf32> to vector<128xf32>
    %114 = vector.shape_cast %113 : vector<128xf32> to vector<1x128xf32>
    %115 = vector.extract_strided_slice %111 {offsets = [16, 0], sizes = [16, 128], strides = [1, 1]} : vector<64x128xf32> to vector<16x128xf32>
    %cst_53 = arith.constant dense<0.000000e+00> : vector<128xf32>
    %116 = vector.multi_reduction <add>, %115, %cst_53 [0] : vector<16x128xf32> to vector<128xf32>
    %117 = vector.shape_cast %116 : vector<128xf32> to vector<1x128xf32>
    %118 = vector.extract_strided_slice %111 {offsets = [32, 0], sizes = [16, 128], strides = [1, 1]} : vector<64x128xf32> to vector<16x128xf32>
    %cst_54 = arith.constant dense<0.000000e+00> : vector<128xf32>
    %119 = vector.multi_reduction <add>, %118, %cst_54 [0] : vector<16x128xf32> to vector<128xf32>
    %120 = vector.shape_cast %119 : vector<128xf32> to vector<1x128xf32>
    %121 = vector.extract_strided_slice %111 {offsets = [48, 0], sizes = [16, 128], strides = [1, 1]} : vector<64x128xf32> to vector<16x128xf32>
    %cst_55 = arith.constant dense<0.000000e+00> : vector<128xf32>
    %122 = vector.multi_reduction <add>, %121, %cst_55 [0] : vector<16x128xf32> to vector<128xf32>
    %123 = vector.shape_cast %122 : vector<128xf32> to vector<1x128xf32>
    %c6 = arith.constant 6 : index
    %c0_56 = arith.constant 0 : index
    %c0_57 = arith.constant 0 : index
    %124 = vector.load %arg1[%c6, %c0_56, %c0_57] : memref<8x32x128xbf16, #tpu.memory_space<vmem>>, vector<1x32x128xbf16>
    %125 = vector.shape_cast %124 : vector<1x32x128xbf16> to vector<32x128xbf16>
    %126 = arith.extf %125 : vector<32x128xbf16> to vector<32x128xf32>
    %cst_58 = arith.constant dense<0.000000e+00> : vector<64x128xf32>
    %127 = tpu.matmul %0, %125, %cst_58 {dimension_numbers = #tpu.dot_dimension_numbers<[1], [0], [0], [1], [0, 0, 1, 1], [], []>} : vector<64x32xbf16>, vector<32x128xbf16>, vector<64x128xf32> -> vector<64x128xf32>
    %cst_59 = arith.constant 0.000000e+00 : f32
    %128 = vector.broadcast %cst_59 : f32 to vector<64x128xf32>
    %129 = arith.maximumf %127, %128 : vector<64x128xf32>
    %130 = arith.mulf %129, %3 : vector<64x128xf32>
    %131 = vector.extract_strided_slice %130 {offsets = [0, 0], sizes = [16, 128], strides = [1, 1]} : vector<64x128xf32> to vector<16x128xf32>
    %cst_60 = arith.constant dense<0.000000e+00> : vector<128xf32>
    %132 = vector.multi_reduction <add>, %131, %cst_60 [0] : vector<16x128xf32> to vector<128xf32>
    %133 = vector.shape_cast %132 : vector<128xf32> to vector<1x128xf32>
    %134 = vector.extract_strided_slice %130 {offsets = [16, 0], sizes = [16, 128], strides = [1, 1]} : vector<64x128xf32> to vector<16x128xf32>
    %cst_61 = arith.constant dense<0.000000e+00> : vector<128xf32>
    %135 = vector.multi_reduction <add>, %134, %cst_61 [0] : vector<16x128xf32> to vector<128xf32>
    %136 = vector.shape_cast %135 : vector<128xf32> to vector<1x128xf32>
    %137 = vector.extract_strided_slice %130 {offsets = [32, 0], sizes = [16, 128], strides = [1, 1]} : vector<64x128xf32> to vector<16x128xf32>
    %cst_62 = arith.constant dense<0.000000e+00> : vector<128xf32>
    %138 = vector.multi_reduction <add>, %137, %cst_62 [0] : vector<16x128xf32> to vector<128xf32>
    %139 = vector.shape_cast %138 : vector<128xf32> to vector<1x128xf32>
    %140 = vector.extract_strided_slice %130 {offsets = [48, 0], sizes = [16, 128], strides = [1, 1]} : vector<64x128xf32> to vector<16x128xf32>
    %cst_63 = arith.constant dense<0.000000e+00> : vector<128xf32>
    %141 = vector.multi_reduction <add>, %140, %cst_63 [0] : vector<16x128xf32> to vector<128xf32>
    %142 = vector.shape_cast %141 : vector<128xf32> to vector<1x128xf32>
    %c7 = arith.constant 7 : index
    %c0_64 = arith.constant 0 : index
    %c0_65 = arith.constant 0 : index
    %143 = vector.load %arg1[%c7, %c0_64, %c0_65] : memref<8x32x128xbf16, #tpu.memory_space<vmem>>, vector<1x32x128xbf16>
    %144 = vector.shape_cast %143 : vector<1x32x128xbf16> to vector<32x128xbf16>
    %145 = arith.extf %144 : vector<32x128xbf16> to vector<32x128xf32>
    %cst_66 = arith.constant dense<0.000000e+00> : vector<64x128xf32>
    %146 = tpu.matmul %0, %144, %cst_66 {dimension_numbers = #tpu.dot_dimension_numbers<[1], [0], [0], [1], [0, 0, 1, 1], [], []>} : vector<64x32xbf16>, vector<32x128xbf16>, vector<64x128xf32> -> vector<64x128xf32>
    %cst_67 = arith.constant 0.000000e+00 : f32
    %147 = vector.broadcast %cst_67 : f32 to vector<64x128xf32>
    %148 = arith.maximumf %146, %147 : vector<64x128xf32>
    %149 = arith.mulf %148, %3 : vector<64x128xf32>
    %150 = vector.extract_strided_slice %149 {offsets = [0, 0], sizes = [16, 128], strides = [1, 1]} : vector<64x128xf32> to vector<16x128xf32>
    %cst_68 = arith.constant dense<0.000000e+00> : vector<128xf32>
    %151 = vector.multi_reduction <add>, %150, %cst_68 [0] : vector<16x128xf32> to vector<128xf32>
    %152 = vector.shape_cast %151 : vector<128xf32> to vector<1x128xf32>
    %153 = vector.extract_strided_slice %149 {offsets = [16, 0], sizes = [16, 128], strides = [1, 1]} : vector<64x128xf32> to vector<16x128xf32>
    %cst_69 = arith.constant dense<0.000000e+00> : vector<128xf32>
    %154 = vector.multi_reduction <add>, %153, %cst_69 [0] : vector<16x128xf32> to vector<128xf32>
    %155 = vector.shape_cast %154 : vector<128xf32> to vector<1x128xf32>
    %156 = vector.extract_strided_slice %149 {offsets = [32, 0], sizes = [16, 128], strides = [1, 1]} : vector<64x128xf32> to vector<16x128xf32>
    %cst_70 = arith.constant dense<0.000000e+00> : vector<128xf32>
    %157 = vector.multi_reduction <add>, %156, %cst_70 [0] : vector<16x128xf32> to vector<128xf32>
    %158 = vector.shape_cast %157 : vector<128xf32> to vector<1x128xf32>
    %159 = vector.extract_strided_slice %149 {offsets = [48, 0], sizes = [16, 128], strides = [1, 1]} : vector<64x128xf32> to vector<16x128xf32>
    %cst_71 = arith.constant dense<0.000000e+00> : vector<128xf32>
    %160 = vector.multi_reduction <add>, %159, %cst_71 [0] : vector<16x128xf32> to vector<128xf32>
    %161 = vector.shape_cast %160 : vector<128xf32> to vector<1x128xf32>
    %162 = arith.maximumf %19, %38 : vector<1x128xf32>
    %163 = arith.maximumf %162, %57 : vector<1x128xf32>
    %164 = arith.maximumf %163, %76 : vector<1x128xf32>
    %165 = arith.maximumf %164, %95 : vector<1x128xf32>
    %166 = arith.maximumf %165, %114 : vector<1x128xf32>
    %167 = arith.maximumf %166, %133 : vector<1x128xf32>
    %168 = arith.maximumf %167, %152 : vector<1x128xf32>
    %169 = arith.subf %19, %168 : vector<1x128xf32>
    %170 = math.exp %169 : vector<1x128xf32>
    %171 = arith.subf %38, %168 : vector<1x128xf32>
    %172 = math.exp %171 : vector<1x128xf32>
    %173 = arith.subf %57, %168 : vector<1x128xf32>
    %174 = math.exp %173 : vector<1x128xf32>
    %175 = arith.subf %76, %168 : vector<1x128xf32>
    %176 = math.exp %175 : vector<1x128xf32>
    %177 = arith.subf %95, %168 : vector<1x128xf32>
    %178 = math.exp %177 : vector<1x128xf32>
    %179 = arith.subf %114, %168 : vector<1x128xf32>
    %180 = math.exp %179 : vector<1x128xf32>
    %181 = arith.subf %133, %168 : vector<1x128xf32>
    %182 = math.exp %181 : vector<1x128xf32>
    %183 = arith.subf %152, %168 : vector<1x128xf32>
    %184 = math.exp %183 : vector<1x128xf32>
    %185 = arith.addf %170, %172 : vector<1x128xf32>
    %186 = arith.addf %185, %174 : vector<1x128xf32>
    %187 = arith.addf %186, %176 : vector<1x128xf32>
    %188 = arith.addf %187, %178 : vector<1x128xf32>
    %189 = arith.addf %188, %180 : vector<1x128xf32>
    %190 = arith.addf %189, %182 : vector<1x128xf32>
    %191 = arith.addf %190, %184 : vector<1x128xf32>
    %cst_72 = arith.constant 1.000000e+00 : f32
    %192 = vector.broadcast %cst_72 : f32 to vector<1x128xf32>
    %193 = arith.divf %192, %191 : vector<1x128xf32>
    %194 = arith.maximumf %22, %41 : vector<1x128xf32>
    %195 = arith.maximumf %194, %60 : vector<1x128xf32>
    %196 = arith.maximumf %195, %79 : vector<1x128xf32>
    %197 = arith.maximumf %196, %98 : vector<1x128xf32>
    %198 = arith.maximumf %197, %117 : vector<1x128xf32>
    %199 = arith.maximumf %198, %136 : vector<1x128xf32>
    %200 = arith.maximumf %199, %155 : vector<1x128xf32>
    %201 = arith.subf %22, %200 : vector<1x128xf32>
    %202 = math.exp %201 : vector<1x128xf32>
    %203 = arith.subf %41, %200 : vector<1x128xf32>
    %204 = math.exp %203 : vector<1x128xf32>
    %205 = arith.subf %60, %200 : vector<1x128xf32>
    %206 = math.exp %205 : vector<1x128xf32>
    %207 = arith.subf %79, %200 : vector<1x128xf32>
    %208 = math.exp %207 : vector<1x128xf32>
    %209 = arith.subf %98, %200 : vector<1x128xf32>
    %210 = math.exp %209 : vector<1x128xf32>
    %211 = arith.subf %117, %200 : vector<1x128xf32>
    %212 = math.exp %211 : vector<1x128xf32>
    %213 = arith.subf %136, %200 : vector<1x128xf32>
    %214 = math.exp %213 : vector<1x128xf32>
    %215 = arith.subf %155, %200 : vector<1x128xf32>
    %216 = math.exp %215 : vector<1x128xf32>
    %217 = arith.addf %202, %204 : vector<1x128xf32>
    %218 = arith.addf %217, %206 : vector<1x128xf32>
    %219 = arith.addf %218, %208 : vector<1x128xf32>
    %220 = arith.addf %219, %210 : vector<1x128xf32>
    %221 = arith.addf %220, %212 : vector<1x128xf32>
    %222 = arith.addf %221, %214 : vector<1x128xf32>
    %223 = arith.addf %222, %216 : vector<1x128xf32>
    %cst_73 = arith.constant 1.000000e+00 : f32
    %224 = vector.broadcast %cst_73 : f32 to vector<1x128xf32>
    %225 = arith.divf %224, %223 : vector<1x128xf32>
    %226 = arith.maximumf %25, %44 : vector<1x128xf32>
    %227 = arith.maximumf %226, %63 : vector<1x128xf32>
    %228 = arith.maximumf %227, %82 : vector<1x128xf32>
    %229 = arith.maximumf %228, %101 : vector<1x128xf32>
    %230 = arith.maximumf %229, %120 : vector<1x128xf32>
    %231 = arith.maximumf %230, %139 : vector<1x128xf32>
    %232 = arith.maximumf %231, %158 : vector<1x128xf32>
    %233 = arith.subf %25, %232 : vector<1x128xf32>
    %234 = math.exp %233 : vector<1x128xf32>
    %235 = arith.subf %44, %232 : vector<1x128xf32>
    %236 = math.exp %235 : vector<1x128xf32>
    %237 = arith.subf %63, %232 : vector<1x128xf32>
    %238 = math.exp %237 : vector<1x128xf32>
    %239 = arith.subf %82, %232 : vector<1x128xf32>
    %240 = math.exp %239 : vector<1x128xf32>
    %241 = arith.subf %101, %232 : vector<1x128xf32>
    %242 = math.exp %241 : vector<1x128xf32>
    %243 = arith.subf %120, %232 : vector<1x128xf32>
    %244 = math.exp %243 : vector<1x128xf32>
    %245 = arith.subf %139, %232 : vector<1x128xf32>
    %246 = math.exp %245 : vector<1x128xf32>
    %247 = arith.subf %158, %232 : vector<1x128xf32>
    %248 = math.exp %247 : vector<1x128xf32>
    %249 = arith.addf %234, %236 : vector<1x128xf32>
    %250 = arith.addf %249, %238 : vector<1x128xf32>
    %251 = arith.addf %250, %240 : vector<1x128xf32>
    %252 = arith.addf %251, %242 : vector<1x128xf32>
    %253 = arith.addf %252, %244 : vector<1x128xf32>
    %254 = arith.addf %253, %246 : vector<1x128xf32>
    %255 = arith.addf %254, %248 : vector<1x128xf32>
    %cst_74 = arith.constant 1.000000e+00 : f32
    %256 = vector.broadcast %cst_74 : f32 to vector<1x128xf32>
    %257 = arith.divf %256, %255 : vector<1x128xf32>
    %258 = arith.maximumf %28, %47 : vector<1x128xf32>
    %259 = arith.maximumf %258, %66 : vector<1x128xf32>
    %260 = arith.maximumf %259, %85 : vector<1x128xf32>
    %261 = arith.maximumf %260, %104 : vector<1x128xf32>
    %262 = arith.maximumf %261, %123 : vector<1x128xf32>
    %263 = arith.maximumf %262, %142 : vector<1x128xf32>
    %264 = arith.maximumf %263, %161 : vector<1x128xf32>
    %265 = arith.subf %28, %264 : vector<1x128xf32>
    %266 = math.exp %265 : vector<1x128xf32>
    %267 = arith.subf %47, %264 : vector<1x128xf32>
    %268 = math.exp %267 : vector<1x128xf32>
    %269 = arith.subf %66, %264 : vector<1x128xf32>
    %270 = math.exp %269 : vector<1x128xf32>
    %271 = arith.subf %85, %264 : vector<1x128xf32>
    %272 = math.exp %271 : vector<1x128xf32>
    %273 = arith.subf %104, %264 : vector<1x128xf32>
    %274 = math.exp %273 : vector<1x128xf32>
    %275 = arith.subf %123, %264 : vector<1x128xf32>
    %276 = math.exp %275 : vector<1x128xf32>
    %277 = arith.subf %142, %264 : vector<1x128xf32>
    %278 = math.exp %277 : vector<1x128xf32>
    %279 = arith.subf %161, %264 : vector<1x128xf32>
    %280 = math.exp %279 : vector<1x128xf32>
    %281 = arith.addf %266, %268 : vector<1x128xf32>
    %282 = arith.addf %281, %270 : vector<1x128xf32>
    %283 = arith.addf %282, %272 : vector<1x128xf32>
    %284 = arith.addf %283, %274 : vector<1x128xf32>
    %285 = arith.addf %284, %276 : vector<1x128xf32>
    %286 = arith.addf %285, %278 : vector<1x128xf32>
    %287 = arith.addf %286, %280 : vector<1x128xf32>
    %cst_75 = arith.constant 1.000000e+00 : f32
    %288 = vector.broadcast %cst_75 : f32 to vector<1x128xf32>
    %289 = arith.divf %288, %287 : vector<1x128xf32>
    %cst_76 = arith.constant 1.000000e+00 : f32
    %290 = vector.broadcast %cst_76 : f32 to vector<32x128xf32>
    %291 = vector.broadcast %170 : vector<1x128xf32> to vector<32x128xf32>
    %292 = arith.mulf %291, %12 : vector<32x128xf32>
    %293 = vector.broadcast %172 : vector<1x128xf32> to vector<32x128xf32>
    %294 = arith.mulf %293, %31 : vector<32x128xf32>
    %295 = arith.addf %292, %294 : vector<32x128xf32>
    %296 = vector.broadcast %174 : vector<1x128xf32> to vector<32x128xf32>
    %297 = arith.mulf %296, %50 : vector<32x128xf32>
    %298 = arith.addf %295, %297 : vector<32x128xf32>
    %299 = vector.broadcast %176 : vector<1x128xf32> to vector<32x128xf32>
    %300 = arith.mulf %299, %69 : vector<32x128xf32>
    %301 = arith.addf %298, %300 : vector<32x128xf32>
    %302 = vector.broadcast %178 : vector<1x128xf32> to vector<32x128xf32>
    %303 = arith.mulf %302, %88 : vector<32x128xf32>
    %304 = arith.addf %301, %303 : vector<32x128xf32>
    %305 = vector.broadcast %180 : vector<1x128xf32> to vector<32x128xf32>
    %306 = arith.mulf %305, %107 : vector<32x128xf32>
    %307 = arith.addf %304, %306 : vector<32x128xf32>
    %308 = vector.broadcast %182 : vector<1x128xf32> to vector<32x128xf32>
    %309 = arith.mulf %308, %126 : vector<32x128xf32>
    %310 = arith.addf %307, %309 : vector<32x128xf32>
    %311 = vector.broadcast %184 : vector<1x128xf32> to vector<32x128xf32>
    %312 = arith.mulf %311, %145 : vector<32x128xf32>
    %313 = arith.addf %310, %312 : vector<32x128xf32>
    %314 = vector.broadcast %193 : vector<1x128xf32> to vector<32x128xf32>
    %315 = arith.mulf %313, %314 : vector<32x128xf32>
    %316 = arith.mulf %315, %290 : vector<32x128xf32>
    %317 = arith.addf %290, %316 : vector<32x128xf32>
    %318 = vector.shape_cast %316 : vector<32x128xf32> to vector<1x32x128xf32>
    %319 = vector.broadcast %318 : vector<1x32x128xf32> to vector<16x32x128xf32>
    %320 = arith.mulf %6, %319 : vector<16x32x128xf32>
    %cst_77 = arith.constant dense<0.000000e+00> : vector<16x128xf32>
    %321 = vector.multi_reduction <add>, %320, %cst_77 [1] : vector<16x32x128xf32> to vector<16x128xf32>
    %cst_78 = arith.constant 0.000000e+00 : f32
    %322 = vector.broadcast %cst_78 : f32 to vector<16x128xf32>
    %323 = arith.maximumf %321, %322 : vector<16x128xf32>
    %324 = arith.mulf %323, %9 : vector<16x128xf32>
    %cst_79 = arith.constant dense<0.000000e+00> : vector<128xf32>
    %325 = vector.multi_reduction <add>, %324, %cst_79 [0] : vector<16x128xf32> to vector<128xf32>
    %326 = vector.shape_cast %325 : vector<128xf32> to vector<1x128xf32>
    %327 = vector.broadcast %202 : vector<1x128xf32> to vector<32x128xf32>
    %328 = arith.mulf %327, %12 : vector<32x128xf32>
    %329 = vector.broadcast %204 : vector<1x128xf32> to vector<32x128xf32>
    %330 = arith.mulf %329, %31 : vector<32x128xf32>
    %331 = arith.addf %328, %330 : vector<32x128xf32>
    %332 = vector.broadcast %206 : vector<1x128xf32> to vector<32x128xf32>
    %333 = arith.mulf %332, %50 : vector<32x128xf32>
    %334 = arith.addf %331, %333 : vector<32x128xf32>
    %335 = vector.broadcast %208 : vector<1x128xf32> to vector<32x128xf32>
    %336 = arith.mulf %335, %69 : vector<32x128xf32>
    %337 = arith.addf %334, %336 : vector<32x128xf32>
    %338 = vector.broadcast %210 : vector<1x128xf32> to vector<32x128xf32>
    %339 = arith.mulf %338, %88 : vector<32x128xf32>
    %340 = arith.addf %337, %339 : vector<32x128xf32>
    %341 = vector.broadcast %212 : vector<1x128xf32> to vector<32x128xf32>
    %342 = arith.mulf %341, %107 : vector<32x128xf32>
    %343 = arith.addf %340, %342 : vector<32x128xf32>
    %344 = vector.broadcast %214 : vector<1x128xf32> to vector<32x128xf32>
    %345 = arith.mulf %344, %126 : vector<32x128xf32>
    %346 = arith.addf %343, %345 : vector<32x128xf32>
    %347 = vector.broadcast %216 : vector<1x128xf32> to vector<32x128xf32>
    %348 = arith.mulf %347, %145 : vector<32x128xf32>
    %349 = arith.addf %346, %348 : vector<32x128xf32>
    %350 = vector.broadcast %225 : vector<1x128xf32> to vector<32x128xf32>
    %351 = arith.mulf %349, %350 : vector<32x128xf32>
    %352 = arith.mulf %351, %317 : vector<32x128xf32>
    %353 = arith.addf %317, %352 : vector<32x128xf32>
    %354 = vector.shape_cast %352 : vector<32x128xf32> to vector<1x32x128xf32>
    %355 = vector.broadcast %354 : vector<1x32x128xf32> to vector<16x32x128xf32>
    %356 = arith.mulf %6, %355 : vector<16x32x128xf32>
    %cst_80 = arith.constant dense<0.000000e+00> : vector<16x128xf32>
    %357 = vector.multi_reduction <add>, %356, %cst_80 [1] : vector<16x32x128xf32> to vector<16x128xf32>
    %cst_81 = arith.constant 0.000000e+00 : f32
    %358 = vector.broadcast %cst_81 : f32 to vector<16x128xf32>
    %359 = arith.maximumf %357, %358 : vector<16x128xf32>
    %360 = arith.mulf %359, %9 : vector<16x128xf32>
    %cst_82 = arith.constant dense<0.000000e+00> : vector<128xf32>
    %361 = vector.multi_reduction <add>, %360, %cst_82 [0] : vector<16x128xf32> to vector<128xf32>
    %362 = vector.shape_cast %361 : vector<128xf32> to vector<1x128xf32>
    %363 = vector.broadcast %234 : vector<1x128xf32> to vector<32x128xf32>
    %364 = arith.mulf %363, %12 : vector<32x128xf32>
    %365 = vector.broadcast %236 : vector<1x128xf32> to vector<32x128xf32>
    %366 = arith.mulf %365, %31 : vector<32x128xf32>
    %367 = arith.addf %364, %366 : vector<32x128xf32>
    %368 = vector.broadcast %238 : vector<1x128xf32> to vector<32x128xf32>
    %369 = arith.mulf %368, %50 : vector<32x128xf32>
    %370 = arith.addf %367, %369 : vector<32x128xf32>
    %371 = vector.broadcast %240 : vector<1x128xf32> to vector<32x128xf32>
    %372 = arith.mulf %371, %69 : vector<32x128xf32>
    %373 = arith.addf %370, %372 : vector<32x128xf32>
    %374 = vector.broadcast %242 : vector<1x128xf32> to vector<32x128xf32>
    %375 = arith.mulf %374, %88 : vector<32x128xf32>
    %376 = arith.addf %373, %375 : vector<32x128xf32>
    %377 = vector.broadcast %244 : vector<1x128xf32> to vector<32x128xf32>
    %378 = arith.mulf %377, %107 : vector<32x128xf32>
    %379 = arith.addf %376, %378 : vector<32x128xf32>
    %380 = vector.broadcast %246 : vector<1x128xf32> to vector<32x128xf32>
    %381 = arith.mulf %380, %126 : vector<32x128xf32>
    %382 = arith.addf %379, %381 : vector<32x128xf32>
    %383 = vector.broadcast %248 : vector<1x128xf32> to vector<32x128xf32>
    %384 = arith.mulf %383, %145 : vector<32x128xf32>
    %385 = arith.addf %382, %384 : vector<32x128xf32>
    %386 = vector.broadcast %257 : vector<1x128xf32> to vector<32x128xf32>
    %387 = arith.mulf %385, %386 : vector<32x128xf32>
    %388 = arith.mulf %387, %353 : vector<32x128xf32>
    %389 = arith.addf %353, %388 : vector<32x128xf32>
    %390 = vector.shape_cast %388 : vector<32x128xf32> to vector<1x32x128xf32>
    %391 = vector.broadcast %390 : vector<1x32x128xf32> to vector<16x32x128xf32>
    %392 = arith.mulf %6, %391 : vector<16x32x128xf32>
    %cst_83 = arith.constant dense<0.000000e+00> : vector<16x128xf32>
    %393 = vector.multi_reduction <add>, %392, %cst_83 [1] : vector<16x32x128xf32> to vector<16x128xf32>
    %cst_84 = arith.constant 0.000000e+00 : f32
    %394 = vector.broadcast %cst_84 : f32 to vector<16x128xf32>
    %395 = arith.maximumf %393, %394 : vector<16x128xf32>
    %396 = arith.mulf %395, %9 : vector<16x128xf32>
    %cst_85 = arith.constant dense<0.000000e+00> : vector<128xf32>
    %397 = vector.multi_reduction <add>, %396, %cst_85 [0] : vector<16x128xf32> to vector<128xf32>
    %398 = vector.shape_cast %397 : vector<128xf32> to vector<1x128xf32>
    %399 = vector.broadcast %266 : vector<1x128xf32> to vector<32x128xf32>
    %400 = arith.mulf %399, %12 : vector<32x128xf32>
    %401 = vector.broadcast %268 : vector<1x128xf32> to vector<32x128xf32>
    %402 = arith.mulf %401, %31 : vector<32x128xf32>
    %403 = arith.addf %400, %402 : vector<32x128xf32>
    %404 = vector.broadcast %270 : vector<1x128xf32> to vector<32x128xf32>
    %405 = arith.mulf %404, %50 : vector<32x128xf32>
    %406 = arith.addf %403, %405 : vector<32x128xf32>
    %407 = vector.broadcast %272 : vector<1x128xf32> to vector<32x128xf32>
    %408 = arith.mulf %407, %69 : vector<32x128xf32>
    %409 = arith.addf %406, %408 : vector<32x128xf32>
    %410 = vector.broadcast %274 : vector<1x128xf32> to vector<32x128xf32>
    %411 = arith.mulf %410, %88 : vector<32x128xf32>
    %412 = arith.addf %409, %411 : vector<32x128xf32>
    %413 = vector.broadcast %276 : vector<1x128xf32> to vector<32x128xf32>
    %414 = arith.mulf %413, %107 : vector<32x128xf32>
    %415 = arith.addf %412, %414 : vector<32x128xf32>
    %416 = vector.broadcast %278 : vector<1x128xf32> to vector<32x128xf32>
    %417 = arith.mulf %416, %126 : vector<32x128xf32>
    %418 = arith.addf %415, %417 : vector<32x128xf32>
    %419 = vector.broadcast %280 : vector<1x128xf32> to vector<32x128xf32>
    %420 = arith.mulf %419, %145 : vector<32x128xf32>
    %421 = arith.addf %418, %420 : vector<32x128xf32>
    %422 = vector.broadcast %289 : vector<1x128xf32> to vector<32x128xf32>
    %423 = arith.mulf %421, %422 : vector<32x128xf32>
    %424 = arith.mulf %423, %389 : vector<32x128xf32>
    %425 = vector.shape_cast %424 : vector<32x128xf32> to vector<1x32x128xf32>
    %426 = vector.broadcast %425 : vector<1x32x128xf32> to vector<16x32x128xf32>
    %427 = arith.mulf %6, %426 : vector<16x32x128xf32>
    %cst_86 = arith.constant dense<0.000000e+00> : vector<16x128xf32>
    %428 = vector.multi_reduction <add>, %427, %cst_86 [1] : vector<16x32x128xf32> to vector<16x128xf32>
    %cst_87 = arith.constant 0.000000e+00 : f32
    %429 = vector.broadcast %cst_87 : f32 to vector<16x128xf32>
    %430 = arith.maximumf %428, %429 : vector<16x128xf32>
    %431 = arith.mulf %430, %9 : vector<16x128xf32>
    %cst_88 = arith.constant dense<0.000000e+00> : vector<128xf32>
    %432 = vector.multi_reduction <add>, %431, %cst_88 [0] : vector<16x128xf32> to vector<128xf32>
    %433 = vector.shape_cast %432 : vector<128xf32> to vector<1x128xf32>
    %434 = arith.maximumf %326, %362 : vector<1x128xf32>
    %435 = arith.maximumf %434, %398 : vector<1x128xf32>
    %436 = arith.maximumf %435, %433 : vector<1x128xf32>
    %437 = arith.subf %326, %436 : vector<1x128xf32>
    %438 = math.exp %437 : vector<1x128xf32>
    %439 = arith.subf %362, %436 : vector<1x128xf32>
    %440 = math.exp %439 : vector<1x128xf32>
    %441 = arith.subf %398, %436 : vector<1x128xf32>
    %442 = math.exp %441 : vector<1x128xf32>
    %443 = arith.subf %433, %436 : vector<1x128xf32>
    %444 = math.exp %443 : vector<1x128xf32>
    %445 = arith.addf %438, %440 : vector<1x128xf32>
    %446 = arith.addf %445, %442 : vector<1x128xf32>
    %447 = arith.addf %446, %444 : vector<1x128xf32>
    %448 = vector.broadcast %438 : vector<1x128xf32> to vector<32x128xf32>
    %449 = arith.mulf %448, %316 : vector<32x128xf32>
    %450 = vector.broadcast %440 : vector<1x128xf32> to vector<32x128xf32>
    %451 = arith.mulf %450, %352 : vector<32x128xf32>
    %452 = arith.addf %449, %451 : vector<32x128xf32>
    %453 = vector.broadcast %442 : vector<1x128xf32> to vector<32x128xf32>
    %454 = arith.mulf %453, %388 : vector<32x128xf32>
    %455 = arith.addf %452, %454 : vector<32x128xf32>
    %456 = vector.broadcast %444 : vector<1x128xf32> to vector<32x128xf32>
    %457 = arith.mulf %456, %424 : vector<32x128xf32>
    %458 = arith.addf %455, %457 : vector<32x128xf32>
    %cst_89 = arith.constant 1.000000e+00 : f32
    %459 = vector.broadcast %cst_89 : f32 to vector<1x128xf32>
    %460 = arith.divf %459, %447 : vector<1x128xf32>
    %461 = vector.broadcast %460 : vector<1x128xf32> to vector<32x128xf32>
    %462 = arith.mulf %458, %461 : vector<32x128xf32>
    %c0_90 = arith.constant 0 : index
    %c0_91 = arith.constant 0 : index
    %463 = vector.load %arg6[%c0_90, %c0_91] : memref<32x128xf32, #tpu.memory_space<vmem>>, vector<32x128xf32>
    tpu.vector_store %arg6[%c0_90, %c0_91], %462 {strides = array<i32>} : memref<32x128xf32, #tpu.memory_space<vmem>>, vector<32x128xf32>,
    return
  }
  func.func @transform_0(%arg0: i32) -> (i32, i32, i32) {
    %c0_i32 = arith.constant 0 : i32
    %c0_i32_0 = arith.constant 0 : i32
    %c0_i32_1 = arith.constant 0 : i32
    return %c0_i32, %c0_i32_0, %arg0 : i32, i32, i32
  }
  func.func @transform_1(%arg0: i32) -> (i32, i32) {
    %c0_i32 = arith.constant 0 : i32
    %c0_i32_0 = arith.constant 0 : i32
    %c0_i32_1 = arith.constant 0 : i32
    return %c0_i32, %c0_i32_0 : i32, i32
  }
  func.func @transform_2(%arg0: i32) -> (i32, i32) {
    %c0_i32 = arith.constant 0 : i32
    %c0_i32_0 = arith.constant 0 : i32
    %c0_i32_1 = arith.constant 0 : i32
    return %c0_i32, %c0_i32_0 : i32, i32
  }
  func.func @transform_3(%arg0: i32) -> (i32, i32, i32) {
    %c0_i32 = arith.constant 0 : i32
    %c0_i32_0 = arith.constant 0 : i32
    %c0_i32_1 = arith.constant 0 : i32
    %c0_i32_2 = arith.constant 0 : i32
    return %c0_i32, %c0_i32_0, %c0_i32_1 : i32, i32, i32
  }
  func.func @transform_4(%arg0: i32) -> (i32, i32) {
    %c0_i32 = arith.constant 0 : i32
    %c0_i32_0 = arith.constant 0 : i32
    %c0_i32_1 = arith.constant 0 : i32
    return %c0_i32, %c0_i32_0 : i32, i32
  }
  func.func @transform_5(%arg0: i32) -> (i32, i32) {
    %c0_i32 = arith.constant 0 : i32
    %c0_i32_0 = arith.constant 0 : i32
    return %c0_i32, %arg0 : i32, i32
  }
}

</mosaic_0001>

<bundles_post_ra>
// kernel: tpu_custom_call.1
= control target key start
LH: loop header
LB: loop body
LE: loop exit
PB: predicated region body
PF: predicated region fallthrough
CT: control target
= control target key end

     0   :  { %v3667_v3 = vmov 0   ;;  %vm512_vm0 = vcmask 261120   ;;  %s6334_s0 = inlined_call_operand.vmem [shape: bf16[8,32,128], index: 0, kind: input, shape index: {}]   ;;  %s6335_s1 = inlined_call_operand.vmem [shape: bf16[64,32], index: 1, kind: input, shape index: {}]   ;;  %s6336_s2 = inlined_call_operand.vmem [shape: f32[64,1], index: 2, kind: input, shape index: {}]   ;;  %s6337_s3 = inlined_call_operand.vmem [shape: f32[16,32,1], index: 3, kind: input, shape index: {}]   ;;  %s6338_s4 = inlined_call_operand.vmem [shape: f32[16,1], index: 4, kind: input, shape index: {}]   ;;  %s6339_s5 = inlined_call_operand.hbm [shape: f32[32,128], index: 5, kind: output, shape index: {}]  }
   0x1   :  { %v32_v0 = vld [vmem:[%s6336_s2 + $0x10] sm:$0xff]  ;;  %v30_v1 = vld [vmem:[%s6336_s2] sm:$0xff]  ;;  %3514 = vset.pattern.permute.xlu1 %v3667_v3  ;;  %3513 = vset.pattern.permute.xlu0 %v3667_v3  ;;  %v33_v5 = vld [vmem:[%s6336_s2 + $0x18] sm:$0xff] }
   0x2   :  { %v3710_v2 = vld [vmem:[%s6334_s0] sm:$0xff]   ;;  %v3715_v4 = vld [vmem:[%s6334_s0 + $0x10] sm:$0xff]   ;;  %50 = vperm.xlu1 %3514, %v32_v0   ;;  %40 = vperm.xlu0 %3513, %v30_v1   ;;  %v3723_v6 = vld [vmem:[%s6334_s0 + $0x8] sm:$0xff]  }
   0x3   :  { %v3728_v7 = vld [vmem:[%s6334_s0 + $0x18] sm:$0xff]   ;;  %3413 = vmatprep.subr.bf16.mxu0 %v3710_v2  ;;  %v31_v8 = vld [vmem:[%s6336_s2 + $0x8] sm:$0xff]  ;;  %3425 = vmatprep.subr.bf16.mxu1 %v3715_v4  ;;  %v3739_v9 = vld [vmem:[%s6335_s1] sm:$0xff]  }
   0x4   :  { %3414 = vmatpush3.bf16.msra.mxu0 %v3710_v2  ;;  %3426 = vmatpush3.bf16.msra.mxu1 %v3715_v4  ;;  %v3746_v10 = vld [vmem:[%s6334_s0 + $0x20] sm:$0xff]   ;;  %v3751_v11 = vld [vmem:[%s6334_s0 + $0x30] sm:$0xff]   ;;  %v35_v12 = vld [vmem:[%s6336_s2 + $0x28] sm:$0xff] }
   0x5   :  { %3415 = vmatprep.subr.bf16.mxu0 %v3723_v6  ;;  %v34_v13 = vld [vmem:[%s6336_s2 + $0x20] sm:$0xff]  ;;  %3427 = vmatprep.subr.bf16.mxu1 %v3728_v7  ;;  %v3765_v14 = vld [vmem:[%s6335_s1 + $0x8] sm:$0xff]   ;;  %v3775_v15 = vld [vmem:[%s6335_s1 + $0x10] sm:$0xff]  }
   0x6   :  { %55 = vperm.xlu1 %3514, %v33_v5   ;;  %45 = vperm.xlu0 %3513, %v31_v8   ;;  %v3780_v16 = vld [vmem:[%s6334_s0 + $0x28] sm:$0xff]   ;;  %v3317_v17 = vld [vmem:[%s6334_s0 + $0x38] sm:$0xff]   ;;  %v36_v19 = vld [vmem:[%s6336_s2 + $0x30] sm:$0xff] }
   0x7   :  { %3417 = vmatprep.mubr.msk.bf16.mxu0 %vm512_vm0, %v3739_v9  ;;  %3429 = vmatprep.mubr.msk.bf16.mxu1 %vm512_vm0, %v3739_v9  ;;  %v37_v18 = vld [vmem:[%s6336_s2 + $0x38] sm:$0xff]  ;;  %v3325_v20 = vld [vmem:[%s6334_s0 + $0x40] sm:$0xff]   ;;  %v3335_v21 = vld [vmem:[%s6334_s0 + $0x50] sm:$0xff]  }
   0x8   :  { %3416 = vmatpush3.bf16.msra.mxu0 %v3723_v6  ;;  %3428 = vmatpush3.bf16.msra.mxu1 %v3728_v7  ;;  %v79_v22 = vld [vmem:[%s6337_s3 + $0x8] sm:$0xff]  ;;  %v78_v23 = vld [vmem:[%s6337_s3] sm:$0xff]  ;;  %v3817_v24 = vld [vmem:[%s6335_s1 + $0x18] sm:$0xff]  }
   0x9   :  { %3437 = vmatprep.subr.bf16.mxu0 %v3746_v10  ;;  %3449 = vmatprep.subr.bf16.mxu1 %v3751_v11  ;;  %v81_v25 = vld [vmem:[%s6337_s3 + $0x18] sm:$0xff]  ;;  %v80_v26 = vld [vmem:[%s6337_s3 + $0x10] sm:$0xff]  ;;  %v83_v27 = vld [vmem:[%s6337_s3 + $0x28] sm:$0xff] }
   0xa   :  { %65 = vperm.xlu1 %3514, %v35_v12   ;;  %60 = vperm.xlu0 %3513, %v34_v13   ;;  %v82_v28 = vld [vmem:[%s6337_s3 + $0x20] sm:$0xff]  ;;  %v3327_v29 = vld [vmem:[%s6334_s0 + $0x48] sm:$0xff]   ;;  %v3337_v30 = vld [vmem:[%s6334_s0 + $0x58] sm:$0xff]  }
   0xb   :  { %3418 = vmatmul.mubr.msk.bf16.vlgmr.msra.gmra.mrb[0].mxu0 %vm512_vm0, %v3765_v14  ;;  %3430 = vmatmul.mubr.msk.bf16.vlgmr.msra.gmra.mrb[0].mxu1 %vm512_vm0, %v3765_v14  ;;  %v3345_v31 = vld [vmem:[%s6334_s0 + $0x60] sm:$0xff]   ;;  %v85_v32 = vld [vmem:[%s6337_s3 + $0x38] sm:$0xff]  ;;  %v84_v33 = vld [vmem:[%s6337_s3 + $0x30] sm:$0xff] }
   0xc   :  { %3438 = vmatpush3.bf16.msra.mxu0 %v3746_v10  ;;  %3450 = vmatpush3.bf16.msra.mxu1 %v3751_v11  ;;  %v3355_v34 = vld [vmem:[%s6334_s0 + $0x70] sm:$0xff]   ;;  %v87_v35 = vld [vmem:[%s6337_s3 + $0x48] sm:$0xff]  ;;  %v86_v36 = vld [vmem:[%s6337_s3 + $0x40] sm:$0xff] }
   0xd   :  { %3421 = vmatprep.mubr.msk.bf16.mxu0 %vm512_vm0, %v3775_v15  ;;  %3433 = vmatprep.mubr.msk.bf16.mxu1 %vm512_vm0, %v3775_v15 }
   0xe   :  { %75 = vperm.xlu1 %3514, %v37_v18   ;;  %70 = vperm.xlu0 %3513, %v36_v19  }
   0xf   :  { %3439 = vmatprep.subr.bf16.mxu0 %v3780_v16  ;;  %3451 = vmatprep.subr.bf16.mxu1 %v3317_v17 }
  0x10   :  { %3440 = vmatpush3.bf16.msra.mxu0 %v3780_v16  ;;  %3452 = vmatpush3.bf16.msra.mxu1 %v3317_v17 }
  0x11   :  { %3461 = vmatprep.subr.bf16.mxu0 %v3325_v20  ;;  %3473 = vmatprep.subr.bf16.mxu1 %v3335_v21 }
  0x12   :  { %149 = vperm.xlu1 %3514, %v79_v22   ;;  %144 = vperm.xlu0 %3513, %v78_v23  }
  0x13   :  { %3422 = vmatmul.mubr.msk.bf16.gmra.mrb[4].mxu0 %vm512_vm0, %v3817_v24  ;;  %3434 = vmatmul.mubr.msk.bf16.gmra.mrb[4].mxu1 %vm512_vm0, %v3817_v24 }
  0x14   :  { %3441 = vmatprep.mubr.msk.bf16.mxu0 %vm512_vm0, %v3739_v9  ;;  %3453 = vmatprep.mubr.msk.bf16.mxu1 %vm512_vm0, %v3739_v9 }
  0x16   :  { %159 = vperm.xlu1 %3514, %v81_v25   ;;  %154 = vperm.xlu0 %3513, %v80_v26  }
  0x1a   :  { %169 = vperm.xlu1 %3514, %v83_v27   ;;  %164 = vperm.xlu0 %3513, %v82_v28  }
  0x1b   :  { %3442 = vmatmul.mubr.msk.bf16.vlgmr.msra.gmra.mrb[8].mxu0 %vm512_vm0, %v3765_v14  ;;  %3454 = vmatmul.mubr.msk.bf16.vlgmr.msra.gmra.mrb[8].mxu1 %vm512_vm0, %v3765_v14 }
  0x1c   :  { %3462 = vmatpush3.bf16.msra.mxu0 %v3325_v20  ;;  %3474 = vmatpush3.bf16.msra.mxu1 %v3335_v21 }
  0x1d   :  { %3445 = vmatprep.mubr.msk.bf16.mxu0 %vm512_vm0, %v3775_v15  ;;  %3457 = vmatprep.mubr.msk.bf16.mxu1 %vm512_vm0, %v3775_v15 }
  0x1e   :  { %179 = vperm.xlu1 %3514, %v85_v32   ;;  %174 = vperm.xlu0 %3513, %v84_v33  }
  0x1f   :  { %3463 = vmatprep.subr.bf16.mxu0 %v3327_v29  ;;  %3475 = vmatprep.subr.bf16.mxu1 %v3337_v30 }
  0x20   :  { %3464 = vmatpush3.bf16.msra.mxu0 %v3327_v29  ;;  %3476 = vmatpush3.bf16.msra.mxu1 %v3337_v30 }
  0x21   :  { %3485 = vmatprep.subr.bf16.mxu0 %v3345_v31 }
  0x22   :  { %189 = vperm.xlu1 %3514, %v87_v35   ;;  %184 = vperm.xlu0 %3513, %v86_v36  }
  0x23   :  { %10 = vsyncpa [#allocation3], 0  ;;  %3446 = vmatmul.mubr.msk.bf16.gmra.mrb[12].mxu0 %vm512_vm0, %v3817_v24  ;;  %v89_v37 = vld [vmem:[%s6337_s3 + $0x58] sm:$0xff]  ;;  %v88_v38 = vld [vmem:[%s6337_s3 + $0x50] sm:$0xff]  ;;  %3497 = vmatprep.subr.bf16.mxu1 %v3355_v34  ;;  %vm2059_vm1 = vcmask 1041409   ;;  %vm2062_vm2 = vcmask 1042434  }
  0x24   :  { %3458 = vmatmul.mubr.msk.bf16.gmra.mrb[12].mxu1 %vm512_vm0, %v3817_v24  ;;  %3465 = vmatprep.mubr.msk.bf16.mxu0 %vm512_vm0, %v3739_v9  ;;  %v91_v39 = vld [vmem:[%s6337_s3 + $0x68] sm:$0xff]  ;;  %v90_v40 = vld [vmem:[%s6337_s3 + $0x60] sm:$0xff]  ;;  %v3357_v42 = vld [vmem:[%s6334_s0 + $0x78] sm:$0xff]   ;;  %vm2065_vm3 = vcmask 1043459   ;;  %vm2068_vm4 = vcmask 1044484   ;;  %vm2071_vm5 = vcmask 1045509  }
  0x25   :  { %3477 = vmatprep.mubr.msk.bf16.mxu1 %vm512_vm0, %v3739_v9  ;;  %v3347_v41 = vld [vmem:[%s6334_s0 + $0x68] sm:$0xff]   ;;  %v93_v43 = vld [vmem:[%s6337_s3 + $0x78] sm:$0xff]  ;;  %v92_v44 = vld [vmem:[%s6337_s3 + $0x70] sm:$0xff]  ;;  %vm2074_vm6 = vcmask 1046534   ;;  %vm2077_vm7 = vcmask 1047559  }
  0x26   :  { %199 = vperm.xlu1 %3514, %v89_v37   ;;  %194 = vperm.xlu0 %3513, %v88_v38   ;;  %v95_v45 = vld [vmem:[%s6337_s3 + $0x88] sm:$0xff]  ;;  %v94_v46 = vld [vmem:[%s6337_s3 + $0x80] sm:$0xff]  ;;  %v97_v47 = vld [vmem:[%s6337_s3 + $0x98] sm:$0xff] }
  0x27   :  { %v96_v48 = vld [vmem:[%s6337_s3 + $0x90] sm:$0xff]  ;;  %v99_v49 = vld [vmem:[%s6337_s3 + $0xa8] sm:$0xff]  ;;  %v98_v50 = vld [vmem:[%s6337_s3 + $0xa0] sm:$0xff] }
  0x28   :  { %v101_v51 = vld [vmem:[%s6337_s3 + $0xb8] sm:$0xff]  ;;  %v100_v52 = vld [vmem:[%s6337_s3 + $0xb0] sm:$0xff]  ;;  %v103_v53 = vld [vmem:[%s6337_s3 + $0xc8] sm:$0xff] }
  0x29   :  { %v102_v54 = vld [vmem:[%s6337_s3 + $0xc0] sm:$0xff]  ;;  %v105_v55 = vld [vmem:[%s6337_s3 + $0xd8] sm:$0xff]  ;;  %v104_v56 = vld [vmem:[%s6337_s3 + $0xd0] sm:$0xff] }
  0x2a   :  { %209 = vperm.xlu1 %3514, %v91_v39   ;;  %204 = vperm.xlu0 %3513, %v90_v40   ;;  %v115_v57 = vld [vmem:[%s6337_s3 + $0x128] sm:$0xff]  ;;  %v114_v58 = vld [vmem:[%s6337_s3 + $0x120] sm:$0xff]  ;;  %v116_v0 = vld [vmem:[%s6337_s3 + $0x130] sm:$0xff] }
  0x2b   :  { %3466 = vmatmul.mubr.msk.bf16.vlgmr.msra.gmra.mrb[16].mxu0 %vm512_vm0, %v3765_v14  ;;  %v119_v59 = vld [vmem:[%s6337_s3 + $0x148] sm:$0xff]  ;;  %v118_v60 = vld [vmem:[%s6337_s3 + $0x140] sm:$0xff]  ;;  %v120_v1 = vld [vmem:[%s6337_s3 + $0x150] sm:$0xff] }
  0x2c   :  { %3478 = vmatmul.mubr.msk.bf16.vlgmr.msra.gmra.mrb[16].mxu1 %vm512_vm0, %v3765_v14  ;;  %3486 = vmatpush3.bf16.msra.mxu0 %v3345_v31  ;;  %v111_v61 = vld [vmem:[%s6337_s3 + $0x108] sm:$0xff]  ;;  %v110_v62 = vld [vmem:[%s6337_s3 + $0x100] sm:$0xff]  ;;  %v112_v12 = vld [vmem:[%s6337_s3 + $0x110] sm:$0xff] }
  0x2d   :  { %3498 = vmatpush3.bf16.msra.mxu1 %v3355_v34  ;;  %3469 = vmatprep.mubr.msk.bf16.mxu0 %vm512_vm0, %v3775_v15  ;;  %v122_v63 = vld [vmem:[%s6337_s3 + $0x160] sm:$0xff]  ;;  %v123_v3 = vld [vmem:[%s6337_s3 + $0x168] sm:$0xff]  ;;  %v128_v19 = vld [vmem:[%s6337_s3 + $0x190] sm:$0xff] }
  0x2e   :  { %219 = vperm.xlu1 %3514, %v93_v43   ;;  %214 = vperm.xlu0 %3513, %v92_v44   ;;  %v127_v5 = vld [vmem:[%s6337_s3 + $0x188] sm:$0xff]  ;;  %v126_v8 = vld [vmem:[%s6337_s3 + $0x180] sm:$0xff]  ;;  %v113_v22 = vld [vmem:[%s6337_s3 + $0x118] sm:$0xff] }
  0x2f   :  { %3481 = vmatprep.mubr.msk.bf16.mxu1 %vm512_vm0, %v3775_v15  ;;  %3487 = vmatprep.subr.bf16.mxu0 %v3347_v41  ;;  %v130_v13 = vld [vmem:[%s6337_s3 + $0x1a0] sm:$0xff]  ;;  %v131_v17 = vld [vmem:[%s6337_s3 + $0x1a8] sm:$0xff]  ;;  %v125_v25 = vld [vmem:[%s6337_s3 + $0x178] sm:$0xff] }
  0x30   :  { %3488 = vmatpush3.bf16.msra.mxu0 %v3347_v41  ;;  %3499 = vmatprep.subr.bf16.mxu1 %v3357_v42  ;;  %v134_v18 = vld [vmem:[%s6337_s3 + $0x1c0] sm:$0xff]  ;;  %v135_v21 = vld [vmem:[%s6337_s3 + $0x1c8] sm:$0xff]  ;;  %v136_v28 = vld [vmem:[%s6337_s3 + $0x1d0] sm:$0xff] }
  0x31   :  { %3500 = vmatpush3.bf16.msra.mxu1 %v3357_v42  ;;  %v106_v20 = vld [vmem:[%s6337_s3 + $0xe0] sm:$0xff]  ;;  %v107_v23 = vld [vmem:[%s6337_s3 + $0xe8] sm:$0xff]  ;;  %v129_v29 = vld [vmem:[%s6337_s3 + $0x198] sm:$0xff] }
  0x32   :  { %229 = vperm.xlu1 %3514, %v95_v45   ;;  %224 = vperm.xlu0 %3513, %v94_v46   ;;  %v139_v26 = vld [vmem:[%s6337_s3 + $0x1e8] sm:$0xff]  ;;  %v138_v27 = vld [vmem:[%s6337_s3 + $0x1e0] sm:$0xff]  ;;  %v133_v30 = vld [vmem:[%s6337_s3 + $0x1b8] sm:$0xff] }
  0x33   :  { %3470 = vmatmul.mubr.msk.bf16.gmra.mrb[20].mxu0 %vm512_vm0, %v3817_v24  ;;  %v108_v31 = vld [vmem:[%s6337_s3 + $0xf0] sm:$0xff]  ;;  %v137_v32 = vld [vmem:[%s6337_s3 + $0x1d8] sm:$0xff]  ;;  %v463_v36 = vld [vmem:[%s6338_s4 + $0x8] sm:$0xff] }
  0x34   :  { %3482 = vmatmul.mubr.msk.bf16.gmra.mrb[20].mxu1 %vm512_vm0, %v3817_v24  ;;  %3489 = vmatprep.mubr.msk.bf16.mxu0 %vm512_vm0, %v3739_v9  ;;  %v140_v33 = vld [vmem:[%s6337_s3 + $0x1f0] sm:$0xff]  ;;  %v141_v34 = vld [vmem:[%s6337_s3 + $0x1f8] sm:$0xff]  ;;  %v462_v37 = vld [vmem:[%s6338_s4] sm:$0xff] }
  0x35   :  { %3501 = vmatprep.mubr.msk.bf16.mxu1 %vm512_vm0, %v3739_v9  ;;  %v117_v9 = vld [vmem:[%s6337_s3 + $0x138] sm:$0xff] }
  0x36   :  { %239 = vperm.xlu1 %3514, %v97_v47   ;;  %234 = vperm.xlu0 %3513, %v96_v48   ;;  %v109_v35 = vld [vmem:[%s6337_s3 + $0xf8] sm:$0xff] }
  0x3a   :  { %249 = vperm.xlu1 %3514, %v99_v49   ;;  %244 = vperm.xlu0 %3513, %v98_v50  }
  0x3b   :  { %3490 = vmatmul.mubr.msk.bf16.vlgmr.msra.gmra.mrb[24].mxu0 %vm512_vm0, %v3765_v14 }
  0x3c   :  { %3502 = vmatmul.mubr.msk.bf16.vlgmr.msra.gmra.mrb[24].mxu1 %vm512_vm0, %v3765_v14  ;;  %3493 = vmatprep.mubr.msk.bf16.mxu0 %vm512_vm0, %v3775_v15  ;;  %v124_v14 = vld [vmem:[%s6337_s3 + $0x170] sm:$0xff] }
  0x3d   :  { %3505 = vmatprep.mubr.msk.bf16.mxu1 %vm512_vm0, %v3775_v15  ;;  %v121_v15 = vld [vmem:[%s6337_s3 + $0x158] sm:$0xff] }
  0x3e   :  { %259 = vperm.xlu1 %3514, %v101_v51   ;;  %254 = vperm.xlu0 %3513, %v100_v52  }
  0x42   :  { %269 = vperm.xlu1 %3514, %v103_v53   ;;  %264 = vperm.xlu0 %3513, %v102_v54  }
  0x43   :  { %3494 = vmatmul.mubr.msk.bf16.gmra.mrb[28].mxu0 %vm512_vm0, %v3817_v24 }
  0x44   :  { %3506 = vmatmul.mubr.msk.bf16.gmra.mrb[28].mxu1 %vm512_vm0, %v3817_v24  ;;  %v132_v24 = vld [vmem:[%s6337_s3 + $0x1b0] sm:$0xff] }
  0x46   :  { %279 = vperm.xlu1 %3514, %v105_v55   ;;  %274 = vperm.xlu0 %3513, %v104_v56  }
  0x4a   :  { %329 = vperm.xlu1 %3514, %v115_v57   ;;  %324 = vperm.xlu0 %3513, %v114_v58   ;;  %v4120_v57 = vunpack.c.l.bf16 %v3710_v2 }
  0x4c   :  { %6514 = vst [vmem:[#allocation15_spill] sm:$0xff] %v4120_v57 }
  0x4e   :  { %349 = vperm.xlu1 %3514, %v119_v59   ;;  %344 = vperm.xlu0 %3513, %v118_v60  }
  0x52   :  { %309 = vperm.xlu1 %3514, %v111_v61   ;;  %304 = vperm.xlu0 %3513, %v110_v62   ;;  %v4123_v61 = vunpack.c.h.bf16 %v3710_v2  ;;  %v4126_v62 = vunpack.c.l.bf16 %v3715_v4  ;;  %v4138_v2 = vunpack.c.l.bf16 %v3728_v7 }
  0x54   :  { %6515 = vst [vmem:[#allocation16_spill] sm:$0xff] %v4123_v61  ;;  %6516 = vst [vmem:[#allocation17_spill] sm:$0xff] %v4126_v62 }
  0x55   :  { %6520 = vst [vmem:[#allocation21_spill] sm:$0xff] %v4138_v2 }
  0x56   :  { %364 = vperm.xlu1 %3514, %v122_v63   ;;  %334 = vperm.xlu0 %3513, %v116_v0   ;;  %v4129_v63 = vunpack.c.h.bf16 %v3715_v4 }
  0x58   :  { %6517 = vst [vmem:[#allocation18_spill] sm:$0xff] %v4129_v63 }
  0x5a   :  { %354 = vperm.xlu1 %3514, %v120_v1   ;;  %369 = vperm.xlu0 %3513, %v123_v3  }
  0x5e   :  { %389 = vperm.xlu1 %3514, %v127_v5   ;;  %384 = vperm.xlu0 %3513, %v126_v8   ;;  %v4132_v5 = vunpack.c.l.bf16 %v3723_v6  ;;  %v4135_v8 = vunpack.c.h.bf16 %v3723_v6 }
  0x60   :  { %6518 = vst [vmem:[#allocation19_spill] sm:$0xff] %v4132_v5  ;;  %6519 = vst [vmem:[#allocation20_spill] sm:$0xff] %v4135_v8 }
  0x62   :  { %339 = vperm.xlu1 %3514, %v117_v9   ;;  %314 = vperm.xlu0 %3513, %v112_v12  }
  0x66   :  { %404 = vperm.xlu1 %3514, %v130_v13   ;;  %374 = vperm.xlu0 %3513, %v124_v14   ;;  %v4141_v14 = vunpack.c.h.bf16 %v3728_v7 }
  0x68   :  { %6521 = vst [vmem:[#allocation22_spill] sm:$0xff] %v4141_v14 }
  0x6a   :  { %359 = vperm.xlu1 %3514, %v121_v15   ;;  %409 = vperm.xlu0 %3513, %v131_v17  }
  0x6e   :  { %424 = vperm.xlu1 %3514, %v134_v18   ;;  %394 = vperm.xlu0 %3513, %v128_v19   ;;  %v4144_v18 = vunpack.c.l.bf16 %v3746_v10 }
  0x70   :  { %6522 = vst [vmem:[#allocation23_spill] sm:$0xff] %v4144_v18 }
  0x72   :  { %284 = vperm.xlu1 %3514, %v106_v20   ;;  %429 = vperm.xlu0 %3513, %v135_v21  }
  0x76   :  { %319 = vperm.xlu1 %3514, %v113_v22   ;;  %289 = vperm.xlu0 %3513, %v107_v23   ;;  %v4149_v22 = vunpack.c.h.bf16 %v3746_v10 }
  0x78   :  { %6523 = vst [vmem:[#allocation24_spill] sm:$0xff] %v4149_v22 }
  0x7a   :  { %414 = vperm.xlu1 %3514, %v132_v24   ;;  %379 = vperm.xlu0 %3513, %v125_v25   ;;  %v4154_v25 = vunpack.c.l.bf16 %v3751_v11 }
  0x7c   :  { %6524 = vst [vmem:[#allocation25_spill] sm:$0xff] %v4154_v25 }
  0x7e   :  { %449 = vperm.xlu1 %3514, %v139_v26   ;;  %444 = vperm.xlu0 %3513, %v138_v27  }
  0x81   :  { %v4083_v38 = vpop.permute.xlu1 %50  ;;  %v4085_v39 = vpop.permute.xlu0 %40 }
  0x82   :  { %434 = vperm.xlu1 %3514, %v136_v28   ;;  %399 = vperm.xlu0 %3513, %v129_v29  }
  0x85   :  { %v4087_v40 = vpop.permute.xlu1 %55  ;;  %v4089_v41 = vpop.permute.xlu0 %45 }
  0x86   :  { %419 = vperm.xlu1 %3514, %v133_v30   ;;  %294 = vperm.xlu0 %3513, %v108_v31   ;;  %v4161_v30 = vunpack.c.h.bf16 %v3751_v11 }
  0x88   :  { %6526 = vst [vmem:[#allocation27_spill] sm:$0xff] %v4161_v30 }
  0x89   :  { %v4091_v42 = vpop.permute.xlu1 %65  ;;  %v4093_v43 = vpop.permute.xlu0 %60 }
  0x8a   :  { %439 = vperm.xlu1 %3514, %v137_v32   ;;  %454 = vperm.xlu0 %3513, %v140_v33  }
  0x8d   :  { %v4095_v44 = vpop.permute.xlu1 %75  ;;  %v4097_v45 = vpop.permute.xlu0 %70 }
  0x8e   :  { %459 = vperm.xlu1 %3514, %v141_v34   ;;  %299 = vperm.xlu0 %3513, %v109_v35   ;;  %v4168_v35 = vunpack.c.l.bf16 %v3780_v16 }
  0x90   :  { %6528 = vst [vmem:[#allocation29_spill] sm:$0xff] %v4168_v35 }
  0x91   :  { %v4099_v46 = vpop.permute.xlu1 %149  ;;  %v4101_v47 = vpop.permute.xlu0 %144 }
  0x92   :  { %470 = vperm.xlu1 %3514, %v463_v36   ;;  %466 = vperm.xlu0 %3513, %v462_v37   ;;  %6504 = vst [vmem:[#allocation5_spill] sm:$0xff] %v4099_v46  ;;  %6505 = vst [vmem:[#allocation6_spill] sm:$0xff] %v4101_v47 }
  0x95   :  { %v4103_v48 = vpop.permute.xlu1 %159  ;;  %v4105_v49 = vpop.permute.xlu0 %154 }
  0x96   :  { %6506 = vst [vmem:[#allocation7_spill] sm:$0xff] %v4103_v48  ;;  %6507 = vst [vmem:[#allocation8_spill] sm:$0xff] %v4105_v49 }
  0x99   :  { %v4107_v50 = vpop.permute.xlu1 %169  ;;  %v4109_v51 = vpop.permute.xlu0 %164 }
  0x9a   :  { %6508 = vst [vmem:[#allocation9_spill] sm:$0xff] %v4107_v50  ;;  %6509 = vst [vmem:[#allocation10_spill] sm:$0xff] %v4109_v51 }
  0x9d   :  { %v4111_v52 = vpop.permute.xlu1 %179  ;;  %v4113_v53 = vpop.permute.xlu0 %174 }
  0x9e   :  { %6510 = vst [vmem:[#allocation11_spill] sm:$0xff] %v4111_v52  ;;  %6511 = vst [vmem:[#allocation12_spill] sm:$0xff] %v4113_v53 }
  0xa1   :  { %v4115_v54 = vpop.permute.xlu1 %189  ;;  %v4117_v55 = vpop.permute.xlu0 %184 }
  0xa2   :  { %6512 = vst [vmem:[#allocation13_spill] sm:$0xff] %v4115_v54  ;;  %6513 = vst [vmem:[#allocation14_spill] sm:$0xff] %v4117_v55 }
  0xa5   :  { %v4156_v26 = vpop.permute.xlu1 %199  ;;  %v4163_v10 = vpop.permute.xlu0 %194 }
  0xa6   :  { %6525 = vst [vmem:[#allocation26_spill] sm:$0xff] %v4156_v26  ;;  %6527 = vst [vmem:[#allocation28_spill] sm:$0xff] %v4163_v10 }
  0xde   :  { %v3419_v56 = vpop.f32.mrb[0].mxu0  ;;  %v3431_v59 = vpop.f32.mrb[0].mxu1 }
  0xdf   :  { %v592_v58 = vmax.f32 %v3419_v56, 0.0  ;;  %v559_v60 = vpop.f32.mrb[1].mxu0  ;;  %v722_v0 = vmax.f32 %v3431_v59, 0.0  ;;  %v689_v1 = vpop.f32.mrb[1].mxu1 }
  0xe0   :  { %v3420_v3 = vpop.f32.mrb[2].mxu0  ;;  %v590_v9 = vmax.f32 %v559_v60, 0.0  ;;  %v3432_v13 = vpop.f32.mrb[2].mxu1  ;;  %v720_v4 = vmax.f32 %v689_v1, 0.0 }
  0xe1   :  { %v593_v12 = vmax.f32 %v3420_v3, 0.0  ;;  %v723_v15 = vmax.f32 %v3432_v13, 0.0  ;;  %v562_v17 = vpop.f32.mrb[3].mxu0  ;;  %v600_v19 = vmul.f32 %v592_v58, %v4083_v38  ;;  %v692_v21 = vpop.f32.mrb[3].mxu1  ;;  %v730_v23 = vmul.f32 %v722_v0, %v4083_v38 }
  0xe2   :  { %v591_v20 = vmax.f32 %v562_v17, 0.0  ;;  %v721_v24 = vmax.f32 %v692_v21, 0.0  ;;  %v598_v27 = vmul.f32 %v590_v9, %v4085_v39  ;;  %v728_v31 = vmul.f32 %v720_v4, %v4085_v39 }
  0xe3   :  { %v601_v6 = vmul.f32 %v593_v12, %v4087_v40  ;;  %v731_v7 = vmul.f32 %v723_v15, %v4087_v40 }
  0xe4   :  { %v599_v29 = vmul.f32 %v591_v20, %v4089_v41  ;;  %v729_v33 = vmul.f32 %v721_v24, %v4089_v41 }
  0xe5   :  { %v613_v28 = vadd.f32 %v601_v6, %v600_v19  ;;  %v743_v32 = vadd.f32 %v731_v7, %v730_v23 }
  0xe6   :  { %v3423_v34 = vpop.f32.mrb[4].mxu0  ;;  %v606_v37 = vadd.f32 %v599_v29, %v598_v27  ;;  %v3435_v58 = vpop.f32.mrb[4].mxu1  ;;  %v736_v0 = vadd.f32 %v729_v33, %v728_v31 }
  0xe7   :  { %v614_v36 = vrot.slane %v613_v28, 4  ;;  %v596_v56 = vmax.f32 %v3423_v34, 0.0  ;;  %v575_v59 = vpop.f32.mrb[5].mxu0  ;;  %v744_v60 = vrot.slane %v743_v32, 4  ;;  %v726_v11 = vmax.f32 %v3435_v58, 0.0  ;;  %v705_v3 = vpop.f32.mrb[5].mxu1 }
  0xe8   :  { %v594_v1 = vmax.f32 %v575_v59, 0.0  ;;  %v3424_v9 = vpop.f32.mrb[6].mxu0  ;;  %v607_v13 = vrot.slane %v606_v37, 4  ;;  %v724_v15 = vmax.f32 %v705_v3, 0.0  ;;  %v3436_v17 = vpop.f32.mrb[6].mxu1  ;;  %v737_v16 = vrot.slane %v736_v0, 4 }
  0xe9   :  { %v615_v12 = vadd.f32 %v614_v36, %v613_v28  ;;  %v604_v4 = vmul.f32 %v596_v56, %v4097_v45  ;;  %v745_v19 = vadd.f32 %v744_v60, %v743_v32  ;;  %v734_v6 = vmul.f32 %v726_v11, %v4097_v45  ;;  %v578_v21 = vpop.f32.mrb[7].mxu0  ;;  %v708_v29 = vpop.f32.mrb[7].mxu1 }
  0xea   :  { %v602_v20 = vmul.f32 %v594_v1, %v4093_v43  ;;  %v608_v7 = vadd.f32 %v607_v13, %v606_v37  ;;  %v732_v24 = vmul.f32 %v724_v15, %v4093_v43  ;;  %v597_v27 = vmax.f32 %v3424_v9, 0.0  ;;  %v4174_v36 = vpop.permute.xlu1 %209  ;;  %v4177_v60 = vpop.permute.xlu0 %204 }
  0xeb   :  { %v616_v23 = vrot.slane %v615_v12, 2  ;;  %v746_v31 = vrot.slane %v745_v19, 2  ;;  %v738_v28 = vadd.f32 %v737_v16, %v736_v0  ;;  %v727_v33 = vmax.f32 %v3436_v17, 0.0  ;;  %6529 = vst [vmem:[#allocation30_spill] sm:$0xff] %v4174_v36  ;;  %6530 = vst [vmem:[#allocation31_spill] sm:$0xff] %v4177_v60 }
  0xec   :  { %v595_v34 = vmax.f32 %v578_v21, 0.0  ;;  %v609_v32 = vrot.slane %v608_v7, 2  ;;  %v605_v58 = vmul.f32 %v597_v27, %v4095_v44  ;;  %v725_v59 = vmax.f32 %v708_v29, 0.0 }
  0xed   :  { %v617_v56 = vadd.f32 %v616_v23, %v615_v12  ;;  %v747_v11 = vadd.f32 %v746_v31, %v745_v19  ;;  %v739_v1 = vrot.slane %v738_v28, 2  ;;  %v735_v37 = vmul.f32 %v727_v33, %v4095_v44 }
  0xee   :  { %v603_v3 = vmul.f32 %v595_v34, %v4091_v42  ;;  %v3443_v9 = vpop.f32.mrb[8].mxu0  ;;  %v610_v0 = vadd.f32 %v609_v32, %v608_v7  ;;  %v627_v15 = vadd.f32 %v605_v58, %v604_v4  ;;  %v733_v17 = vmul.f32 %v725_v59, %v4091_v42  ;;  %v3455_v16 = vpop.f32.mrb[8].mxu1 }
  0xef   :  { %v618_v13 = vrot.slane %v617_v56, 1  ;;  %v819_v12 = vpop.f32.mrb[9].mxu0  ;;  %v748_v21 = vrot.slane %v747_v11, 1  ;;  %v740_v23 = vadd.f32 %v739_v1, %v738_v28  ;;  %v757_v27 = vadd.f32 %v735_v37, %v734_v6  ;;  %v949_v36 = vpop.f32.mrb[9].mxu1 }
  0xf0   :  { %v620_v29 = vadd.f32 %v603_v3, %v602_v20  ;;  %v3444_v60 = vpop.f32.mrb[10].mxu0  ;;  %v611_v31 = vrot.slane %v610_v0, 1  ;;  %v628_v33 = vrot.slane %v627_v15, 4  ;;  %v750_v26 = vadd.f32 %v733_v17, %v732_v24  ;;  %v3456_v34 = vpop.f32.mrb[10].mxu1 }
  0xf1   :  { %v4182_v19 = vadd.f32 %v618_v13, %v617_v56  ;;  %v4184_v10 = vadd.f32 %v748_v21, %v747_v11  ;;  %v741_v7 = vrot.slane %v740_v23, 1  ;;  %v758_v4 = vrot.slane %v757_v27, 4  ;;  %v822_v58 = vpop.f32.mrb[11].mxu0  ;;  %v952_v20 = vpop.f32.mrb[11].mxu1 }
  0xf2   :  { %v621_v32 = vrot.slane %v620_v29, 4  ;;  %v4186_v59 = vadd.f32 %v611_v31, %v610_v0  ;;  %v629_v54 = vadd.f32 %v628_v33, %v627_v15  ;;  %v751_v28 = vrot.slane %v750_v26, 4  ;;  %v4192_v3 = vpop.permute.xlu1 %219  ;;  %v4195_v0 = vpop.permute.xlu0 %214 }
  0xf3   :  { %6531 = vst [vmem:[#allocation32_spill] sm:$0xff] %v4184_v10  ;;  %v852_v6 = vmax.f32 %v3443_v9, 0.0  ;;  %v4190_v1 = vadd.f32 %v741_v7, %v740_v23  ;;  %v759_v37 = vadd.f32 %v758_v4, %v757_v27  ;;  %6534 = vst [vmem:[#allocation35_spill] sm:$0xff] %v4192_v3  ;;  %v982_v21 = vmax.f32 %v3455_v16, 0.0 }
  0xf4   :  { %6532 = vst [vmem:[#allocation33_spill] sm:$0xff] %v4186_v59  ;;  %v622_v24 = vadd.f32 %v621_v32, %v620_v29  ;;  %v630_v11 = vrot.slane %v629_v54, 2  ;;  %v752_v13 = vadd.f32 %v751_v28, %v750_v26  ;;  %6535 = vst [vmem:[#allocation36_spill] sm:$0xff] %v4195_v0  ;;  %v850_v33 = vmax.f32 %v819_v12, 0.0 }
  0xf5   :  { %6533 = vst [vmem:[#allocation34_spill] sm:$0xff] %v4190_v1  ;;  %v860_v17 = vmul.f32 %v852_v6, %v4083_v38  ;;  %v760_v15 = vrot.slane %v759_v37, 2  ;;  %v990_v27 = vmul.f32 %v982_v21, %v4083_v38  ;;  %v980_v29 = vmax.f32 %v949_v36, 0.0 }
  0xf6   :  { %v623_v31 = vrot.slane %v622_v24, 2  ;;  %v3447_v56 = vpop.f32.mrb[12].mxu0  ;;  %v631_v23 = vadd.f32 %v630_v11, %v629_v54  ;;  %v753_v7 = vrot.slane %v752_v13, 2  ;;  %v858_v16 = vmul.f32 %v850_v33, %v4085_v39 }
  0xf7   :  { %v3459_v4 = vpop.f32.mrb[12].mxu1  ;;  %v835_v32 = vpop.f32.mrb[13].mxu0  ;;  %v761_v26 = vadd.f32 %v760_v15, %v759_v37  ;;  %v853_v6 = vmax.f32 %v3444_v60, 0.0  ;;  %v988_v52 = vmul.f32 %v980_v29, %v4085_v39  ;;  %v983_v12 = vmax.f32 %v3456_v34, 0.0 }
  0xf8   :  { %v624_v28 = vadd.f32 %v623_v31, %v622_v24  ;;  %v965_v3 = vpop.f32.mrb[13].mxu1  ;;  %v3448_v0 = vpop.f32.mrb[14].mxu0  ;;  %v632_v55 = vrot.slane %v631_v23, 1  ;;  %v754_v9 = vadd.f32 %v753_v7, %v752_v13  ;;  %v851_v36 = vmax.f32 %v822_v58, 0.0 }
  0xf9   :  { %v3460_v53 = vpop.f32.mrb[14].mxu1  ;;  %v762_v54 = vrot.slane %v761_v26, 1  ;;  %v861_v21 = vmul.f32 %v853_v6, %v4087_v40  ;;  %v838_v50 = vpop.f32.mrb[15].mxu0  ;;  %v991_v24 = vmul.f32 %v983_v12, %v4087_v40  ;;  %v981_v60 = vmax.f32 %v952_v20, 0.0 }
  0xfa   :  { %v625_v11 = vrot.slane %v624_v28, 1  ;;  %v4203_v51 = vadd.f32 %v632_v55, %v631_v23  ;;  %v755_v37 = vrot.slane %v754_v9, 1  ;;  %v968_v15 = vpop.f32.mrb[15].mxu1  ;;  %v859_v34 = vmul.f32 %v851_v36, %v4089_v41  ;;  %v4211_v7 = vpop.permute.xlu1 %229 }
  0xfb   :  { %v4206_v31 = vadd.f32 %v762_v54, %v761_v26  ;;  %v873_v33 = vadd.f32 %v861_v21, %v860_v17  ;;  %6539 = vst [vmem:[#allocation40_spill] sm:$0xff] %v4211_v7  ;;  %v1003_v58 = vadd.f32 %v991_v24, %v990_v27  ;;  %v989_v55 = vmul.f32 %v981_v60, %v4089_v41  ;;  %v4216_v6 = vpop.permute.xlu0 %224 }
  0xfc   :  { %6536 = vst [vmem:[#allocation37_spill] sm:$0xff] %v4203_v51  ;;  %v4208_v13 = vadd.f32 %v625_v11, %v624_v28  ;;  %v4213_v29 = vadd.f32 %v755_v37, %v754_v9  ;;  %v856_v23 = vmax.f32 %v3447_v56, 0.0  ;;  %6541 = vst [vmem:[#allocation42_spill] sm:$0xff] %v4216_v6  ;;  %v866_v12 = vadd.f32 %v859_v34, %v858_v16 }
  0xfd   :  { %6537 = vst [vmem:[#allocation38_spill] sm:$0xff] %v4206_v31  ;;  %v874_v26 = vrot.slane %v873_v33, 4  ;;  %v986_v28 = vmax.f32 %v3459_v4, 0.0  ;;  %v1004_v11 = vrot.slane %v1003_v58, 4  ;;  %v996_v9 = vadd.f32 %v989_v55, %v988_v52 }
  0xfe   :  { %6538 = vst [vmem:[#allocation39_spill] sm:$0xff] %v4208_v13  ;;  %6540 = vst [vmem:[#allocation41_spill] sm:$0xff] %v4213_v29  ;;  %v4220_v54 = vpop.f32.mrb[16].mxu0  ;;  %v864_v27 = vmul.f32 %v856_v23, %v4097_v45  ;;  %v867_v37 = vrot.slane %v866_v12, 4  ;;  %v854_v60 = vmax.f32 %v835_v32, 0.0  ;;  %v984_v17 = vmax.f32 %v965_v3, 0.0  ;;  %v4244_v47 = vpop.permute.xlu1 %239 }
  0xff   :  { %v4225_v21 = vpop.f32.mrb[16].mxu1  ;;  %v4227_v56 = vpop.f32.mrb[17].mxu0  ;;  %v875_v36 = vadd.f32 %v874_v26, %v873_v33  ;;  %v994_v24 = vmul.f32 %v986_v28, %v4097_v45  ;;  %v1005_v34 = vadd.f32 %v1004_v11, %v1003_v58  ;;  %v997_v20 = vrot.slane %v996_v9, 4  ;;  %6542 = vst [vmem:[#allocation43_spill] sm:$0xff] %v4244_v47 }
 0x100   :  { %v4230_v16 = vpop.f32.mrb[17].mxu1  ;;  %v4232_v4 = vpop.f32.mrb[18].mxu0  ;;  %v857_v7 = vmax.f32 %v3448_v0, 0.0  ;;  %v868_v23 = vadd.f32 %v867_v37, %v866_v12  ;;  %v862_v6 = vmul.f32 %v854_v60, %v4093_v43  ;;  %v987_v48 = vmax.f32 %v3460_v53, 0.0 }
 0x101   :  { %v4234_v52 = vpop.f32.mrb[18].mxu1  ;;  %v876_v55 = vrot.slane %v875_v36, 2  ;;  %v4237_v33 = vpop.f32.mrb[19].mxu0  ;;  %v1006_v26 = vrot.slane %v1005_v34, 2  ;;  %v998_v28 = vadd.f32 %v997_v20, %v996_v9  ;;  %v992_v32 = vmul.f32 %v984_v17, %v4093_v43 }
 0x102   :  { %v865_v49 = vmul.f32 %v857_v7, %v4095_v44  ;;  %v4241_v46 = vpop.f32.mrb[19].mxu1  ;;  %v869_v3 = vrot.slane %v868_v23, 2  ;;  %v995_v0 = vmul.f32 %v987_v48, %v4095_v44  ;;  %v855_v11 = vmax.f32 %v838_v50, 0.0  ;;  %v4246_v30 = vpop.permute.xlu0 %234 }
 0x103   :  { %v877_v58 = vadd.f32 %v876_v55, %v875_v36  ;;  %v1007_v12 = vadd.f32 %v1006_v26, %v1005_v34  ;;  %v999_v37 = vrot.slane %v998_v28, 2  ;;  %v985_v60 = vmax.f32 %v968_v15, 0.0  ;;  %6543 = vst [vmem:[#allocation44_spill] sm:$0xff] %v4246_v30 }
 0x104   :  { %v887_v53 = vadd.f32 %v865_v49, %v864_v27  ;;  %v870_v9 = vadd.f32 %v869_v3, %v868_v23  ;;  %v1017_v17 = vadd.f32 %v995_v0, %v994_v24  ;;  %v863_v7 = vmul.f32 %v855_v11, %v4091_v42 }
 0x105   :  { %v878_v20 = vrot.slane %v877_v58, 1  ;;  %v1008_v36 = vrot.slane %v1007_v12, 1  ;;  %v1000_v55 = vadd.f32 %v999_v37, %v998_v28  ;;  %v993_v48 = vmul.f32 %v985_v60, %v4091_v42 }
 0x106   :  { %v4249_v25 = vpop.f32.mrb[20].mxu0  ;;  %v888_v35 = vrot.slane %v887_v53, 4  ;;  %v871_v15 = vrot.slane %v870_v9, 1  ;;  %v1018_v27 = vrot.slane %v1017_v17, 4  ;;  %v880_v26 = vadd.f32 %v863_v7, %v862_v6  ;;  %v4293_v22 = vpop.permute.xlu0 %244 }
 0x107   :  { %v4252_v50 = vpop.f32.mrb[20].mxu1  ;;  %v4254_v34 = vpop.f32.mrb[21].mxu0  ;;  %v4256_v49 = vadd.f32 %v878_v20, %v877_v58  ;;  %v4262_v3 = vadd.f32 %v1008_v36, %v1007_v12  ;;  %v1001_v0 = vrot.slane %v1000_v55, 1  ;;  %v1010_v11 = vadd.f32 %v993_v48, %v992_v32  ;;  %6549 = vst [vmem:[#allocation48_spill] sm:$0xff] %v4293_v22 }
 0x108   :  { %v4258_v23 = vpop.f32.mrb[21].mxu1  ;;  %v4260_v24 = vpop.f32.mrb[22].mxu0  ;;  %v889_v28 = vadd.f32 %v888_v35, %v887_v53  ;;  %v6545_v60 = vmax.f32 %v4182_v19, %v4184_v10  ;;  %v4272_v20 = vadd.f32 %v871_v15, %v870_v9  ;;  %v1019_v6 = vadd.f32 %v1018_v27, %v1017_v17 }
 0x109   :  { %6544 = vst [vmem:[#allocation45_spill] sm:$0xff] %v4256_v49  ;;  %v4264_v37 = vpop.f32.mrb[22].mxu1  ;;  %v881_v7 = vrot.slane %v880_v26, 4  ;;  %v4274_v47 = vpop.f32.mrb[23].mxu0  ;;  %v4276_v30 = vadd.f32 %v1001_v0, %v1000_v55  ;;  %v1011_v36 = vrot.slane %v1010_v11, 4  ;;  %v1112_v35 = vmax.f32 %v4220_v54, 0.0 }
 0x10a   :  { %v4270_v58 = vmax.f32 %v6545_v60, %v4256_v49  ;;  %6546 = vst [vmem:[#allocation46_spill] sm:$0xff] %v4272_v20  ;;  %v890_v12 = vrot.slane %v889_v28, 2  ;;  %v4279_v32 = vpop.f32.mrb[23].mxu1  ;;  %v6547_v9 = vmax.f32 %v4186_v59, %v4190_v1  ;;  %v1020_v17 = vrot.slane %v1019_v6, 2  ;;  %v4289_v27 = vpop.permute.xlu1 %249 }
 0x10b   :  { %v882_v15 = vadd.f32 %v881_v7, %v880_v26  ;;  %6548 = vst [vmem:[#allocation47_spill] sm:$0xff] %v4289_v27  ;;  %v1012_v0 = vadd.f32 %v1011_v36, %v1010_v11  ;;  %v1120_v60 = vmul.f32 %v1112_v35, %v4083_v38  ;;  %v1242_v54 = vmax.f32 %v4225_v21, 0.0 }
 0x10c   :  { %v4287_v48 = vmax.f32 %v6547_v9, %v4272_v20  ;;  %v891_v55 = vadd.f32 %v890_v12, %v889_v28  ;;  %v1021_v18 = vadd.f32 %v1020_v17, %v1019_v6  ;;  %v1110_v9 = vmax.f32 %v4227_v56, 0.0 }
 0x10d   :  { %v883_v14 = vrot.slane %v882_v15, 2  ;;  %v1013_v7 = vrot.slane %v1012_v0, 2  ;;  %v1250_v28 = vmul.f32 %v1242_v54, %v4083_v38  ;;  %v1240_v11 = vmax.f32 %v4230_v16, 0.0 }
 0x10e   :  { %v4298_v2 = vpop.f32.mrb[24].mxu0  ;;  %v892_v26 = vrot.slane %v891_v55, 1  ;;  %v1022_v36 = vrot.slane %v1021_v18, 1  ;;  %v1118_v53 = vmul.f32 %v1110_v9, %v4085_v39  ;;  %v1113_v6 = vmax.f32 %v4232_v4, 0.0 }
 0x10f   :  { %v4302_v12 = vpop.f32.mrb[24].mxu1  ;;  %v4304_v21 = vpop.f32.mrb[25].mxu0  ;;  %v884_v35 = vadd.f32 %v883_v14, %v882_v15  ;;  %v1014_v22 = vadd.f32 %v1013_v7, %v1012_v0  ;;  %v1248_v54 = vmul.f32 %v1240_v11, %v4085_v39  ;;  %v1243_v16 = vmax.f32 %v4234_v52, 0.0 }
 0x110   :  { %v4308_v17 = vpop.f32.mrb[25].mxu1  ;;  %v4310_v56 = vpop.f32.mrb[26].mxu0  ;;  %v4312_v27 = vadd.f32 %v892_v26, %v891_v55  ;;  %v4318_v62 = vadd.f32 %v1022_v36, %v1021_v18  ;;  %v1121_v15 = vmul.f32 %v1113_v6, %v4087_v40  ;;  %v1111_v4 = vmax.f32 %v4237_v33, 0.0 }
 0x111   :  { %v4316_v63 = vpop.f32.mrb[26].mxu1  ;;  %v885_v14 = vrot.slane %v884_v35, 1  ;;  %v4322_v9 = vpop.f32.mrb[27].mxu0  ;;  %v6552_v55 = vmax.f32 %v4203_v51, %v4206_v31  ;;  %v1015_v26 = vrot.slane %v1014_v22, 1  ;;  %v1251_v52 = vmul.f32 %v1243_v16, %v4087_v40 }
 0x112   :  { %6550 = vst [vmem:[#allocation49_spill] sm:$0xff] %v4312_v27  ;;  %6551 = vst [vmem:[#allocation50_spill] sm:$0xff] %v4318_v62  ;;  %v1241_v7 = vmax.f32 %v4241_v46, 0.0  ;;  %v4332_v18 = vpop.f32.mrb[27].mxu1  ;;  %v4334_v11 = vpop.permute.xlu1 %259  ;;  %v1133_v33 = vadd.f32 %v1121_v15, %v1120_v60  ;;  %v1119_v6 = vmul.f32 %v1111_v4, %v4089_v41  ;;  %v1116_v8 = vmax.f32 %v4249_v25, 0.0 }
 0x113   :  { %v4328_v0 = vmax.f32 %v6552_v55, %v4312_v27  ;;  %6553 = vst [vmem:[#allocation51_spill] sm:$0xff] %v4334_v11  ;;  %v4336_v36 = vadd.f32 %v885_v14, %v884_v35  ;;  %v4342_v27 = vadd.f32 %v1015_v26, %v1014_v22  ;;  %v1263_v31 = vadd.f32 %v1251_v52, %v1250_v28  ;;  %v4345_v46 = vpop.permute.xlu0 %254 }
 0x114   :  { %v1249_v16 = vmul.f32 %v1241_v7, %v4089_v41  ;;  %6556 = vst [vmem:[#allocation54_spill] sm:$0xff] %v4345_v46  ;;  %v6557_v35 = vmax.f32 %v4208_v13, %v4213_v29  ;;  %v1134_v60 = vrot.slane %v1133_v33, 4  ;;  %v1126_v15 = vadd.f32 %v1119_v6, %v1118_v53 }
 0x115   :  { %6554 = vst [vmem:[#allocation52_spill] sm:$0xff] %v4336_v36  ;;  %6555 = vst [vmem:[#allocation53_spill] sm:$0xff] %v4342_v27  ;;  %v1124_v25 = vmul.f32 %v1116_v8, %v4097_v45  ;;  %v1264_v55 = vrot.slane %v1263_v31, 4  ;;  %v1246_v28 = vmax.f32 %v4252_v50, 0.0  ;;  %v1114_v26 = vmax.f32 %v4254_v34, 0.0 }
 0x116   :  { %v4351_v14 = vmax.f32 %v6557_v35, %v4336_v36  ;;  %v4354_v4 = vpop.f32.mrb[28].mxu0  ;;  %v1256_v22 = vadd.f32 %v1249_v16, %v1248_v54  ;;  %v1135_v11 = vadd.f32 %v1134_v60, %v1133_v33  ;;  %v1127_v46 = vrot.slane %v1126_v15, 4  ;;  %v4375_v13 = vpop.permute.xlu1 %269 }
 0x117   :  { %v4358_v52 = vpop.f32.mrb[28].mxu1  ;;  %v4360_v7 = vpop.f32.mrb[29].mxu0  ;;  %v1244_v53 = vmax.f32 %v4258_v23, 0.0  ;;  %v1265_v54 = vadd.f32 %v1264_v55, %v1263_v31  ;;  %v1254_v50 = vmul.f32 %v1246_v28, %v4097_v45  ;;  %v1122_v34 = vmul.f32 %v1114_v26, %v4093_v43  ;;  %6558 = vst [vmem:[#allocation55_spill] sm:$0xff] %v4375_v13 }
 0x118   :  { %v4365_v8 = vpop.f32.mrb[29].mxu1  ;;  %v4367_v6 = vpop.f32.mrb[30].mxu0  ;;  %v1257_v16 = vrot.slane %v1256_v22, 4  ;;  %v1136_v33 = vrot.slane %v1135_v11, 2  ;;  %v1128_v60 = vadd.f32 %v1127_v46, %v1126_v15  ;;  %v1117_v35 = vmax.f32 %v4260_v24, 0.0 }
 0x119   :  { %v4371_v36 = vpop.f32.mrb[30].mxu1  ;;  %v4373_v29 = vpop.f32.mrb[31].mxu0  ;;  %v1252_v23 = vmul.f32 %v1244_v53, %v4093_v43  ;;  %v1266_v31 = vrot.slane %v1265_v54, 2  ;;  %v1247_v28 = vmax.f32 %v4264_v37, 0.0  ;;  %v1115_v26 = vmax.f32 %v4274_v47, 0.0 }
 0x11a   :  { %v4379_v51 = vpop.f32.mrb[31].mxu1  ;;  %v1258_v55 = vadd.f32 %v1257_v16, %v1256_v22  ;;  %v1137_v5 = vadd.f32 %v1136_v33, %v1135_v11  ;;  %v1129_v61 = vrot.slane %v1128_v60, 2  ;;  %v1125_v57 = vmul.f32 %v1117_v35, %v4095_v44  ;;  %v4387_v53 = vpop.permute.xlu0 %264 }
 0x11b   :  { %v1245_v13 = vmax.f32 %v4279_v32, 0.0  ;;  %v1267_v20 = vadd.f32 %v1266_v31, %v1265_v54  ;;  %v1255_v15 = vmul.f32 %v1247_v28, %v4095_v44  ;;  %v1123_v24 = vmul.f32 %v1115_v26, %v4091_v42  ;;  %6559 = vst [vmem:[#allocation56_spill] sm:$0xff] %v4387_v53  ;;  %v4390_v35 = vpop.permute.xlu1 %279 }
 0x11c   :  { %v1259_v46 = vrot.slane %v1258_v55, 2  ;;  %v1138_v1 = vrot.slane %v1137_v5, 1  ;;  %v1130_v22 = vadd.f32 %v1129_v61, %v1128_v60  ;;  %v1147_v16 = vadd.f32 %v1125_v57, %v1124_v25  ;;  %6560 = vst [vmem:[#allocation57_spill] sm:$0xff] %v4390_v35 }
 0x11d   :  { %v1253_v37 = vmul.f32 %v1245_v13, %v4091_v42  ;;  %v1268_v47 = vrot.slane %v1267_v20, 1  ;;  %v1277_v33 = vadd.f32 %v1255_v15, %v1254_v50  ;;  %v1140_v59 = vadd.f32 %v1123_v24, %v1122_v34 }
 0x11e   :  { %v1260_v11 = vadd.f32 %v1259_v46, %v1258_v55  ;;  %v4392_v32 = vadd.f32 %v1138_v1, %v1137_v5  ;;  %v1131_v54 = vrot.slane %v1130_v22, 1  ;;  %v1148_v31 = vrot.slane %v1147_v16, 4  ;;  %v3633_v5 = vld [vmem:[%s6334_s0 + $0x28] sm:$0xff]  }
 0x11f   :  { %v1270_v28 = vadd.f32 %v1253_v37, %v1252_v23  ;;  %v4394_v49 = vadd.f32 %v1268_v47, %v1267_v20  ;;  %v1278_v53 = vrot.slane %v1277_v33, 4  ;;  %v1141_v10 = vrot.slane %v1140_v59, 4  ;;  %v4411_v23 = vpop.permute.xlu0 %274  ;;  %v4427_v37 = vpop.permute.xlu1 %329 }
 0x120   :  { %v1261_v26 = vrot.slane %v1260_v11, 1  ;;  %v6561_v57 = vmax.f32 %v4270_v58, %v4262_v3  ;;  %v4402_v13 = vadd.f32 %v1131_v54, %v1130_v22  ;;  %v1149_v25 = vadd.f32 %v1148_v31, %v1147_v16  ;;  %6562 = vst [vmem:[#allocation58_spill] sm:$0xff] %v4411_v23  ;;  %v3634_v22 = vld [vmem:[%s6334_s0 + $0x38] sm:$0xff]   ;;  %6564 = vst [vmem:[#allocation59_spill] sm:$0xff] %v4427_v37 }
 0x121   :  { %v1271_v50 = vrot.slane %v1270_v28, 4  ;;  %v4407_v1 = vunpack.c.h.bf16 %v3633_v5  ;;  %v1279_v34 = vadd.f32 %v1278_v53, %v1277_v33  ;;  %v1142_v60 = vadd.f32 %v1141_v10, %v1140_v59 }
 0x122   :  { %v4400_v61 = vmax.f32 %v6561_v57, %v4392_v32  ;;  %v4409_v20 = vadd.f32 %v1261_v26, %v1260_v11  ;;  %v6563_v55 = vmax.f32 %v4287_v48, %v4276_v30  ;;  %v1150_v15 = vrot.slane %v1149_v25, 2  ;;  %v3635_v57 = vld [vmem:[%s6334_s0 + $0x40] sm:$0xff]  }
 0x123   :  { %v1272_v24 = vadd.f32 %v1271_v50, %v1270_v28  ;;  %v4424_v16 = vunpack.c.l.bf16 %v3634_v22  ;;  %v1280_v10 = vrot.slane %v1279_v34, 2  ;;  %v1143_v59 = vrot.slane %v1142_v60, 2  ;;  %v4460_v47 = vpop.permute.xlu1 %349 }
 0x124   :  { %v4419_v46 = vmax.f32 %v6563_v55, %v4402_v13  ;;  %v1502_v53 = vmax.f32 %v4302_v12, 0.0  ;;  %v1151_v48 = vadd.f32 %v1150_v15, %v1149_v25  ;;  %v1372_v33 = vmax.f32 %v4298_v2, 0.0  ;;  %6568 = vst [vmem:[#allocation63_spill] sm:$0xff] %v4460_v47 }
 0x125   :  { %v1273_v11 = vrot.slane %v1272_v24, 2  ;;  %v4432_v54 = vunpack.c.h.bf16 %v3634_v22  ;;  %v1281_v31 = vadd.f32 %v1280_v10, %v1279_v34  ;;  %v1144_v28 = vadd.f32 %v1143_v59, %v1142_v60  ;;  %v4444_v34 = vpop.permute.xlu0 %324 }
 0x126   :  { %v1510_v26 = vmul.f32 %v1502_v53, %v4083_v38  ;;  %v4438_v12 = vunpack.c.l.bf16 %v3635_v57  ;;  %v1152_v50 = vrot.slane %v1151_v48, 1  ;;  %v1373_v55 = vmax.f32 %v4310_v56, 0.0  ;;  %6565 = vst [vmem:[#allocation60_spill] sm:$0xff] %v4444_v34 }
 0x127   :  { %v1274_v5 = vadd.f32 %v1273_v11, %v1272_v24  ;;  %v4441_v25 = vunpack.c.h.bf16 %v3635_v57  ;;  %v1282_v15 = vrot.slane %v1281_v31, 1  ;;  %v1145_v2 = vrot.slane %v1144_v28, 1  ;;  %v3636_v24 = vld [vmem:[%s6334_s0 + $0x50] sm:$0xff]   ;;  %v4515_v34 = vpop.permute.xlu1 %309 }
 0x128   :  { %v1503_v22 = vmax.f32 %v4316_v63, 0.0  ;;  %v4446_v60 = vadd.f32 %v1152_v50, %v1151_v48  ;;  %v1380_v59 = vmul.f32 %v1372_v33, %v4083_v38  ;;  %v1381_v53 = vmul.f32 %v1373_v55, %v4087_v40  ;;  %6575 = vst [vmem:[#allocation68_spill] sm:$0xff] %v4515_v34 }
 0x129   :  { %v1275_v10 = vrot.slane %v1274_v5, 1  ;;  %v4453_v56 = vunpack.c.l.bf16 %v3636_v24  ;;  %v4455_v11 = vunpack.c.h.bf16 %v3636_v24  ;;  %v4457_v57 = vadd.f32 %v1145_v2, %v1144_v28 }
 0x12a   :  { %6566 = vst [vmem:[#allocation61_spill] sm:$0xff] %v4446_v60  ;;  %v1511_v63 = vmul.f32 %v1503_v22, %v4087_v40  ;;  %v6569_v38 = vmax.f32 %v4328_v0, %v4318_v62  ;;  %v4468_v33 = vadd.f32 %v1282_v15, %v1281_v31  ;;  %v1370_v50 = vmax.f32 %v4304_v21, 0.0  ;;  %v3637_v0 = vld [vmem:[%s6334_s0 + $0x48] sm:$0xff]  }
 0x12b   :  { %6567 = vst [vmem:[#allocation62_spill] sm:$0xff] %v4457_v57  ;;  %v1393_v55 = vadd.f32 %v1381_v53, %v1380_v59  ;;  %v6571_v28 = vmax.f32 %v4351_v14, %v4342_v27  ;;  %v4477_v40 = vadd.f32 %v1275_v10, %v1274_v5  ;;  %v1500_v22 = vmax.f32 %v4308_v17, 0.0  ;;  %v3638_v14 = vld [vmem:[%s6334_s0 + $0x58] sm:$0xff]   ;;  %v3639_v53 = vld [vmem:[%s6334_s0 + $0x60] sm:$0xff]  }
 0x12c   :  { %v4466_v48 = vmax.f32 %v6569_v38, %v4446_v60  ;;  %6570 = vst [vmem:[#allocation64_spill] sm:$0xff] %v4468_v33  ;;  %v1523_v24 = vadd.f32 %v1511_v63, %v1510_v26  ;;  %v4483_v31 = vunpack.c.l.bf16 %v3637_v0  ;;  %v4485_v15 = vunpack.c.h.bf16 %v3637_v0 }
 0x12d   :  { %v4475_v2 = vmax.f32 %v6571_v28, %v4457_v57  ;;  %6573 = vst [vmem:[#allocation66_spill] sm:$0xff] %v4477_v40  ;;  %v1394_v59 = vrot.slane %v1393_v55, 4  ;;  %v4492_v5 = vunpack.c.l.bf16 %v3638_v14  ;;  %v4494_v17 = vunpack.c.h.bf16 %v3638_v14  ;;  %v3640_v28 = vld [vmem:[%s6334_s0 + $0x70] sm:$0xff]   ;;  %v4510_v14 = vpop.permute.xlu0 %344  ;;  %v6606_v40 = vld [vmem:[#allocation29_spill] sm:$0xff] }
 0x12e   :  { %v1524_v10 = vrot.slane %v1523_v24, 4  ;;  %v4501_v63 = vunpack.c.l.bf16 %v3639_v53  ;;  %v4503_v38 = vunpack.c.h.bf16 %v3639_v53  ;;  %v4508_v0 = vunpack.c.l.bf16 %v3640_v28  ;;  %6574 = vst [vmem:[#allocation67_spill] sm:$0xff] %v4510_v14 }
 0x12f   :  { %6572 = vst [vmem:[#allocation65_spill] sm:$0xff] %v4475_v2  ;;  %v1395_v21 = vadd.f32 %v1394_v59, %v1393_v55  ;;  %v1378_v26 = vmul.f32 %v1370_v50, %v4085_v39  ;;  %v1508_v58 = vmul.f32 %v1500_v22, %v4085_v39  ;;  %v1371_v37 = vmax.f32 %v4322_v9, 0.0 }
 0x130   :  { %v1525_v47 = vadd.f32 %v1524_v10, %v1523_v24  ;;  %v1501_v35 = vmax.f32 %v4332_v18, 0.0  ;;  %v1376_v23 = vmax.f32 %v4354_v4, 0.0  ;;  %v1506_v57 = vmax.f32 %v4358_v52, 0.0 }
 0x131   :  { %v1396_v53 = vrot.slane %v1395_v21, 2  ;;  %v1379_v14 = vmul.f32 %v1371_v37, %v4089_v41  ;;  %v1374_v55 = vmax.f32 %v4360_v7, 0.0  ;;  %v1504_v50 = vmax.f32 %v4365_v8, 0.0  ;;  %v4528_v10 = vpop.permute.xlu0 %304 }
 0x132   :  { %v1526_v27 = vrot.slane %v1525_v47, 2  ;;  %v1509_v22 = vmul.f32 %v1501_v35, %v4089_v41  ;;  %v1384_v9 = vmul.f32 %v1376_v23, %v4097_v45  ;;  %v1514_v24 = vmul.f32 %v1506_v57, %v4097_v45  ;;  %6576 = vst [vmem:[#allocation69_spill] sm:$0xff] %v4528_v10 }
 0x133   :  { %v1397_v39 = vadd.f32 %v1396_v53, %v1395_v21  ;;  %v1386_v18 = vadd.f32 %v1379_v14, %v1378_v26  ;;  %v1382_v4 = vmul.f32 %v1374_v55, %v4093_v43  ;;  %v1512_v52 = vmul.f32 %v1504_v50, %v4093_v43 }
 0x134   :  { %v1527_v59 = vadd.f32 %v1526_v27, %v1525_v47  ;;  %v1516_v34 = vadd.f32 %v1509_v22, %v1508_v58  ;;  %v1377_v7 = vmax.f32 %v4367_v6, 0.0  ;;  %v1507_v8 = vmax.f32 %v4371_v36, 0.0  ;;  %v4534_v27 = vpop.permute.xlu1 %364 }
 0x135   :  { %v1398_v37 = vrot.slane %v1397_v39, 1  ;;  %v1387_v41 = vrot.slane %v1386_v18, 4  ;;  %v1375_v35 = vmax.f32 %v4373_v29, 0.0  ;;  %v1505_v45 = vmax.f32 %v4379_v51, 0.0  ;;  %6577 = vst [vmem:[#allocation70_spill] sm:$0xff] %v4534_v27 }
 0x136   :  { %v1528_v21 = vrot.slane %v1527_v59, 1  ;;  %v1517_v47 = vrot.slane %v1516_v34, 4  ;;  %v1385_v43 = vmul.f32 %v1377_v7, %v4095_v44  ;;  %v1515_v57 = vmul.f32 %v1507_v8, %v4095_v44  ;;  %v3641_v44 = vld [vmem:[%s6334_s0 + $0x68] sm:$0xff]  }
 0x137   :  { %v1399_v23 = vadd.f32 %v1398_v37, %v1397_v39  ;;  %v1388_v58 = vadd.f32 %v1387_v41, %v1386_v18  ;;  %v1383_v6 = vmul.f32 %v1375_v35, %v4091_v42  ;;  %v1513_v36 = vmul.f32 %v1505_v45, %v4091_v42  ;;  %v4550_v18 = vpop.permute.xlu0 %334  ;;  %v6582_v41 = vld [vmem:[#allocation45_spill] sm:$0xff] }
 0x138   :  { %v1529_v26 = vadd.f32 %v1528_v21, %v1527_v59  ;;  %v6578_v14 = vmax.f32 %v4400_v61, %v4394_v49  ;;  %v1518_v53 = vadd.f32 %v1517_v47, %v1516_v34  ;;  %v1407_v51 = vadd.f32 %v1385_v43, %v1384_v9  ;;  %6579 = vst [vmem:[#allocation71_spill] sm:$0xff] %v4550_v18 }
 0x139   :  { %v1537_v55 = vadd.f32 %v1515_v57, %v1514_v24  ;;  %v4543_v50 = vunpack.c.h.bf16 %v3640_v28  ;;  %v1389_v39 = vrot.slane %v1388_v58, 2  ;;  %v1400_v22 = vadd.f32 %v1383_v6, %v1382_v4  ;;  %v4552_v28 = vpop.permute.xlu1 %354 }
 0x13a   :  { %v1589_v29 = vmax.f32 %v6578_v14, %v1399_v23  ;;  %v1530_v37 = vadd.f32 %v1513_v36, %v1512_v52  ;;  %v4548_v59 = vunpack.c.l.bf16 %v3641_v44  ;;  %v1519_v7 = vrot.slane %v1518_v53, 2  ;;  %6580 = vst [vmem:[#allocation72_spill] sm:$0xff] %v4552_v28  ;;  %v6581_v52 = vld [vmem:[#allocation32_spill] sm:$0xff] }
 0x13b   :  { %v1408_v61 = vrot.slane %v1407_v51, 4  ;;  %v1390_v8 = vadd.f32 %v1389_v39, %v1388_v58  ;;  %v1538_v34 = vrot.slane %v1537_v55, 4  ;;  %v1401_v9 = vrot.slane %v1400_v22, 4 }
 0x13c   :  { %v1590_v42 = vmax.f32 %v1589_v29, %v1529_v26  ;;  %v1531_v24 = vrot.slane %v1530_v37, 4  ;;  %v1520_v29 = vadd.f32 %v1519_v7, %v1518_v53  ;;  %v4560_v39 = vunpack.c.h.bf16 %v3641_v44 }
 0x13d   :  { %v1409_v28 = vadd.f32 %v1408_v61, %v1407_v51  ;;  %v1391_v18 = vrot.slane %v1390_v8, 1  ;;  %v1402_v53 = vadd.f32 %v1401_v9, %v1400_v22 }
 0x13e   :  { %v1591_v4 = vsub.f32 %v4182_v19, %v1590_v42  ;;  %v1594_v21 = vsub.f32 %v6581_v52, %v1590_v42  ;;  %v1597_v35 = vsub.f32 %v6582_v41, %v1590_v42  ;;  %v1600_v45 = vsub.f32 %v4262_v3, %v1590_v42  ;;  %v4562_v52 = vpop.permute.xlu0 %369 }
 0x13f   :  { %v1603_v47 = vsub.f32 %v4392_v32, %v1590_v42  ;;  %v1606_v43 = vsub.f32 %v4394_v49, %v1590_v42  ;;  %v1609_v57 = vsub.f32 %v1399_v23, %v1590_v42  ;;  %v1612_v6 = vsub.f32 %v1529_v26, %v1590_v42  ;;  %6583 = vst [vmem:[#allocation32_spill] sm:$0xff] %v4562_v52  ;;  %v4564_v26 = vpop.permute.xlu1 %389 }
 0x140   :  { %v1592_v58 = vmul.f32 1.442695, %v1591_v4  ;;  %v1595_v36 = vmul.f32 1.442695, %v1594_v21  ;;  %v1598_v14 = vmul.f32 1.442695, %v1597_v35  ;;  %v1539_v23 = vadd.f32 %v1538_v34, %v1537_v55 }
 0x141   :  { %v1601_v27 = vmul.f32 1.442695, %v1600_v45  ;;  %v1604_v19 = vmul.f32 1.442695, %v1603_v47  ;;  %v1607_v41 = vmul.f32 1.442695, %v1606_v43  ;;  %v4566_v42 = vadd.f32 %v1391_v18, %v1390_v8 }
 0x142   :  { %3551 = vpow2.f32 %v1592_v58  ;;  %v1610_v3 = vmul.f32 1.442695, %v1609_v57  ;;  %v1521_v32 = vrot.slane %v1520_v29, 1  ;;  %v1410_v49 = vrot.slane %v1409_v28, 2  ;;  %6584 = vst [vmem:[#allocation45_spill] sm:$0xff] %v4564_v26  ;;  %v3642_v18 = vld [vmem:[%s6334_s0 + $0x78] sm:$0xff]   ;;  %v4585_v34 = vpop.permute.xlu0 %384 }
 0x143   :  { %3553 = vpow2.f32 %v1595_v36  ;;  %v4568_v44 = vadd.f32 %v1531_v24, %v1530_v37  ;;  %v1613_v51 = vmul.f32 1.442695, %v1612_v6  ;;  %v1540_v61 = vrot.slane %v1539_v23, 2  ;;  %6586 = vst [vmem:[#allocation73_spill] sm:$0xff] %v4585_v34  ;;  %v4596_v47 = vpop.permute.xlu1 %339  ;;  %v6590_v43 = vld [vmem:[#allocation33_spill] sm:$0xff]  ;;  %v6591_v6 = vld [vmem:[#allocation34_spill] sm:$0xff] }
 0x144   :  { %3555 = vpow2.f32 %v1598_v14  ;;  %v1411_v7 = vadd.f32 %v1410_v49, %v1409_v28  ;;  %v6585_v4 = vmax.f32 %v4419_v46, %v4409_v20  ;;  %v4574_v35 = vadd.f32 %v1521_v32, %v1520_v29  ;;  %6589 = vst [vmem:[#allocation76_spill] sm:$0xff] %v4596_v47  ;;  %v6592_v36 = vld [vmem:[#allocation46_spill] sm:$0xff]  ;;  %v6600_v32 = vld [vmem:[#allocation17_spill] sm:$0xff]  ;;  %v6604_v34 = vld [vmem:[#allocation23_spill] sm:$0xff]  ;;  %s3668_s0 = smov [#allocation2]  }
 0x145   :  { %3557 = vpow2.f32 %v1601_v27  ;;  %v1403_v55 = vrot.slane %v1402_v53, 2  ;;  %v4579_v22 = vunpack.c.l.bf16 %v3642_v18  ;;  %v4581_v37 = vadd.f32 %v1540_v61, %v1539_v23  ;;  %v6603_v29 = vld [vmem:[#allocation22_spill] sm:$0xff]  ;;  %v6605_v47 = vld [vmem:[#allocation24_spill] sm:$0xff]  ;;  %s3274_s11 = sshll.u32 %s3668_s0, 4  ;;  %s3275_s11 = int_to_ptr.vmem [resolvable:$true] %s3274_s11 }
 0x146   :  { %3559 = vpow2.f32 %v1604_v19  ;;  %v1549_v21 = vmax.f32 %v6585_v4, %v4566_v42  ;;  %v1412_v27 = vrot.slane %v1411_v7, 1  ;;  %v4583_v8 = vunpack.c.h.bf16 %v3642_v18  ;;  %v6596_v18 = vld [vmem:[#allocation16_spill] sm:$0xff]  ;;  %s3643_s12 = scalar_lea.vmem %s3275_s11, 512  ;;  %p3648_p1 = scmp.lt.s32.totalorder %s3275_s11, %s3275_s11 }
 0x147   :  { %3561 = vpow2.f32 %v1607_v41  ;;  %v4594_v45 = vadd.f32 %v1403_v55, %v1402_v53  ;;  %p3644_p0 = scmp.ne.s32.totalorder %s3275_s11, %s3643_s12  ;;  %p3649_p2 = scmp.lt.s32.totalorder %s3643_s12, %s3643_s12 }
 0x148   :  { %3563 = vpow2.f32 %v1610_v3  ;;  %v4588_v46 = vmax.f32 %v1549_v21, %v4574_v35  ;;  %v4591_v24 = vadd.f32 %v1412_v27, %v1411_v7  ;;  %v6593_v7 = vmax.f32 %v4466_v48, %v4468_v33  ;;  %v6595_v21 = vld [vmem:[#allocation15_spill] sm:$0xff]  ;;  %v6601_v3 = vld [vmem:[#allocation18_spill] sm:$0xff]  ;;  %v6602_v48 = vld [vmem:[#allocation21_spill] sm:$0xff] }
 0x149   :  { %3565 = vpow2.f32 %v1613_v51  ;;  %6588 = vst [vmem:[#allocation75_spill] sm:$0xff] %v4594_v45  ;;  %p3650_p3 = por %p3649_p2, %p3648_p1 }
 0x14a   :  { %6587 = vst [vmem:[#allocation74_spill] sm:$0xff] %v4591_v24  ;;  %v1551_v57 = vsub.f32 %v6590_v43, %v4588_v46  ;;  %v1554_v58 = vsub.f32 %v6591_v6, %v4588_v46  ;;  %v1557_v14 = vsub.f32 %v6592_v36, %v4588_v46  ;;  %v4624_v61 = vmax.f32 %v6593_v7, %v4591_v24  ;;  %v6597_v43 = vld [vmem:[#allocation19_spill] sm:$0xff]  ;;  %v6598_v36 = vld [vmem:[#allocation20_spill] sm:$0xff]  ;;  %v6608_v24 = vld [vmem:[#allocation25_spill] sm:$0xff] }
 0x14b   :  { %p3651_p4 = pnand %p3650_p3, %p3644_p0 }
 0x14c   :  { %v3552_v49 = vpop.eup %3551  ;;  %v4614_v23 = vmul.f32 1.442695, %v1551_v57  ;;  %v4616_v53 = vmul.f32 1.442695, %v1554_v58  ;;  %v4618_v51 = vmul.f32 1.442695, %v1557_v14  ;;  %v4630_v58 = vpop.permute.xlu0 %314 }
 0x14d   :  { %6594 = vst [vmem:[#allocation33_spill] sm:$0xff] %v4624_v61  ;;  %v3554_v4 = vpop.eup %3553  ;;  %v2102_v55 = vmul.f32 %v3552_v49, %v6595_v21  ;;  %v2103_v27 = vmul.f32 %v3552_v49, %v6596_v18  ;;  %v2104_v6 = vmul.f32 %v3552_v49, %v6597_v43  ;;  %v2105_v57 = vmul.f32 %v3552_v49, %v6598_v36  ;;  %v4639_v43 = vpop.permute.xlu1 %404 }
 0x14e   :  { %v3556_v28 = vpop.eup %3555  ;;  %6599 = vst [vmem:[#allocation34_spill] sm:$0xff] %v4630_v58  ;;  %v1615_v14 = vadd.f32 %v3554_v4, %v3552_v49  ;;  %v2106_v9 = vmul.f32 %v3554_v4, %v6600_v32  ;;  %v2107_v41 = vmul.f32 %v3554_v4, %v6601_v3  ;;  %v2108_v7 = vmul.f32 %v3554_v4, %v6602_v48 }
 0x14f   :  { %v3558_v19 = vpop.eup %3557  ;;  %v2109_v26 = vmul.f32 %v3554_v4, %v6603_v29  ;;  %v2114_v52 = vmul.f32 %v3556_v28, %v6604_v34  ;;  %v2115_v10 = vmul.f32 %v3556_v28, %v6605_v47  ;;  %v2116_v2 = vmul.f32 %v3556_v28, %v6606_v40  ;;  %6607 = vst [vmem:[#allocation46_spill] sm:$0xff] %v4639_v43  ;;  %v6609_v4 = vld [vmem:[#allocation27_spill] sm:$0xff] }
 0x150   :  { %v3560_v36 = vpop.eup %3559  ;;  %v1616_v58 = vadd.f32 %v3556_v28, %v1615_v14  ;;  %v2110_v49 = vadd.f32 %v2106_v9, %v2102_v55  ;;  %v2111_v18 = vadd.f32 %v2107_v41, %v2103_v27  ;;  %v2112_v32 = vadd.f32 %v2108_v7, %v2104_v6 }
 0x151   :  { %v3562_v21 = vpop.eup %3561  ;;  %v2113_v3 = vadd.f32 %v2109_v26, %v2105_v57  ;;  %v2117_v48 = vmul.f32 %v3556_v28, %v4407_v1  ;;  %v2122_v33 = vmul.f32 %v3558_v19, %v6608_v24  ;;  %v2123_v29 = vmul.f32 %v3558_v19, %v6609_v4  ;;  %v4647_v26 = vpop.permute.xlu0 %374 }
 0x152   :  { %v3564_v34 = vpop.eup %3563  ;;  %v1617_v60 = vadd.f32 %v3558_v19, %v1616_v58  ;;  %v2118_v47 = vadd.f32 %v2114_v52, %v2110_v49  ;;  %v2119_v62 = vadd.f32 %v2115_v10, %v2111_v18  ;;  %v2120_v40 = vadd.f32 %v2116_v2, %v2112_v32  ;;  %6610 = vst [vmem:[#allocation25_spill] sm:$0xff] %v4647_v26  ;;  %v4652_v52 = vpop.permute.xlu1 %359 }
 0x153   :  { %v3566_v61 = vpop.eup %3565  ;;  %v2121_v45 = vadd.f32 %v2117_v48, %v2113_v3  ;;  %v2124_v14 = vmul.f32 %v3558_v19, %v4424_v16  ;;  %v2125_v9 = vmul.f32 %v3558_v19, %v4432_v54  ;;  %v2130_v41 = vmul.f32 %v3560_v36, %v4438_v12  ;;  %6611 = vst [vmem:[#allocation27_spill] sm:$0xff] %v4652_v52  ;;  %v6648_v52 = vld [vmem:[#allocation29_spill] sm:$0xff] }
 0x154   :  { %v1618_v28 = vadd.f32 %v3560_v36, %v1617_v60  ;;  %v2126_v55 = vadd.f32 %v2122_v33, %v2118_v47  ;;  %v2127_v27 = vadd.f32 %v2123_v29, %v2119_v62  ;;  %v2131_v6 = vmul.f32 %v3560_v36, %v4441_v25 }
 0x155   :  { %v2128_v57 = vadd.f32 %v2124_v14, %v2120_v40  ;;  %v2129_v58 = vadd.f32 %v2125_v9, %v2121_v45  ;;  %v2132_v10 = vmul.f32 %v3560_v36, %v4483_v31  ;;  %v2133_v2 = vmul.f32 %v3560_v36, %v4485_v15  ;;  %v4661_v9 = vpop.permute.xlu0 %409 }
 0x156   :  { %v1619_v3 = vadd.f32 %v3562_v21, %v1618_v28  ;;  %v2134_v32 = vadd.f32 %v2130_v41, %v2126_v55  ;;  %v2135_v19 = vadd.f32 %v2131_v6, %v2127_v27  ;;  %v2138_v18 = vmul.f32 %v3562_v21, %v4453_v56  ;;  %6612 = vst [vmem:[#allocation77_spill] sm:$0xff] %v4661_v9  ;;  %v6646_v9 = vld [vmem:[#allocation23_spill] sm:$0xff] }
 0x157   :  { %v2136_v48 = vadd.f32 %v2132_v10, %v2128_v57  ;;  %v2137_v7 = vadd.f32 %v2133_v2, %v2129_v58  ;;  %v2139_v60 = vmul.f32 %v3562_v21, %v4455_v11  ;;  %v2140_v62 = vmul.f32 %v3562_v21, %v4492_v5  ;;  %v4666_v10 = vpop.permute.xlu1 %424 }
 0x158   :  { %v1620_v33 = vadd.f32 %v3564_v34, %v1619_v3  ;;  %v2141_v40 = vmul.f32 %v3562_v21, %v4494_v17  ;;  %v2142_v45 = vadd.f32 %v2138_v18, %v2134_v32  ;;  %v2146_v47 = vmul.f32 %v3564_v34, %v4501_v63  ;;  %6613 = vst [vmem:[#allocation78_spill] sm:$0xff] %v4666_v10 }
 0x159   :  { %v2143_v29 = vadd.f32 %v2139_v60, %v2135_v19  ;;  %v2144_v36 = vadd.f32 %v2140_v62, %v2136_v48  ;;  %v2147_v49 = vmul.f32 %v3564_v34, %v4503_v38  ;;  %v2148_v14 = vmul.f32 %v3564_v34, %v4548_v59 }
 0x15a   :  { %v1621_v41 = vadd.f32 %v3566_v61, %v1620_v33  ;;  %v2145_v28 = vadd.f32 %v2141_v40, %v2137_v7  ;;  %v2149_v55 = vmul.f32 %v3564_v34, %v4560_v39  ;;  %v2150_v27 = vadd.f32 %v2146_v47, %v2142_v45 }
 0x15b   :  { %v2151_v6 = vadd.f32 %v2147_v49, %v2143_v29  ;;  %v2152_v57 = vadd.f32 %v2148_v14, %v2144_v36  ;;  %v2154_v21 = vmul.f32 %v3566_v61, %v4508_v0  ;;  %v2155_v58 = vmul.f32 %v3566_v61, %v4543_v50  ;;  %v6622_v36 = vld [vmem:[#allocation75_spill] sm:$0xff]  ;;  %v4701_v49 = vpop.permute.xlu1 %284 }
 0x15c   :  { %3567 = vrcp.f32 %v1621_v41  ;;  %v2153_v2 = vadd.f32 %v2149_v55, %v2145_v28  ;;  %v2156_v3 = vmul.f32 %v3566_v61, %v4579_v22  ;;  %v2157_v32 = vmul.f32 %v3566_v61, %v4583_v8  ;;  %6623 = vst [vmem:[#allocation75_spill] sm:$0xff] %v4701_v49  ;;  %v6626_v28 = vld [vmem:[#allocation38_spill] sm:$0xff] }
 0x15d   :  { %v2158_v19 = vadd.f32 %v2154_v21, %v2150_v27  ;;  %v2159_v18 = vadd.f32 %v2155_v58, %v2151_v6  ;;  %3569 = vpow2.f32 %v4614_v23  ;;  %v6614_v34 = vsub.f32 %v4276_v30, %v4588_v46  ;;  %v6627_v27 = vld [vmem:[#allocation49_spill] sm:$0xff] }
 0x15e   :  { %v2160_v7 = vadd.f32 %v2156_v3, %v2152_v57  ;;  %v2161_v60 = vadd.f32 %v2157_v32, %v2153_v2  ;;  %3571 = vpow2.f32 %v4616_v53  ;;  %v6615_v62 = vsub.f32 %v4402_v13, %v4588_v46  ;;  %v4690_v53 = vpop.permute.xlu0 %394  ;;  %v6628_v57 = vld [vmem:[#allocation50_spill] sm:$0xff]  ;;  %v6629_v58 = vld [vmem:[#allocation61_spill] sm:$0xff]  ;;  %v6630_v3 = vld [vmem:[#allocation64_spill] sm:$0xff] }
 0x15f   :  { %v1561_v48 = vmul.f32 1.442695, %v6614_v34  ;;  %3573 = vpow2.f32 %v4618_v51  ;;  %v6616_v61 = vsub.f32 %v4409_v20, %v4588_v46  ;;  %v6617_v23 = vsub.f32 %v4566_v42, %v4588_v46  ;;  %6619 = vst [vmem:[#allocation79_spill] sm:$0xff] %v4690_v53  ;;  %v6631_v34 = vld [vmem:[#allocation74_spill] sm:$0xff]  ;;  %v6642_v32 = vld [vmem:[#allocation17_spill] sm:$0xff]  ;;  %v6647_v53 = vld [vmem:[#allocation24_spill] sm:$0xff] }
 0x160   :  { %v1564_v33 = vmul.f32 1.442695, %v6615_v62  ;;  %v6618_v30 = vrot.slane %v4568_v44, 2  ;;  %v6620_v13 = vsub.f32 %v4574_v35, %v4588_v46  ;;  %v6621_v20 = vrot.slane %v4581_v37, 1  ;;  %v6641_v35 = vld [vmem:[#allocation20_spill] sm:$0xff]  ;;  %v6643_v2 = vld [vmem:[#allocation18_spill] sm:$0xff] }
 0x161   :  { %v1567_v40 = vmul.f32 1.442695, %v6616_v61  ;;  %v1570_v45 = vmul.f32 1.442695, %v6617_v23  ;;  %3575 = vpow2.f32 %v1561_v48  ;;  %v1405_v42 = vrot.slane %v6622_v36, 1  ;;  %v6644_v21 = vld [vmem:[#allocation21_spill] sm:$0xff] }
 0x162   :  { %v4688_v47 = vadd.f32 %v6618_v30, %v4568_v44  ;;  %v1573_v51 = vmul.f32 1.442695, %v6620_v13  ;;  %v4698_v29 = vadd.f32 %v6621_v20, %v4581_v37  ;;  %3577 = vpow2.f32 %v1564_v33  ;;  %v6624_v44 = vld [vmem:[#allocation33_spill] sm:$0xff]  ;;  %v4725_v33 = vpop.permute.xlu0 %429 }
 0x163   :  { %3579 = vpow2.f32 %v1567_v40  ;;  %v4708_v41 = vadd.f32 %v1405_v42, %v6622_v36  ;;  %v6625_v37 = vld [vmem:[#allocation37_spill] sm:$0xff]  ;;  %6632 = vst [vmem:[#allocation33_spill] sm:$0xff] %v4725_v33  ;;  %v6645_v33 = vld [vmem:[#allocation22_spill] sm:$0xff] }
 0x164   :  { %v4705_v14 = vmax.f32 %v6624_v44, %v4698_v29  ;;  %3581 = vpow2.f32 %v1570_v45  ;;  %v4743_v44 = vpop.permute.xlu1 %319 }
 0x165   :  { %3583 = vpow2.f32 %v1573_v51  ;;  %6637 = vst [vmem:[#allocation61_spill] sm:$0xff] %v4743_v44 }
 0x166   :  { %v1671_v46 = vsub.f32 %v6625_v37, %v4705_v14  ;;  %v1674_v55 = vsub.f32 %v6626_v28, %v4705_v14  ;;  %v1677_v6 = vsub.f32 %v6627_v27, %v4705_v14  ;;  %v3568_v62 = vpop.eup %3567  ;;  %v6638_v37 = vld [vmem:[#allocation15_spill] sm:$0xff]  ;;  %v6639_v28 = vld [vmem:[#allocation16_spill] sm:$0xff] }
 0x167   :  { %v3570_v30 = vpop.eup %3569  ;;  %v4735_v13 = vmul.f32 %v3568_v62, %v2158_v19  ;;  %v4737_v51 = vmul.f32 %v3568_v62, %v2159_v18  ;;  %v4739_v20 = vmul.f32 %v3568_v62, %v2160_v7  ;;  %v4741_v36 = vmul.f32 %v3568_v62, %v2161_v60  ;;  %v6640_v27 = vld [vmem:[#allocation19_spill] sm:$0xff] }
 0x168   :  { %v4727_v61 = vmul.f32 1.442695, %v1671_v46  ;;  %v4729_v40 = vmul.f32 1.442695, %v1674_v55  ;;  %v4731_v23 = vmul.f32 1.442695, %v1677_v6  ;;  %v3572_v42 = vpop.eup %3571  ;;  %v1704_v46 = vmul.f32 %v3570_v30, %v6638_v37 }
 0x169   :  { %6633 = vst [vmem:[#allocation37_spill] sm:$0xff] %v4735_v13  ;;  %6634 = vst [vmem:[#allocation38_spill] sm:$0xff] %v4737_v51  ;;  %v1705_v55 = vmul.f32 %v3570_v30, %v6639_v28  ;;  %v1706_v6 = vmul.f32 %v3570_v30, %v6640_v27  ;;  %v1707_v45 = vmul.f32 %v3570_v30, %v6641_v35  ;;  %v3574_v48 = vpop.eup %3573 }
 0x16a   :  { %6635 = vst [vmem:[#allocation49_spill] sm:$0xff] %v4739_v20  ;;  %6636 = vst [vmem:[#allocation50_spill] sm:$0xff] %v4741_v36  ;;  %v1575_v19 = vadd.f32 %v3572_v42, %v3570_v30  ;;  %v1708_v18 = vmul.f32 %v3572_v42, %v6642_v32  ;;  %v1709_v7 = vmul.f32 %v3572_v42, %v6643_v2  ;;  %v4756_v32 = vpop.permute.xlu0 %289 }
 0x16b   :  { %v1710_v60 = vmul.f32 %v3572_v42, %v6644_v21  ;;  %v3576_v62 = vpop.eup %3575  ;;  %v1711_v10 = vmul.f32 %v3572_v42, %v6645_v33  ;;  %v1716_v43 = vmul.f32 %v3574_v48, %v6646_v9  ;;  %v1717_v26 = vmul.f32 %v3574_v48, %v6647_v53  ;;  %6649 = vst [vmem:[#allocation64_spill] sm:$0xff] %v4756_v32 }
 0x16c   :  { %v1718_v44 = vmul.f32 %v3574_v48, %v6648_v52  ;;  %v3578_v49 = vpop.eup %3577  ;;  %v1576_v36 = vadd.f32 %v3574_v48, %v1575_v19  ;;  %v1712_v20 = vadd.f32 %v1708_v18, %v1704_v46  ;;  %v1713_v51 = vadd.f32 %v1709_v7, %v1705_v55  ;;  %v4761_v19 = vpop.permute.xlu1 %414 }
 0x16d   :  { %v1714_v30 = vadd.f32 %v1710_v60, %v1706_v6  ;;  %v3580_v13 = vpop.eup %3579  ;;  %v1715_v2 = vadd.f32 %v1711_v10, %v1707_v45  ;;  %v1719_v21 = vmul.f32 %v3574_v48, %v4407_v1  ;;  %v1724_v35 = vmul.f32 %v3576_v62, %v6608_v24  ;;  %6650 = vst [vmem:[#allocation74_spill] sm:$0xff] %v4761_v19  ;;  %v6685_v19 = vld [vmem:[#allocation29_spill] sm:$0xff] }
 0x16e   :  { %v1725_v42 = vmul.f32 %v3576_v62, %v6609_v4  ;;  %v3582_v9 = vpop.eup %3581  ;;  %v1577_v33 = vadd.f32 %v3576_v62, %v1576_v36  ;;  %v1720_v53 = vadd.f32 %v1716_v43, %v1712_v20  ;;  %v1721_v27 = vadd.f32 %v1717_v26, %v1713_v51 }
 0x16f   :  { %v1722_v52 = vadd.f32 %v1718_v44, %v1714_v30  ;;  %v3584_v28 = vpop.eup %3583  ;;  %v1723_v46 = vadd.f32 %v1719_v21, %v1715_v2  ;;  %v1726_v55 = vmul.f32 %v3576_v62, %v4424_v16  ;;  %v1727_v6 = vmul.f32 %v3576_v62, %v4432_v54  ;;  %v4770_v44 = vpop.permute.xlu0 %379 }
 0x170   :  { %v1732_v10 = vmul.f32 %v3578_v49, %v4438_v12  ;;  %v1578_v48 = vadd.f32 %v3578_v49, %v1577_v33  ;;  %v1728_v45 = vadd.f32 %v1724_v35, %v1720_v53  ;;  %v1729_v18 = vadd.f32 %v1725_v42, %v1721_v27  ;;  %6651 = vst [vmem:[#allocation80_spill] sm:$0xff] %v4770_v44 }
 0x171   :  { %v1733_v7 = vmul.f32 %v3578_v49, %v4441_v25  ;;  %v1730_v60 = vadd.f32 %v1726_v55, %v1722_v52  ;;  %v1731_v36 = vadd.f32 %v1727_v6, %v1723_v46  ;;  %v1734_v43 = vmul.f32 %v3578_v49, %v4483_v31 }
 0x172   :  { %v1735_v26 = vmul.f32 %v3578_v49, %v4485_v15  ;;  %v1579_v51 = vadd.f32 %v3580_v13, %v1578_v48  ;;  %v1736_v20 = vadd.f32 %v1732_v10, %v1728_v45  ;;  %v1740_v2 = vmul.f32 %v3580_v13, %v4453_v56  ;;  %v4776_v49 = vpop.permute.xlu1 %449 }
 0x173   :  { %v1737_v21 = vadd.f32 %v1733_v7, %v1729_v18  ;;  %v1738_v62 = vadd.f32 %v1734_v43, %v1730_v60  ;;  %v1741_v53 = vmul.f32 %v3580_v13, %v4455_v11  ;;  %v1742_v35 = vmul.f32 %v3580_v13, %v4492_v5  ;;  %6652 = vst [vmem:[#allocation81_spill] sm:$0xff] %v4776_v49  ;;  %v6683_v49 = vld [vmem:[#allocation23_spill] sm:$0xff] }
 0x174   :  { %v1739_v30 = vadd.f32 %v1735_v26, %v1731_v36  ;;  %v1580_v33 = vadd.f32 %v3582_v9, %v1579_v51  ;;  %v1743_v52 = vmul.f32 %v3580_v13, %v4494_v17  ;;  %v1744_v27 = vadd.f32 %v1740_v2, %v1736_v20 }
 0x175   :  { %v1748_v42 = vmul.f32 %v3582_v9, %v4501_v63  ;;  %v1745_v46 = vadd.f32 %v1741_v53, %v1737_v21  ;;  %v1746_v55 = vadd.f32 %v1742_v35, %v1738_v62  ;;  %v1749_v6 = vmul.f32 %v3582_v9, %v4503_v38  ;;  %v4785_v21 = vpop.permute.xlu0 %444 }
 0x176   :  { %v1750_v10 = vmul.f32 %v3582_v9, %v4548_v59  ;;  %v1581_v48 = vadd.f32 %v3584_v28, %v1580_v33  ;;  %v1747_v45 = vadd.f32 %v1743_v52, %v1739_v30  ;;  %v1751_v18 = vmul.f32 %v3582_v9, %v4560_v39  ;;  %6653 = vst [vmem:[#allocation82_spill] sm:$0xff] %v4785_v21 }
 0x177   :  { %v1752_v7 = vadd.f32 %v1748_v42, %v1744_v27  ;;  %v1753_v60 = vadd.f32 %v1749_v6, %v1745_v46  ;;  %v1756_v13 = vmul.f32 %v3584_v28, %v4508_v0  ;;  %v1757_v43 = vmul.f32 %v3584_v28, %v4543_v50  ;;  %v4795_v27 = vpop.permute.xlu1 %434 }
 0x178   :  { %v1754_v36 = vadd.f32 %v1750_v10, %v1746_v55  ;;  %3585 = vrcp.f32 %v1581_v48  ;;  %v1755_v26 = vadd.f32 %v1751_v18, %v1747_v45  ;;  %v1758_v51 = vmul.f32 %v3584_v28, %v4579_v22  ;;  %6656 = vst [vmem:[#allocation83_spill] sm:$0xff] %v4795_v27  ;;  %v6661_v55 = vld [vmem:[#allocation66_spill] sm:$0xff]  ;;  %v6666_v45 = vld [vmem:[#allocation41_spill] sm:$0xff]  ;;  %v6684_v27 = vld [vmem:[#allocation24_spill] sm:$0xff] }
 0x179   :  { %v1759_v20 = vmul.f32 %v3584_v28, %v4583_v8  ;;  %v1760_v2 = vadd.f32 %v1756_v13, %v1752_v7  ;;  %v1761_v62 = vadd.f32 %v1757_v43, %v1753_v60  ;;  %3587 = vpow2.f32 %v4727_v61  ;;  %v6667_v7 = vld [vmem:[#allocation52_spill] sm:$0xff]  ;;  %v6670_v43 = vld [vmem:[#allocation62_spill] sm:$0xff] }
 0x17a   :  { %v6654_v9 = vsub.f32 %v6628_v57, %v4705_v14  ;;  %v1762_v53 = vadd.f32 %v1758_v51, %v1754_v36  ;;  %3589 = vpow2.f32 %v4729_v40  ;;  %v6655_v33 = vsub.f32 %v6629_v58, %v4705_v14  ;;  %v6660_v58 = vld [vmem:[#allocation65_spill] sm:$0xff] }
 0x17b   :  { %v1763_v35 = vadd.f32 %v1759_v20, %v1755_v26  ;;  %3591 = vpow2.f32 %v4731_v23  ;;  %v6657_v28 = vsub.f32 %v6630_v3, %v4705_v14  ;;  %v6658_v57 = vsub.f32 %v6631_v34, %v4705_v14  ;;  %v4819_v34 = vpop.permute.xlu0 %399  ;;  %v6669_v36 = vld [vmem:[#allocation53_spill] sm:$0xff]  ;;  %v6680_v20 = vld [vmem:[#allocation18_spill] sm:$0xff] }
 0x17c   :  { %v1681_v30 = vmul.f32 1.442695, %v6654_v9  ;;  %v1684_v52 = vmul.f32 1.442695, %v6655_v33  ;;  %v6659_v40 = vsub.f32 %v4698_v29, %v4705_v14  ;;  %v6662_v6 = vmax.f32 %v6660_v58, %v6661_v55  ;;  %6664 = vst [vmem:[#allocation65_spill] sm:$0xff] %v4819_v34  ;;  %v6665_v29 = vld [vmem:[#allocation39_spill] sm:$0xff] }
 0x17d   :  { %v1687_v61 = vmul.f32 1.442695, %v6657_v28  ;;  %v1690_v42 = vmul.f32 1.442695, %v6658_v57  ;;  %v6663_v23 = vrot.slane %v4688_v47, 1  ;;  %v6679_v28 = vld [vmem:[#allocation17_spill] sm:$0xff] }
 0x17e   :  { %3593 = vpow2.f32 %v1681_v30  ;;  %v1693_v46 = vmul.f32 1.442695, %v6659_v40  ;;  %v1629_v10 = vmax.f32 %v6662_v6, %v4708_v41  ;;  %v6681_v51 = vld [vmem:[#allocation21_spill] sm:$0xff]  ;;  %v6682_v26 = vld [vmem:[#allocation22_spill] sm:$0xff] }
 0x17f   :  { %v4814_v48 = vadd.f32 %v6663_v23, %v4688_v47  ;;  %3595 = vpow2.f32 %v1684_v52  ;;  %v4827_v47 = vpop.permute.xlu1 %419 }
 0x180   :  { %3597 = vpow2.f32 %v1687_v61  ;;  %6668 = vst [vmem:[#allocation66_spill] sm:$0xff] %v4827_v47 }
 0x181   :  { %v4817_v3 = vmax.f32 %v1629_v10, %v4814_v48  ;;  %3599 = vpow2.f32 %v1690_v42  ;;  %v6675_v10 = vld [vmem:[#allocation16_spill] sm:$0xff] }
 0x182   :  { %3601 = vpow2.f32 %v1693_v46  ;;  %v3586_v9 = vpop.eup %3585 }
 0x183   :  { %v1631_v14 = vsub.f32 %v6665_v29, %v4817_v3  ;;  %v1634_v18 = vsub.f32 %v6666_v45, %v4817_v3  ;;  %v1637_v60 = vsub.f32 %v6667_v7, %v4817_v3  ;;  %v3588_v61 = vpop.eup %3587  ;;  %v4845_v57 = vmul.f32 %v3586_v9, %v1760_v2  ;;  %v6676_v29 = vld [vmem:[#allocation19_spill] sm:$0xff]  ;;  %v6677_v45 = vld [vmem:[#allocation20_spill] sm:$0xff]  ;;  %v4866_v32 = vpop.permute.xlu1 %439 }
 0x184   :  { %v4847_v42 = vmul.f32 %v3586_v9, %v1761_v62  ;;  %v4849_v40 = vmul.f32 %v3586_v9, %v1762_v53  ;;  %v4851_v46 = vmul.f32 %v3586_v9, %v1763_v35  ;;  %v3590_v58 = vpop.eup %3589  ;;  %v2832_v6 = vmul.f32 %v3588_v61, %v6638_v37  ;;  %6686 = vst [vmem:[#allocation84_spill] sm:$0xff] %v4866_v32 }
 0x185   :  { %v4837_v30 = vmul.f32 1.442695, %v1631_v14  ;;  %v4839_v33 = vmul.f32 1.442695, %v1634_v18  ;;  %v4841_v52 = vmul.f32 1.442695, %v1637_v60  ;;  %v2833_v23 = vmul.f32 %v3588_v61, %v6675_v10  ;;  %v3592_v7 = vpop.eup %3591  ;;  %v4857_v60 = vpop.permute.xlu0 %294 }
 0x186   :  { %6671 = vst [vmem:[#allocation39_spill] sm:$0xff] %v4845_v57  ;;  %6672 = vst [vmem:[#allocation41_spill] sm:$0xff] %v4847_v42  ;;  %v2834_v14 = vmul.f32 %v3588_v61, %v6676_v29  ;;  %v2835_v18 = vmul.f32 %v3588_v61, %v6677_v45  ;;  %v1695_v2 = vadd.f32 %v3590_v58, %v3588_v61 }
 0x187   :  { %6673 = vst [vmem:[#allocation52_spill] sm:$0xff] %v4849_v40  ;;  %6674 = vst [vmem:[#allocation53_spill] sm:$0xff] %v4851_v46  ;;  %v2836_v62 = vmul.f32 %v3590_v58, %v6679_v28  ;;  %v2837_v53 = vmul.f32 %v3590_v58, %v6680_v20  ;;  %v2838_v35 = vmul.f32 %v3590_v58, %v6681_v51 }
 0x188   :  { %6678 = vst [vmem:[#allocation62_spill] sm:$0xff] %v4857_v60  ;;  %v3594_v9 = vpop.eup %3593  ;;  %v2839_v13 = vmul.f32 %v3590_v58, %v6682_v26  ;;  %v2844_v21 = vmul.f32 %v3592_v7, %v6683_v49  ;;  %v2845_v47 = vmul.f32 %v3592_v7, %v6684_v27  ;;  %v2846_v34 = vmul.f32 %v3592_v7, %v6685_v19 }
 0x189   :  { %v3596_v44 = vpop.eup %3595  ;;  %v1696_v60 = vadd.f32 %v3592_v7, %v1695_v2  ;;  %v2840_v61 = vadd.f32 %v2836_v62, %v2832_v6  ;;  %v2841_v45 = vadd.f32 %v2837_v53, %v2833_v23  ;;  %v2842_v28 = vadd.f32 %v2838_v35, %v2834_v14 }
 0x18a   :  { %v3598_v29 = vpop.eup %3597  ;;  %v2843_v20 = vadd.f32 %v2839_v13, %v2835_v18  ;;  %v2847_v51 = vmul.f32 %v3592_v7, %v4407_v1  ;;  %v2852_v10 = vmul.f32 %v3594_v9, %v6608_v24  ;;  %v2853_v58 = vmul.f32 %v3594_v9, %v6609_v4  ;;  %v4874_v13 = vpop.permute.xlu0 %454 }
 0x18b   :  { %v3600_v49 = vpop.eup %3599  ;;  %v1697_v26 = vadd.f32 %v3594_v9, %v1696_v60  ;;  %v2848_v27 = vadd.f32 %v2844_v21, %v2840_v61  ;;  %v2849_v37 = vadd.f32 %v2845_v47, %v2841_v45  ;;  %v2850_v19 = vadd.f32 %v2846_v34, %v2842_v28  ;;  %6687 = vst [vmem:[#allocation85_spill] sm:$0xff] %v4874_v13  ;;  %v4879_v47 = vpop.permute.xlu1 %459 }
 0x18c   :  { %v3602_v46 = vpop.eup %3601  ;;  %v2851_v40 = vadd.f32 %v2847_v51, %v2843_v20  ;;  %v2854_v2 = vmul.f32 %v3594_v9, %v4424_v16  ;;  %v2855_v6 = vmul.f32 %v3594_v9, %v4432_v54  ;;  %v2860_v23 = vmul.f32 %v3596_v44, %v4438_v12  ;;  %6688 = vst [vmem:[#allocation86_spill] sm:$0xff] %v4879_v47 }
 0x18d   :  { %v1698_v14 = vadd.f32 %v3596_v44, %v1697_v26  ;;  %v2856_v18 = vadd.f32 %v2852_v10, %v2848_v27  ;;  %v2857_v7 = vadd.f32 %v2853_v58, %v2849_v37  ;;  %v2861_v62 = vmul.f32 %v3596_v44, %v4441_v25 }
 0x18e   :  { %v2858_v53 = vadd.f32 %v2854_v2, %v2850_v19  ;;  %v2859_v60 = vadd.f32 %v2855_v6, %v2851_v40  ;;  %v2862_v21 = vmul.f32 %v3596_v44, %v4483_v31  ;;  %v2863_v34 = vmul.f32 %v3596_v44, %v4485_v15  ;;  %v4888_v6 = vpop.permute.xlu0 %299 }
 0x18f   :  { %v1699_v51 = vadd.f32 %v3598_v29, %v1698_v14  ;;  %v2864_v20 = vadd.f32 %v2860_v23, %v2856_v18  ;;  %v2865_v28 = vadd.f32 %v2861_v62, %v2857_v7  ;;  %v2868_v45 = vmul.f32 %v3598_v29, %v4453_v56  ;;  %6689 = vst [vmem:[#allocation87_spill] sm:$0xff] %v4888_v6 }
 0x190   :  { %v2866_v35 = vadd.f32 %v2862_v21, %v2858_v53  ;;  %v2867_v9 = vadd.f32 %v2863_v34, %v2859_v60  ;;  %v2869_v27 = vmul.f32 %v3598_v29, %v4455_v11  ;;  %v2870_v37 = vmul.f32 %v3598_v29, %v4492_v5  ;;  %v4893_v21 = vpop.permute.xlu1 %470 }
 0x191   :  { %v1700_v26 = vadd.f32 %v3600_v49, %v1699_v51  ;;  %v2871_v19 = vmul.f32 %v3598_v29, %v4494_v17  ;;  %v2872_v40 = vadd.f32 %v2868_v45, %v2864_v20  ;;  %v2876_v10 = vmul.f32 %v3600_v49, %v4501_v63  ;;  %6690 = vst [vmem:[#allocation88_spill] sm:$0xff] %v4893_v21 }
 0x192   :  { %v2873_v44 = vadd.f32 %v2869_v27, %v2865_v28  ;;  %v2874_v61 = vadd.f32 %v2870_v37, %v2866_v35  ;;  %v2877_v58 = vmul.f32 %v3600_v49, %v4503_v38  ;;  %v2878_v2 = vmul.f32 %v3600_v49, %v4548_v59 }
 0x193   :  { %v1701_v23 = vadd.f32 %v3602_v46, %v1700_v26  ;;  %v2875_v14 = vadd.f32 %v2871_v19, %v2867_v9  ;;  %v2879_v18 = vmul.f32 %v3600_v49, %v4560_v39  ;;  %v2880_v7 = vadd.f32 %v2876_v10, %v2872_v40  ;;  %v4921_v40 = vpop.permute.xlu0 %466 }
 0x194   :  { %v2881_v62 = vadd.f32 %v2877_v58, %v2873_v44  ;;  %v2882_v53 = vadd.f32 %v2878_v2, %v2874_v61  ;;  %v2884_v29 = vmul.f32 %v3602_v46, %v4508_v0  ;;  %v2885_v60 = vmul.f32 %v3602_v46, %v4543_v50  ;;  %6698 = vst [vmem:[#allocation94_spill] sm:$0xff] %v4921_v40 }
 0x195   :  { %3603 = vrcp.f32 %v1701_v23  ;;  %v2883_v34 = vadd.f32 %v2879_v18, %v2875_v14  ;;  %v2886_v51 = vmul.f32 %v3602_v46, %v4579_v22  ;;  %v2887_v20 = vmul.f32 %v3602_v46, %v4583_v8 }
 0x196   :  { %v2888_v28 = vadd.f32 %v2884_v29, %v2880_v7  ;;  %v2889_v45 = vadd.f32 %v2885_v60, %v2881_v62  ;;  %3605 = vpow2.f32 %v4837_v30  ;;  %v6691_v49 = vsub.f32 %v6669_v36, %v4817_v3  ;;  %v6704_v7 = vld [vmem:[#allocation53_spill] sm:$0xff] }
 0x197   :  { %v2890_v9 = vadd.f32 %v2886_v51, %v2882_v53  ;;  %v2891_v27 = vadd.f32 %v2887_v20, %v2883_v34  ;;  %3607 = vpow2.f32 %v4839_v33  ;;  %v6692_v37 = vsub.f32 %v6670_v43, %v4817_v3  ;;  %v6713_v20 = vld [vmem:[#allocation37_spill] sm:$0xff] }
 0x198   :  { %v1641_v35 = vmul.f32 1.442695, %v6691_v49  ;;  %v4906_v19 = vrot.slane %v4893_v21, 1  ;;  %v4909_v46 = vrot.slane %v4893_v21, 2  ;;  %v4912_v30 = vrot.slane %v4893_v21, 3 }
 0x199   :  { %v1644_v26 = vmul.f32 1.442695, %v6692_v37  ;;  %3609 = vpow2.f32 %v4841_v52  ;;  %v4916_v36 = vrot.slane %v4893_v21, 4  ;;  %v4919_v33 = vrot.slane %v4893_v21, 5 }
 0x19a   :  { %6693 = vst [vmem:[#allocation89_spill] sm:$0xff] %v4906_v19  ;;  %6694 = vst [vmem:[#allocation90_spill] sm:$0xff] %v4909_v46  ;;  %3611 = vpow2.f32 %v1641_v35  ;;  %v6699_v43 = vsub.f32 %v6661_v55, %v4817_v3  ;;  %v4927_v44 = vrot.slane %v4893_v21, 6  ;;  %v6701_v52 = vsub.f32 %v4708_v41, %v4817_v3  ;;  %v6703_v55 = vld [vmem:[#allocation52_spill] sm:$0xff]  ;;  %v6715_v35 = vld [vmem:[#allocation6_spill] sm:$0xff] }
 0x19b   :  { %6695 = vst [vmem:[#allocation91_spill] sm:$0xff] %v4912_v30  ;;  %6696 = vst [vmem:[#allocation92_spill] sm:$0xff] %v4916_v36  ;;  %3613 = vpow2.f32 %v1644_v26  ;;  %v4933_v58 = vadd.f32 1.0, %v4845_v57  ;;  %v6702_v2 = vsub.f32 %v4814_v48, %v4817_v3  ;;  %v4939_v14 = vadd.f32 1.0, %v4847_v42  ;;  %v6731_v46 = vld [vmem:[#allocation17_spill] sm:$0xff] }
 0x19c   :  { %6697 = vst [vmem:[#allocation93_spill] sm:$0xff] %v4919_v33  ;;  %v1647_v10 = vmul.f32 1.442695, %v6699_v43  ;;  %6700 = vst [vmem:[#allocation95_spill] sm:$0xff] %v4927_v44  ;;  %v1650_v61 = vmul.f32 1.442695, %v6701_v52  ;;  %v4977_v37 = vmul.f32 %v4845_v57, %v6715_v35 }
 0x19d   :  { %v1653_v23 = vmul.f32 1.442695, %v6702_v2  ;;  %v4942_v18 = vadd.f32 1.0, %v6703_v55  ;;  %v4945_v62 = vadd.f32 1.0, %v6704_v7  ;;  %v4948_v53 = vrot.slane %v4893_v21, 7  ;;  %v6717_v43 = vld [vmem:[#allocation38_spill] sm:$0xff] }
 0x19e   :  { %v4951_v41 = vrot.slane %v4921_v40, 1  ;;  %v4954_v29 = vrot.slane %v4921_v40, 2  ;;  %v4957_v48 = vrot.slane %v4921_v40, 3  ;;  %v4960_v3 = vrot.slane %v4921_v40, 4  ;;  %6716 = vst [vmem:[#allocation104_spill] sm:$0xff] %v4977_v37 }
 0x19f   :  { %6705 = vst [vmem:[#allocation96_spill] sm:$0xff] %v4948_v53  ;;  %v4963_v60 = vrot.slane %v4921_v40, 5  ;;  %v4966_v34 = vrot.slane %v4921_v40, 6  ;;  %3615 = vpow2.f32 %v1647_v10  ;;  %v4969_v51 = vrot.slane %v4921_v40, 7  ;;  %v3604_v26 = vpop.eup %3603  ;;  %v6719_v10 = vld [vmem:[#allocation49_spill] sm:$0xff] }
 0x1a0   :  { %6706 = vst [vmem:[#allocation97_spill] sm:$0xff] %v4951_v41  ;;  %6707 = vst [vmem:[#allocation98_spill] sm:$0xff] %v4954_v29  ;;  %3617 = vpow2.f32 %v1650_v61  ;;  %v4973_v49 = vmul.f32 %v6713_v20, %v4933_v58  ;;  %v4981_v52 = vmul.f32 %v6717_v43, %v4939_v14  ;;  %v4985_v2 = vmul.f32 %v6719_v10, %v4942_v18  ;;  %v6721_v61 = vld [vmem:[#allocation50_spill] sm:$0xff]  ;;  %v3606_v20 = vpop.eup %3605  ;;  %v6727_v43 = vld [vmem:[#allocation15_spill] sm:$0xff] }
 0x1a1   :  { %6708 = vst [vmem:[#allocation99_spill] sm:$0xff] %v4957_v48  ;;  %6709 = vst [vmem:[#allocation100_spill] sm:$0xff] %v4960_v3  ;;  %3619 = vpow2.f32 %v1653_v23  ;;  %v4989_v53 = vmul.f32 %v6721_v61, %v4945_v62  ;;  %v4991_v44 = vmul.f32 %v3604_v26, %v2888_v28  ;;  %v4993_v33 = vmul.f32 %v3604_v26, %v2889_v45  ;;  %v3608_v36 = vpop.eup %3607  ;;  %v6729_v10 = vld [vmem:[#allocation19_spill] sm:$0xff] }
 0x1a2   :  { %6710 = vst [vmem:[#allocation101_spill] sm:$0xff] %v4963_v60  ;;  %6711 = vst [vmem:[#allocation102_spill] sm:$0xff] %v4966_v34  ;;  %v4995_v35 = vmul.f32 %v3604_v26, %v2890_v9  ;;  %v4997_v23 = vmul.f32 %v3604_v26, %v2891_v27  ;;  %v2467_v21 = vmul.f32 %v3606_v20, %v6727_v43  ;;  %v6730_v60 = vld [vmem:[#allocation20_spill] sm:$0xff]  ;;  %v6734_v27 = vld [vmem:[#allocation22_spill] sm:$0xff] }
 0x1a3   :  { %6712 = vst [vmem:[#allocation103_spill] sm:$0xff] %v4969_v51  ;;  %6714 = vst [vmem:[#allocation37_spill] sm:$0xff] %v4973_v49  ;;  %v6728_v51 = vld [vmem:[#allocation16_spill] sm:$0xff]  ;;  %v2469_v34 = vmul.f32 %v3606_v20, %v6729_v10  ;;  %v2470_v3 = vmul.f32 %v3606_v20, %v6730_v60  ;;  %v3610_v61 = vpop.eup %3609  ;;  %v1655_v40 = vadd.f32 %v3608_v36, %v3606_v20 }
 0x1a4   :  { %6718 = vst [vmem:[#allocation38_spill] sm:$0xff] %v4981_v52  ;;  %6720 = vst [vmem:[#allocation49_spill] sm:$0xff] %v4985_v2  ;;  %v2468_v30 = vmul.f32 %v3606_v20, %v6728_v51  ;;  %v2471_v28 = vmul.f32 %v3608_v36, %v6731_v46  ;;  %v2474_v26 = vmul.f32 %v3608_v36, %v6734_v27  ;;  %v6736_v43 = vld [vmem:[#allocation24_spill] sm:$0xff]  ;;  %v6737_v51 = vld [vmem:[#allocation29_spill] sm:$0xff] }
 0x1a5   :  { %6722 = vst [vmem:[#allocation50_spill] sm:$0xff] %v4989_v53  ;;  %6723 = vst [vmem:[#allocation105_spill] sm:$0xff] %v4991_v44  ;;  %v6732_v44 = vld [vmem:[#allocation18_spill] sm:$0xff]  ;;  %v2480_v48 = vmul.f32 %v3610_v61, %v6736_v43  ;;  %v2481_v29 = vmul.f32 %v3610_v61, %v6737_v51  ;;  %v1656_v41 = vadd.f32 %v3610_v61, %v1655_v40 }
 0x1a6   :  { %6724 = vst [vmem:[#allocation106_spill] sm:$0xff] %v4993_v33  ;;  %6725 = vst [vmem:[#allocation107_spill] sm:$0xff] %v4995_v35  ;;  %v2472_v45 = vmul.f32 %v3608_v36, %v6732_v44  ;;  %v6733_v33 = vld [vmem:[#allocation21_spill] sm:$0xff]  ;;  %v3612_v35 = vpop.eup %3611  ;;  %v2475_v60 = vadd.f32 %v2471_v28, %v2467_v21  ;;  %v2478_v13 = vadd.f32 %v2474_v26, %v2470_v3 }
 0x1a7   :  { %6726 = vst [vmem:[#allocation108_spill] sm:$0xff] %v4997_v23  ;;  %v2473_v9 = vmul.f32 %v3608_v36, %v6733_v33  ;;  %v6735_v23 = vld [vmem:[#allocation23_spill] sm:$0xff]  ;;  %v3614_v10 = vpop.eup %3613  ;;  %v2482_v46 = vmul.f32 %v3610_v61, %v4407_v1  ;;  %v2487_v44 = vmul.f32 %v3612_v35, %v6608_v24  ;;  %v2488_v33 = vmul.f32 %v3612_v35, %v6609_v4 }
 0x1a8   :  { %v2479_v19 = vmul.f32 %v3610_v61, %v6735_v23  ;;  %v2476_v47 = vadd.f32 %v2472_v45, %v2468_v30  ;;  %v1657_v32 = vadd.f32 %v3612_v35, %v1656_v41  ;;  %v2489_v51 = vmul.f32 %v3612_v35, %v4424_v16 }
 0x1a9   :  { %v2477_v20 = vadd.f32 %v2473_v9, %v2469_v34  ;;  %v3616_v37 = vpop.eup %3615  ;;  %v2486_v43 = vadd.f32 %v2482_v46, %v2478_v13  ;;  %v2490_v40 = vmul.f32 %v3612_v35, %v4432_v54  ;;  %v2495_v21 = vmul.f32 %v3614_v10, %v4438_v12 }
 0x1aa   :  { %v2483_v36 = vadd.f32 %v2479_v19, %v2475_v60  ;;  %v2484_v27 = vadd.f32 %v2480_v48, %v2476_v47  ;;  %v3618_v30 = vpop.eup %3617  ;;  %v1658_v3 = vadd.f32 %v3614_v10, %v1657_v32  ;;  %v2496_v24 = vmul.f32 %v3614_v10, %v4441_v25 }
 0x1ab   :  { %v2485_v23 = vadd.f32 %v2481_v29, %v2477_v20  ;;  %v3620_v61 = vpop.eup %3619  ;;  %v2494_v41 = vadd.f32 %v2490_v40, %v2486_v43  ;;  %v2497_v47 = vmul.f32 %v3614_v10, %v4483_v31  ;;  %v2498_v19 = vmul.f32 %v3614_v10, %v4485_v15 }
 0x1ac   :  { %v2491_v34 = vadd.f32 %v2487_v44, %v2483_v36  ;;  %v2492_v1 = vadd.f32 %v2488_v33, %v2484_v27  ;;  %v1659_v13 = vadd.f32 %v3616_v37, %v1658_v3  ;;  %v2503_v54 = vmul.f32 %v3616_v37, %v4453_v56  ;;  %v6745_v3 = vld [vmem:[#allocation9_spill] sm:$0xff] }
 0x1ad   :  { %v2493_v4 = vadd.f32 %v2489_v51, %v2485_v23  ;;  %v2502_v12 = vadd.f32 %v2498_v19, %v2494_v41  ;;  %v2504_v32 = vmul.f32 %v3616_v37, %v4455_v11  ;;  %v2505_v35 = vmul.f32 %v3616_v37, %v4492_v5  ;;  %v6740_v51 = vld [vmem:[#allocation7_spill] sm:$0xff] }
 0x1ae   :  { %v2499_v29 = vadd.f32 %v2495_v21, %v2491_v34  ;;  %v2500_v16 = vadd.f32 %v2496_v24, %v2492_v1  ;;  %v1660_v28 = vadd.f32 %v3618_v30, %v1659_v13  ;;  %v2506_v25 = vmul.f32 %v3616_v37, %v4494_v17  ;;  %v6746_v1 = vld [vmem:[#allocation12_spill] sm:$0xff]  ;;  %v6747_v24 = vld [vmem:[#allocation11_spill] sm:$0xff]  ;;  %v6751_v13 = vld [vmem:[#allocation26_spill] sm:$0xff] }
 0x1af   :  { %v2501_v48 = vadd.f32 %v2497_v47, %v2493_v4  ;;  %v2511_v9 = vmul.f32 %v3618_v30, %v4501_v63  ;;  %v2512_v15 = vmul.f32 %v3618_v30, %v4503_v38  ;;  %v2513_v10 = vmul.f32 %v3618_v30, %v4548_v59  ;;  %v6738_v59 = vld [vmem:[#allocation5_spill] sm:$0xff]  ;;  %v6750_v47 = vld [vmem:[#allocation28_spill] sm:$0xff] }
 0x1b0   :  { %v2507_v45 = vadd.f32 %v2503_v54, %v2499_v29  ;;  %v2508_v31 = vadd.f32 %v2504_v32, %v2500_v16  ;;  %v1661_v60 = vadd.f32 %v3620_v61, %v1660_v28  ;;  %v2510_v56 = vadd.f32 %v2506_v25, %v2502_v12  ;;  %v6749_v4 = vld [vmem:[#allocation13_spill] sm:$0xff]  ;;  %v6752_v16 = vld [vmem:[#allocation31_spill] sm:$0xff]  ;;  %v6754_v32 = vld [vmem:[#allocation36_spill] sm:$0xff] }
 0x1b1   :  { %v2509_v26 = vadd.f32 %v2505_v35, %v2501_v48  ;;  %v2514_v20 = vmul.f32 %v3618_v30, %v4560_v39  ;;  %v2519_v5 = vmul.f32 %v3620_v61, %v4508_v0  ;;  %v2520_v17 = vmul.f32 %v3620_v61, %v4543_v50  ;;  %v6739_v39 = vld [vmem:[#allocation8_spill] sm:$0xff]  ;;  %v6753_v48 = vld [vmem:[#allocation30_spill] sm:$0xff]  ;;  %v6755_v28 = vld [vmem:[#allocation35_spill] sm:$0xff] }
 0x1b2   :  { %v2515_v46 = vadd.f32 %v2511_v9, %v2507_v45  ;;  %v2516_v11 = vadd.f32 %v2512_v15, %v2508_v31  ;;  %3621 = vrcp.f32 %v1661_v60  ;;  %v2521_v63 = vmul.f32 %v3620_v61, %v4579_v22  ;;  %v6756_v45 = vld [vmem:[#allocation42_spill] sm:$0xff]  ;;  %v6757_v31 = vld [vmem:[#allocation40_spill] sm:$0xff]  ;;  %v6759_v60 = vld [vmem:[#allocation43_spill] sm:$0xff] }
 0x1b3   :  { %v2517_v44 = vadd.f32 %v2513_v10, %v2509_v26  ;;  %v2518_v37 = vadd.f32 %v2514_v20, %v2510_v56  ;;  %v2522_v33 = vmul.f32 %v3620_v61, %v4583_v8  ;;  %v5033_v27 = vmul.f32 %v4847_v42, %v6738_v59  ;;  %v6748_v61 = vld [vmem:[#allocation14_spill] sm:$0xff]  ;;  %v6758_v15 = vld [vmem:[#allocation44_spill] sm:$0xff]  ;;  %v6791_v59 = vld [vmem:[#allocation25_spill] sm:$0xff] }
 0x1b4   :  { %v2523_v38 = vadd.f32 %v2519_v5, %v2515_v46  ;;  %v2524_v36 = vadd.f32 %v2520_v17, %v2516_v11  ;;  %v5037_v23 = vmul.f32 %v6703_v55, %v6739_v39  ;;  %v5041_v0 = vadd.f32 %v4973_v49, %v4933_v58  ;;  %v6744_v58 = vld [vmem:[#allocation10_spill] sm:$0xff]  ;;  %v6760_v20 = vld [vmem:[#allocation48_spill] sm:$0xff]  ;;  %v6761_v11 = vld [vmem:[#allocation47_spill] sm:$0xff] }
 0x1b5   :  { %v2525_v50 = vadd.f32 %v2521_v63, %v2517_v44  ;;  %v2526_v43 = vadd.f32 %v2522_v33, %v2518_v37  ;;  %v5045_v22 = vmul.f32 %v6704_v7, %v6740_v51  ;;  %v5049_v8 = vadd.f32 %v4981_v52, %v4939_v14  ;;  %v6762_v5 = vld [vmem:[#allocation54_spill] sm:$0xff]  ;;  %v6763_v37 = vld [vmem:[#allocation51_spill] sm:$0xff]  ;;  %v6764_v33 = vld [vmem:[#allocation56_spill] sm:$0xff] }
 0x1b6   :  { %v5053_v40 = vadd.f32 %v4985_v2, %v4942_v18  ;;  %v5057_v21 = vadd.f32 %v4989_v53, %v4945_v62  ;;  %v5061_v30 = vmul.f32 %v4845_v57, %v6744_v58  ;;  %v5065_v34 = vmul.f32 %v4847_v42, %v6745_v3  ;;  %v6773_v3 = vld [vmem:[#allocation34_spill] sm:$0xff]  ;;  %v6793_v49 = vld [vmem:[#allocation80_spill] sm:$0xff] }
 0x1b7   :  { %6741 = vst [vmem:[#allocation15_spill] sm:$0xff] %v5049_v8  ;;  %v5069_v14 = vmul.f32 %v6703_v55, %v6746_v1  ;;  %v5073_v18 = vmul.f32 %v6704_v7, %v6747_v24  ;;  %v1780_v62 = vmul.f32 %v4845_v57, %v6748_v61  ;;  %v1781_v41 = vmul.f32 %v4847_v42, %v6749_v4  ;;  %v6772_v1 = vld [vmem:[#allocation68_spill] sm:$0xff] }
 0x1b8   :  { %6742 = vst [vmem:[#allocation16_spill] sm:$0xff] %v5053_v40  ;;  %6743 = vst [vmem:[#allocation19_spill] sm:$0xff] %v5057_v21  ;;  %v5081_v19 = vmul.f32 %v6703_v55, %v6750_v47  ;;  %v5085_v29 = vmul.f32 %v6704_v7, %v6751_v13  ;;  %v1784_v54 = vmul.f32 %v4845_v57, %v6752_v16  ;;  %v6769_v16 = vld [vmem:[#allocation64_spill] sm:$0xff]  ;;  %v6770_v13 = vld [vmem:[#allocation62_spill] sm:$0xff] }
 0x1b9   :  { %v1785_v12 = vmul.f32 %v4847_v42, %v6753_v48  ;;  %v5093_v35 = vmul.f32 %v6703_v55, %v6754_v32  ;;  %v5097_v25 = vmul.f32 %v6704_v7, %v6755_v28  ;;  %v1788_v9 = vmul.f32 %v4845_v57, %v6756_v45  ;;  %v6766_v45 = vld [vmem:[#allocation58_spill] sm:$0xff] }
 0x1ba   :  { %v1789_v26 = vmul.f32 %v4847_v42, %v6757_v31  ;;  %v1790_v10 = vmul.f32 %v6703_v55, %v6758_v15  ;;  %v5107_v56 = vmul.f32 %v6704_v7, %v6759_v60  ;;  %v1792_v46 = vmul.f32 %v4845_v57, %v6760_v20  ;;  %v6765_v31 = vld [vmem:[#allocation55_spill] sm:$0xff]  ;;  %v6767_v20 = vld [vmem:[#allocation57_spill] sm:$0xff] }
 0x1bb   :  { %v1793_v44 = vmul.f32 %v4847_v42, %v6761_v11  ;;  %v1794_v17 = vmul.f32 %v6703_v55, %v6762_v5  ;;  %v5117_v63 = vmul.f32 %v6704_v7, %v6763_v37  ;;  %v1796_v15 = vmul.f32 %v4845_v57, %v6764_v33  ;;  %v6768_v11 = vld [vmem:[#allocation75_spill] sm:$0xff] }
 0x1bc   :  { %v1797_v60 = vmul.f32 %v4847_v42, %v6765_v31  ;;  %v1798_v28 = vmul.f32 %v6703_v55, %v6766_v45  ;;  %v1799_v32 = vmul.f32 %v6704_v7, %v6767_v20  ;;  %v1800_v48 = vmul.f32 %v4845_v57, %v6768_v11  ;;  %v3622_v5 = vpop.eup %3621  ;;  %v6771_v31 = vld [vmem:[#allocation69_spill] sm:$0xff] }
 0x1bd   :  { %v1801_v37 = vmul.f32 %v4847_v42, %v6769_v16  ;;  %v1802_v47 = vmul.f32 %v6703_v55, %v6770_v13  ;;  %v1803_v33 = vmul.f32 %v6704_v7, %v4888_v6  ;;  %v5137_v4 = vmul.f32 %v4845_v57, %v6771_v31  ;;  %v6774_v13 = vld [vmem:[#allocation61_spill] sm:$0xff]  ;;  %v6776_v6 = vld [vmem:[#allocation60_spill] sm:$0xff] }
 0x1be   :  { %v2527_v45 = vmul.f32 %v3622_v5, %v2523_v38  ;;  %v2528_v61 = vmul.f32 %v3622_v5, %v2524_v36  ;;  %v2529_v20 = vmul.f32 %v3622_v5, %v2525_v50  ;;  %v2530_v24 = vmul.f32 %v3622_v5, %v2526_v43  ;;  %v6777_v38 = vld [vmem:[#allocation59_spill] sm:$0xff]  ;;  %v6780_v5 = vld [vmem:[#allocation76_spill] sm:$0xff] }
 0x1bf   :  { %v5141_v11 = vmul.f32 %v4847_v42, %v6772_v1  ;;  %v5145_v16 = vmul.f32 %v6703_v55, %v6773_v3  ;;  %v5149_v58 = vmul.f32 %v6704_v7, %v6774_v13  ;;  %v5153_v31 = vmul.f32 %v4845_v57, %v6776_v6  ;;  %v6778_v50 = vld [vmem:[#allocation71_spill] sm:$0xff] }
 0x1c0   :  { %v5157_v36 = vmul.f32 %v4847_v42, %v6777_v38  ;;  %v5161_v43 = vmul.f32 %v6703_v55, %v6778_v50  ;;  %v5165_v3 = vmul.f32 %v6704_v7, %v6780_v5  ;;  %v6782_v1 = vld [vmem:[#allocation67_spill] sm:$0xff]  ;;  %v5172_v53 = vmul.f32 %v2527_v45, %v5041_v0  ;;  %v6785_v38 = vld [vmem:[#allocation72_spill] sm:$0xff]  ;;  %v6789_v5 = vld [vmem:[#allocation70_spill] sm:$0xff] }
 0x1c1   :  { %6775 = vst [vmem:[#allocation20_spill] sm:$0xff] %v5149_v58  ;;  %v5169_v13 = vmul.f32 %v4845_v57, %v6782_v1  ;;  %v6784_v6 = vld [vmem:[#allocation63_spill] sm:$0xff]  ;;  %v5180_v2 = vmul.f32 %v6703_v55, %v6785_v38  ;;  %v5188_v52 = vmul.f32 %v4845_v57, %v6789_v5  ;;  %v6790_v1 = vld [vmem:[#allocation32_spill] sm:$0xff]  ;;  %v5200_v38 = vmul.f32 %v6704_v7, %v6793_v49  ;;  %v6797_v5 = vld [vmem:[#allocation45_spill] sm:$0xff] }
 0x1c2   :  { %6779 = vst [vmem:[#allocation17_spill] sm:$0xff] %v5161_v43  ;;  %6781 = vst [vmem:[#allocation18_spill] sm:$0xff] %v5165_v3  ;;  %v5176_v51 = vmul.f32 %v4847_v42, %v6784_v6  ;;  %v6787_v50 = vld [vmem:[#allocation27_spill] sm:$0xff]  ;;  %v5192_v45 = vmul.f32 %v4847_v42, %v6790_v1  ;;  %v5196_v6 = vmul.f32 %v6703_v55, %v6791_v59 }
 0x1c3   :  { %6783 = vst [vmem:[#allocation21_spill] sm:$0xff] %v5172_v53  ;;  %6786 = vst [vmem:[#allocation22_spill] sm:$0xff] %v5180_v2  ;;  %v5184_v39 = vmul.f32 %v6704_v7, %v6787_v50  ;;  %v5203_v3 = vmul.f32 %v2528_v61, %v5049_v8  ;;  %v6796_v50 = vld [vmem:[#allocation73_spill] sm:$0xff]  ;;  %v5211_v58 = vmul.f32 %v4847_v42, %v6797_v5  ;;  %v6798_v1 = vld [vmem:[#allocation79_spill] sm:$0xff] }
 0x1c4   :  { %6792 = vst [vmem:[#allocation24_spill] sm:$0xff] %v5196_v6  ;;  %6794 = vst [vmem:[#allocation29_spill] sm:$0xff] %v5200_v38  ;;  %v5215_v2 = vmul.f32 %v6703_v55, %v6798_v1  ;;  %v5218_v59 = vmul.f32 %v2529_v20, %v5053_v40  ;;  %v5221_v49 = vmul.f32 %v2530_v24, %v5057_v21  ;;  %v6802_v61 = vld [vmem:[#allocation65_spill] sm:$0xff]  ;;  %v6807_v20 = vld [vmem:[#allocation74_spill] sm:$0xff] }
 0x1c5   :  { %6788 = vst [vmem:[#allocation23_spill] sm:$0xff] %v5184_v39  ;;  %6795 = vst [vmem:[#allocation109_spill] sm:$0xff] %v5203_v3  ;;  %v5207_v39 = vmul.f32 %v4845_v57, %v6796_v50  ;;  %v5225_v3 = vmul.f32 %v6704_v7, %v6802_v61  ;;  %v6804_v50 = vld [vmem:[#allocation46_spill] sm:$0xff]  ;;  %v5233_v5 = vadd.f32 %v5172_v53, %v5041_v0  ;;  %v6806_v1 = vld [vmem:[#allocation77_spill] sm:$0xff] }
 0x1c6   :  { %6799 = vst [vmem:[#allocation110_spill] sm:$0xff] %v5215_v2  ;;  %6800 = vst [vmem:[#allocation111_spill] sm:$0xff] %v5218_v59  ;;  %v5229_v8 = vmul.f32 %v4845_v57, %v6804_v50  ;;  %v5237_v38 = vmul.f32 %v4847_v42, %v6806_v1  ;;  %v5241_v24 = vmul.f32 %v6703_v55, %v6807_v20  ;;  %v6811_v21 = vld [vmem:[#allocation78_spill] sm:$0xff]  ;;  %v6812_v59 = vld [vmem:[#allocation104_spill] sm:$0xff] }
 0x1c7   :  { %6801 = vst [vmem:[#allocation112_spill] sm:$0xff] %v5221_v49  ;;  %6803 = vst [vmem:[#allocation113_spill] sm:$0xff] %v5225_v3  ;;  %v6809_v49 = vld [vmem:[#allocation66_spill] sm:$0xff]  ;;  %v5249_v50 = vmul.f32 %v4845_v57, %v6811_v21  ;;  %v1836_v0 = vadd.f32 %v5033_v27, %v6812_v59  ;;  %v1845_v53 = vadd.f32 %v5065_v34, %v5061_v30 }
 0x1c8   :  { %6805 = vst [vmem:[#allocation114_spill] sm:$0xff] %v5233_v5  ;;  %6808 = vst [vmem:[#allocation115_spill] sm:$0xff] %v5241_v24  ;;  %v5245_v61 = vmul.f32 %v6704_v7, %v6809_v49  ;;  %v1854_v1 = vadd.f32 %v1781_v41, %v1780_v62  ;;  %v1863_v5 = vadd.f32 %v1785_v12, %v1784_v54 }
 0x1c9   :  { %v1872_v40 = vadd.f32 %v1789_v26, %v1788_v9  ;;  %v1881_v3 = vadd.f32 %v1793_v44, %v1792_v46  ;;  %v1890_v20 = vadd.f32 %v1797_v60, %v1796_v15  ;;  %v1837_v24 = vadd.f32 %v1836_v0, %v5037_v23 }
 0x1ca   :  { %6810 = vst [vmem:[#allocation116_spill] sm:$0xff] %v5245_v61  ;;  %v1846_v49 = vadd.f32 %v1845_v53, %v5069_v14  ;;  %v1855_v61 = vadd.f32 %v1854_v1, %v5081_v19  ;;  %v1899_v2 = vadd.f32 %v1801_v37, %v1800_v48  ;;  %v1864_v21 = vadd.f32 %v1863_v5, %v5093_v35  ;;  %v6813_v5 = vld [vmem:[#allocation33_spill] sm:$0xff] }
 0x1cb   :  { %v1873_v6 = vadd.f32 %v1872_v40, %v1790_v10  ;;  %v1882_v43 = vadd.f32 %v1881_v3, %v1794_v17  ;;  %v1891_v59 = vadd.f32 %v1890_v20, %v1798_v28  ;;  %v1838_v27 = vadd.f32 %v1837_v24, %v5045_v22  ;;  %v6814_v20 = vld [vmem:[#allocation83_spill] sm:$0xff] }
 0x1cc   :  { %v1847_v30 = vadd.f32 %v1846_v49, %v5073_v18  ;;  %v1856_v34 = vadd.f32 %v1855_v61, %v5085_v29  ;;  %v1900_v62 = vadd.f32 %v1899_v2, %v1802_v47  ;;  %v1865_v41 = vadd.f32 %v1864_v21, %v5097_v25 }
 0x1cd   :  { %v1874_v23 = vadd.f32 %v1873_v6, %v5107_v56  ;;  %v1883_v53 = vadd.f32 %v1882_v43, %v5117_v63  ;;  %v1892_v1 = vadd.f32 %v1891_v59, %v1799_v32  ;;  %v1839_v14 = vrot.slane %v1838_v27, 4 }
 0x1ce   :  { %v1848_v19 = vrot.slane %v1847_v30, 4  ;;  %v1857_v54 = vrot.slane %v1856_v34, 4  ;;  %v1901_v40 = vadd.f32 %v1900_v62, %v1803_v33  ;;  %v1866_v3 = vrot.slane %v1865_v41, 4 }
 0x1cf   :  { %v1875_v48 = vrot.slane %v1874_v23, 4  ;;  %v1884_v12 = vrot.slane %v1883_v53, 4  ;;  %v1893_v22 = vrot.slane %v1892_v1, 4  ;;  %v1840_v35 = vadd.f32 %v1839_v14, %v1838_v27  ;;  %v6815_v27 = vld [vmem:[#allocation84_spill] sm:$0xff]  ;;  %v6819_v14 = vld [vmem:[#allocation86_spill] sm:$0xff] }
 0x1d0   :  { %v1849_v49 = vadd.f32 %v1848_v19, %v1847_v30  ;;  %v1858_v18 = vadd.f32 %v1857_v54, %v1856_v34  ;;  %v1902_v29 = vrot.slane %v1901_v40, 4  ;;  %v1867_v2 = vadd.f32 %v1866_v3, %v1865_v41  ;;  %v6816_v34 = vld [vmem:[#allocation82_spill] sm:$0xff]  ;;  %v6817_v41 = vld [vmem:[#allocation81_spill] sm:$0xff] }
 0x1d1   :  { %v1876_v47 = vadd.f32 %v1875_v48, %v1874_v23  ;;  %v1885_v21 = vadd.f32 %v1884_v12, %v1883_v53  ;;  %v1894_v28 = vadd.f32 %v1893_v22, %v1892_v1  ;;  %v1841_v6 = vrot.slane %v1840_v35, 2  ;;  %v6818_v53 = vld [vmem:[#allocation85_spill] sm:$0xff] }
 0x1d2   :  { %v1850_v25 = vrot.slane %v1849_v49, 2  ;;  %v1859_v9 = vrot.slane %v1858_v18, 2  ;;  %v1903_v32 = vadd.f32 %v1902_v29, %v1901_v40  ;;  %v1868_v26 = vrot.slane %v1867_v2, 2 }
 0x1d3   :  { %v1877_v15 = vrot.slane %v1876_v47, 2  ;;  %v1886_v10 = vrot.slane %v1885_v21, 2  ;;  %v1895_v60 = vrot.slane %v1894_v28, 2  ;;  %v5265_v56 = vadd.f32 %v1841_v6, %v1840_v35 }
 0x1d4   :  { %v1851_v46 = vadd.f32 %v1850_v25, %v1849_v49  ;;  %v1860_v44 = vadd.f32 %v1859_v9, %v1858_v18  ;;  %v1904_v17 = vrot.slane %v1903_v32, 2  ;;  %v5267_v37 = vadd.f32 %v1868_v26, %v1867_v2  ;;  %v6821_v9 = vld [vmem:[#allocation22_spill] sm:$0xff] }
 0x1d5   :  { %v5269_v63 = vadd.f32 %v1877_v15, %v1876_v47  ;;  %v5271_v33 = vadd.f32 %v1886_v10, %v1885_v21  ;;  %v5273_v43 = vadd.f32 %v1895_v60, %v1894_v28  ;;  %v1829_v61 = vmul.f32 %v4847_v42, %v6813_v5  ;;  %v6826_v10 = vld [vmem:[#allocation18_spill] sm:$0xff] }
 0x1d6   :  { %v1830_v24 = vmul.f32 %v6703_v55, %v6814_v20  ;;  %v1852_v0 = vrot.slane %v1851_v46, 1  ;;  %v1861_v59 = vrot.slane %v1860_v44, 1  ;;  %v1831_v30 = vmul.f32 %v6704_v7, %v6815_v27 }
 0x1d7   :  { %v1832_v62 = vmul.f32 %v4845_v57, %v6816_v34  ;;  %v1833_v23 = vmul.f32 %v4847_v42, %v6817_v41  ;;  %v1834_v1 = vmul.f32 %v6703_v55, %v6818_v53  ;;  %v1835_v19 = vmul.f32 %v6704_v7, %v6819_v14  ;;  %v6877_v55 = vld [vmem:[#allocation30_spill] sm:$0xff]  ;;  %v6878_v57 = vld [vmem:[#allocation36_spill] sm:$0xff] }
 0x1d8   :  { %v1843_v54 = vrot.slane %v5265_v56, 1  ;;  %v1870_v40 = vrot.slane %v5267_v37, 1  ;;  %v5291_v3 = vadd.f32 %v1904_v17, %v1903_v32  ;;  %v5293_v48 = vadd.f32 %v1852_v0, %v1851_v46  ;;  %v6822_v32 = vld [vmem:[#allocation24_spill] sm:$0xff] }
 0x1d9   :  { %v1879_v12 = vrot.slane %v5269_v63, 1  ;;  %v1888_v22 = vrot.slane %v5271_v33, 1  ;;  %v1897_v35 = vrot.slane %v5273_v43, 1  ;;  %v5298_v49 = vadd.f32 %v1861_v59, %v1860_v44  ;;  %v6829_v44 = vld [vmem:[#allocation113_spill] sm:$0xff] }
 0x1da   :  { %v1908_v18 = vadd.f32 %v5141_v11, %v5137_v4  ;;  %v1917_v29 = vadd.f32 %v5157_v36, %v5153_v31  ;;  %v1926_v2 = vadd.f32 %v5176_v51, %v5169_v13  ;;  %v1935_v47 = vadd.f32 %v5192_v45, %v5188_v52  ;;  %v6820_v4 = vld [vmem:[#allocation17_spill] sm:$0xff]  ;;  %v6823_v13 = vld [vmem:[#allocation110_spill] sm:$0xff]  ;;  %v6824_v52 = vld [vmem:[#allocation115_spill] sm:$0xff] }
 0x1db   :  { %v1944_v21 = vadd.f32 %v5211_v58, %v5207_v39  ;;  %v1953_v28 = vadd.f32 %v5237_v38, %v5229_v8  ;;  %v1962_v6 = vadd.f32 %v1829_v61, %v5249_v50  ;;  %v1971_v36 = vadd.f32 %v1833_v23, %v1832_v62  ;;  %v6825_v39 = vld [vmem:[#allocation20_spill] sm:$0xff]  ;;  %v6827_v38 = vld [vmem:[#allocation23_spill] sm:$0xff] }
 0x1dc   :  { %v1909_v25 = vadd.f32 %v1908_v18, %v5145_v16  ;;  %v1918_v11 = vadd.f32 %v1917_v29, %v6820_v4  ;;  %v1927_v31 = vadd.f32 %v1926_v2, %v6821_v9  ;;  %v1936_v51 = vadd.f32 %v1935_v47, %v6822_v32  ;;  %v6828_v16 = vld [vmem:[#allocation29_spill] sm:$0xff]  ;;  %v6830_v61 = vld [vmem:[#allocation116_spill] sm:$0xff] }
 0x1dd   :  { %v1945_v26 = vadd.f32 %v1944_v21, %v6823_v13  ;;  %v1954_v45 = vadd.f32 %v1953_v28, %v6824_v52  ;;  %v1963_v15 = vadd.f32 %v1962_v6, %v1830_v24  ;;  %v1972_v60 = vadd.f32 %v1971_v36, %v1834_v1 }
 0x1de   :  { %v1910_v58 = vadd.f32 %v1909_v25, %v6825_v39  ;;  %v1919_v8 = vadd.f32 %v1918_v11, %v6826_v10  ;;  %v1928_v50 = vadd.f32 %v1927_v31, %v6827_v38  ;;  %v1937_v46 = vadd.f32 %v1936_v51, %v6828_v16 }
 0x1df   :  { %v1946_v17 = vadd.f32 %v1945_v26, %v6829_v44  ;;  %v1955_v0 = vadd.f32 %v1954_v45, %v6830_v61  ;;  %v1964_v59 = vadd.f32 %v1963_v15, %v1831_v30  ;;  %v1973_v29 = vadd.f32 %v1972_v60, %v1835_v19 }
 0x1e0   :  { %v1911_v62 = vrot.slane %v1910_v58, 4  ;;  %v1920_v23 = vrot.slane %v1919_v8, 4  ;;  %v1929_v18 = vrot.slane %v1928_v50, 4  ;;  %v1938_v2 = vrot.slane %v1937_v46, 4 }
 0x1e1   :  { %v1947_v24 = vrot.slane %v1946_v17, 4  ;;  %v1956_v47 = vrot.slane %v1955_v0, 4  ;;  %v1965_v21 = vrot.slane %v1964_v59, 4  ;;  %v1974_v4 = vrot.slane %v1973_v29, 4 }
 0x1e2   :  { %v1912_v28 = vadd.f32 %v1911_v62, %v1910_v58  ;;  %v1921_v6 = vadd.f32 %v1920_v23, %v1919_v8  ;;  %v1930_v25 = vadd.f32 %v1929_v18, %v1928_v50  ;;  %v1939_v1 = vadd.f32 %v1938_v2, %v1937_v46 }
 0x1e3   :  { %v1948_v11 = vadd.f32 %v1947_v24, %v1946_v17  ;;  %v1957_v9 = vadd.f32 %v1956_v47, %v1955_v0  ;;  %v1966_v31 = vadd.f32 %v1965_v21, %v1964_v59  ;;  %v1975_v30 = vadd.f32 %v1974_v4, %v1973_v29 }
 0x1e4   :  { %v1913_v36 = vrot.slane %v1912_v28, 2  ;;  %v1922_v32 = vrot.slane %v1921_v6, 2  ;;  %v1931_v51 = vrot.slane %v1930_v25, 2  ;;  %v1940_v13 = vrot.slane %v1939_v1, 2 }
 0x1e5   :  { %v1949_v26 = vrot.slane %v1948_v11, 2  ;;  %v1958_v52 = vrot.slane %v1957_v9, 2  ;;  %v1967_v19 = vrot.slane %v1966_v31, 2  ;;  %v1976_v10 = vrot.slane %v1975_v30, 2 }
 0x1e6   :  { %v1914_v45 = vadd.f32 %v1913_v36, %v1912_v28  ;;  %v1923_v15 = vadd.f32 %v1922_v32, %v1921_v6  ;;  %v1932_v39 = vadd.f32 %v1931_v51, %v1930_v25  ;;  %v1941_v58 = vadd.f32 %v1940_v13, %v1939_v1  ;;  %v6832_v36 = vld [vmem:[#allocation98_spill] sm:$0xff] }
 0x1e7   :  { %v1950_v8 = vadd.f32 %v1949_v26, %v1948_v11  ;;  %v1959_v38 = vadd.f32 %v1958_v52, %v1957_v9  ;;  %v1968_v50 = vadd.f32 %v1967_v19, %v1966_v31  ;;  %v1906_v60 = vrot.slane %v5291_v3, 1  ;;  %v6833_v52 = vld [vmem:[#allocation99_spill] sm:$0xff] }
 0x1e8   :  { %v1924_v16 = vrot.slane %v1923_v15, 1  ;;  %v1933_v46 = vrot.slane %v1932_v39, 1  ;;  %v1977_v44 = vadd.f32 %v1976_v10, %v1975_v30  ;;  %v1915_v17 = vrot.slane %v1914_v45, 1 }
 0x1e9   :  { %v1942_v61 = vrot.slane %v1941_v58, 1  ;;  %v1951_v0 = vrot.slane %v1950_v8, 1  ;;  %v1960_v59 = vrot.slane %v1959_v38, 1  ;;  %v1871_v62 = vadd.f32 %v1870_v40, %v5267_v37 }
 0x1ea   :  { %v1925_v23 = vadd.f32 %v1924_v16, %v1923_v15  ;;  %v1934_v18 = vadd.f32 %v1933_v46, %v1932_v39  ;;  %v1969_v29 = vrot.slane %v1968_v50, 1  ;;  %v1844_v2 = vadd.f32 %v1843_v54, %v5265_v56  ;;  %v6835_v39 = vld [vmem:[#allocation90_spill] sm:$0xff]  ;;  %v6838_v16 = vld [vmem:[#allocation101_spill] sm:$0xff] }
 0x1eb   :  { %v1880_v24 = vadd.f32 %v1879_v12, %v5269_v63  ;;  %v1889_v47 = vadd.f32 %v1888_v22, %v5271_v33  ;;  %v1978_v21 = vrot.slane %v1977_v44, 1  ;;  %v1898_v37 = vadd.f32 %v1897_v35, %v5273_v43 }
 0x1ec   :  { %v1943_v40 = vadd.f32 %v1942_v61, %v1941_v58  ;;  %v1981_v28 = vmax.f32 %v5293_v48, 0.0  ;;  %v1982_v6 = vmax.f32 %v5298_v49, 0.0  ;;  %v1907_v56 = vadd.f32 %v1906_v60, %v5291_v3  ;;  %v6831_v49 = vld [vmem:[#allocation97_spill] sm:$0xff]  ;;  %v6840_v61 = vld [vmem:[#allocation91_spill] sm:$0xff] }
 0x1ed   :  { %v1916_v54 = vadd.f32 %v1915_v17, %v1914_v45  ;;  %v1952_v63 = vadd.f32 %v1951_v0, %v1950_v8  ;;  %v1961_v12 = vadd.f32 %v1960_v59, %v1959_v38  ;;  %v1970_v25 = vadd.f32 %v1969_v29, %v1968_v50  ;;  %v6834_v45 = vld [vmem:[#allocation89_spill] sm:$0xff]  ;;  %v6836_v8 = vld [vmem:[#allocation94_spill] sm:$0xff]  ;;  %v6837_v50 = vld [vmem:[#allocation100_spill] sm:$0xff] }
 0x1ee   :  { %v1983_v33 = vmax.f32 %v1871_v62, 0.0  ;;  %v1989_v22 = vmax.f32 %v1925_v23, 0.0  ;;  %v1990_v4 = vmax.f32 %v1934_v18, 0.0  ;;  %v1979_v1 = vadd.f32 %v1978_v21, %v1977_v44  ;;  %v6839_v44 = vld [vmem:[#allocation102_spill] sm:$0xff]  ;;  %v6841_v23 = vld [vmem:[#allocation103_spill] sm:$0xff]  ;;  %v6842_v29 = vld [vmem:[#allocation88_spill] sm:$0xff] }
 0x1ef   :  { %v1980_v11 = vmax.f32 %v1844_v2, 0.0  ;;  %v1984_v43 = vmax.f32 %v1880_v24, 0.0  ;;  %v1985_v35 = vmax.f32 %v1889_v47, 0.0  ;;  %v1986_v48 = vmax.f32 %v1898_v37, 0.0  ;;  %v6843_v24 = vld [vmem:[#allocation92_spill] sm:$0xff]  ;;  %v6844_v21 = vld [vmem:[#allocation93_spill] sm:$0xff] }
 0x1f0   :  { %v1991_v9 = vmax.f32 %v1943_v40, 0.0  ;;  %v2027_v31 = vmul.f32 %v6831_v49, %v1981_v28  ;;  %v2028_v3 = vmul.f32 %v6832_v36, %v1982_v6  ;;  %v1987_v32 = vmax.f32 %v1907_v56, 0.0  ;;  %v6920_v36 = vld [vmem:[#allocation25_spill] sm:$0xff]  ;;  %v6922_v49 = vld [vmem:[#allocation80_spill] sm:$0xff] }
 0x1f1   :  { %v1988_v51 = vmax.f32 %v1916_v54, 0.0  ;;  %v1992_v30 = vmax.f32 %v1952_v63, 0.0  ;;  %v1993_v13 = vmax.f32 %v1961_v12, 0.0  ;;  %v1994_v26 = vmax.f32 %v1970_v25, 0.0  ;;  %v6845_v54 = vld [vmem:[#allocation95_spill] sm:$0xff]  ;;  %v6846_v12 = vld [vmem:[#allocation96_spill] sm:$0xff] }
 0x1f2   :  { %v2029_v19 = vmul.f32 %v6833_v52, %v1983_v33  ;;  %v2035_v15 = vmul.f32 %v6834_v45, %v1989_v22  ;;  %v2036_v10 = vmul.f32 %v6835_v39, %v1990_v4  ;;  %v1995_v58 = vmax.f32 %v1979_v1, 0.0  ;;  %v6912_v39 = vld [vmem:[#allocation72_spill] sm:$0xff]  ;;  %v6914_v45 = vld [vmem:[#allocation27_spill] sm:$0xff]  ;;  %v6916_v52 = vld [vmem:[#allocation70_spill] sm:$0xff] }
 0x1f3   :  { %v2026_v38 = vmul.f32 %v1980_v11, %v6836_v8  ;;  %v2030_v60 = vmul.f32 %v6837_v50, %v1984_v43  ;;  %v2031_v46 = vmul.f32 %v6838_v16, %v1985_v35  ;;  %v2032_v17 = vmul.f32 %v6839_v44, %v1986_v48  ;;  %v6906_v44 = vld [vmem:[#allocation76_spill] sm:$0xff]  ;;  %v6908_v16 = vld [vmem:[#allocation67_spill] sm:$0xff] }
 0x1f4   :  { %v2037_v0 = vmul.f32 %v6840_v61, %v1991_v9  ;;  %v2058_v59 = vrot.slane %v2027_v31, 7  ;;  %v2061_v62 = vrot.slane %v2028_v3, 6  ;;  %v2033_v18 = vmul.f32 %v6841_v23, %v1987_v32  ;;  %v6904_v61 = vld [vmem:[#allocation71_spill] sm:$0xff]  ;;  %v6918_v8 = vld [vmem:[#allocation32_spill] sm:$0xff] }
 0x1f5   :  { %v2034_v2 = vmul.f32 %v1988_v51, %v6842_v29  ;;  %v2038_v47 = vmul.f32 %v6843_v24, %v1992_v30  ;;  %v2039_v37 = vmul.f32 %v6844_v21, %v1993_v13  ;;  %v2064_v28 = vrot.slane %v2029_v19, 5  ;;  %v6847_v13 = vld [vmem:[#allocation15_spill] sm:$0xff]  ;;  %v6896_v21 = vld [vmem:[#allocation69_spill] sm:$0xff] }
 0x1f6   :  { %v2060_v40 = vsel %vm2059_vm1, %v2058_v59, %v2026_v38  ;;  %v2079_v6 = vrot.slane %v2035_v15, 7  ;;  %v2081_v56 = vrot.slane %v2036_v10, 6  ;;  %v2040_v63 = vmul.f32 %v6845_v54, %v1994_v26  ;;  %v6848_v26 = vld [vmem:[#allocation109_spill] sm:$0xff]  ;;  %v6850_v38 = vld [vmem:[#allocation16_spill] sm:$0xff]  ;;  %v6895_v54 = vld [vmem:[#allocation87_spill] sm:$0xff] }
 0x1f7   :  { %v2041_v25 = vmul.f32 %v6846_v12, %v1995_v58  ;;  %v2063_v33 = vsel %vm2062_vm2, %v2061_v62, %v2060_v40  ;;  %v2067_v22 = vrot.slane %v2030_v60, 4  ;;  %v2070_v1 = vrot.slane %v2031_v46, 3  ;;  %v6851_v60 = vld [vmem:[#allocation111_spill] sm:$0xff]  ;;  %v6894_v12 = vld [vmem:[#allocation62_spill] sm:$0xff]  ;;  %v6900_v24 = vld [vmem:[#allocation61_spill] sm:$0xff] }
 0x1f8   :  { %v2066_v4 = vsel %vm2065_vm3, %v2064_v28, %v2063_v33  ;;  %v2080_v11 = vsel %vm2059_vm1, %v2079_v6, %v2034_v2  ;;  %v2083_v43 = vrot.slane %v2037_v0, 5  ;;  %v2073_v48 = vrot.slane %v2032_v17, 2  ;;  %v6853_v62 = vld [vmem:[#allocation19_spill] sm:$0xff]  ;;  %v6859_v6 = vld [vmem:[#allocation6_spill] sm:$0xff] }
 0x1f9   :  { %v2069_v35 = vsel %vm2068_vm4, %v2067_v22, %v2066_v4  ;;  %v2082_v9 = vsel %vm2062_vm2, %v2081_v56, %v2080_v11  ;;  %v2085_v31 = vrot.slane %v2038_v47, 4  ;;  %v2076_v32 = vrot.slane %v2033_v18, 1  ;;  %v6854_v18 = vld [vmem:[#allocation112_spill] sm:$0xff]  ;;  %v6856_v47 = vld [vmem:[#allocation114_spill] sm:$0xff]  ;;  %v6860_v56 = vld [vmem:[#allocation37_spill] sm:$0xff] }
 0x1fa   :  { %v2072_v3 = vsel %vm2071_vm5, %v2070_v1, %v2069_v35  ;;  %v2084_v51 = vsel %vm2065_vm3, %v2083_v43, %v2082_v9  ;;  %v2087_v30 = vrot.slane %v2039_v37, 3  ;;  %v5370_v19 = vadd.f32 %v6848_v26, %v6847_v13  ;;  %v6857_v37 = vld [vmem:[#allocation105_spill] sm:$0xff]  ;;  %v6862_v4 = vld [vmem:[#allocation38_spill] sm:$0xff]  ;;  %v6863_v11 = vld [vmem:[#allocation8_spill] sm:$0xff] }
 0x1fb   :  { %v2075_v15 = vsel %vm2074_vm6, %v2073_v48, %v2072_v3  ;;  %v2086_v10 = vsel %vm2068_vm4, %v2085_v31, %v2084_v51  ;;  %v2089_v58 = vrot.slane %v2040_v63, 2  ;;  %v5376_v46 = vadd.f32 %v6851_v60, %v6850_v38  ;;  %v6861_v22 = vld [vmem:[#allocation5_spill] sm:$0xff]  ;;  %v6865_v35 = vld [vmem:[#allocation7_spill] sm:$0xff]  ;;  %v6866_v48 = vld [vmem:[#allocation50_spill] sm:$0xff] }
 0x1fc   :  { %6849 = vst [vmem:[#allocation104_spill] sm:$0xff] %v5370_v19  ;;  %v2078_v17 = vsel %vm2077_vm7, %v2076_v32, %v2075_v15  ;;  %v2088_v0 = vsel %vm2071_vm5, %v2087_v30, %v2086_v10  ;;  %v2091_v59 = vrot.slane %v2041_v25, 1  ;;  %v5382_v2 = vadd.f32 %v6854_v18, %v6853_v62  ;;  %v6864_v25 = vld [vmem:[#allocation49_spill] sm:$0xff]  ;;  %v6868_v3 = vld [vmem:[#allocation10_spill] sm:$0xff]  ;;  %v6870_v13 = vld [vmem:[#allocation12_spill] sm:$0xff] }
 0x1fd   :  { %6852 = vst [vmem:[#allocation84_spill] sm:$0xff] %v5376_v46  ;;  %v5386_v40 = vmul.f32 %v6857_v37, %v6856_v47  ;;  %v2090_v28 = vsel %vm2074_vm6, %v2089_v58, %v2088_v0  ;;  %v2174_v63 = vmul.f32 %v6860_v56, %v6859_v6  ;;  %v2175_v1 = vmul.f32 %v6862_v4, %v6861_v22  ;;  %v6869_v51 = vld [vmem:[#allocation9_spill] sm:$0xff]  ;;  %v6871_v10 = vld [vmem:[#allocation11_spill] sm:$0xff]  ;;  %v6872_v38 = vld [vmem:[#allocation14_spill] sm:$0xff] }
 0x1fe   :  { %6855 = vst [vmem:[#allocation82_spill] sm:$0xff] %v5382_v2  ;;  %v2092_v33 = vsel %vm2077_vm7, %v2091_v59, %v2090_v28  ;;  %v5396_v43 = vmul.f32 %v6864_v25, %v6863_v11  ;;  %v5400_v9 = vmul.f32 %v6866_v48, %v6865_v35  ;;  %v2178_v32 = vmul.f32 %v6860_v56, %v6868_v3  ;;  %v6873_v59 = vld [vmem:[#allocation13_spill] sm:$0xff]  ;;  %v6874_v62 = vld [vmem:[#allocation28_spill] sm:$0xff]  ;;  %v6875_v37 = vld [vmem:[#allocation26_spill] sm:$0xff] }
 0x1ff   :  { %6858 = vst [vmem:[#allocation81_spill] sm:$0xff] %v5386_v40  ;;  %v5402_v31 = vadd.f32 %v2092_v33, %v2078_v17  ;;  %v2179_v30 = vmul.f32 %v6862_v4, %v6869_v51  ;;  %v2180_v15 = vmul.f32 %v6864_v25, %v6870_v13  ;;  %v5412_v58 = vmul.f32 %v6866_v48, %v6871_v10  ;;  %v6876_v33 = vld [vmem:[#allocation31_spill] sm:$0xff]  ;;  %v6881_v10 = vld [vmem:[#allocation40_spill] sm:$0xff]  ;;  %v6886_v60 = vld [vmem:[#allocation54_spill] sm:$0xff] }
 0x200   :  { %v2182_v0 = vmul.f32 %v6860_v56, %v6872_v38  ;;  %v2183_v17 = vmul.f32 %v6862_v4, %v6873_v59  ;;  %v2184_v47 = vmul.f32 %v6864_v25, %v6874_v62  ;;  %v5422_v28 = vmul.f32 %v6866_v48, %v6875_v37  ;;  %v6879_v2 = vld [vmem:[#allocation35_spill] sm:$0xff]  ;;  %v6880_v59 = vld [vmem:[#allocation42_spill] sm:$0xff]  ;;  %v6882_v13 = vld [vmem:[#allocation44_spill] sm:$0xff] }
 0x201   :  { %6867 = vst [vmem:[#allocation85_spill] sm:$0xff] %v5402_v31  ;;  %v2186_v7 = vmul.f32 %v6860_v56, %v6876_v33  ;;  %v2187_v42 = vmul.f32 %v6862_v4, %v6877_v55  ;;  %v2188_v40 = vmul.f32 %v6864_v25, %v6878_v57  ;;  %v5432_v38 = vmul.f32 %v6866_v48, %v6879_v2  ;;  %v6883_v3 = vld [vmem:[#allocation43_spill] sm:$0xff]  ;;  %v6884_v18 = vld [vmem:[#allocation48_spill] sm:$0xff]  ;;  %v6890_v6 = vld [vmem:[#allocation58_spill] sm:$0xff] }
 0x202   :  { %v2190_v62 = vmul.f32 %v6860_v56, %v6880_v59  ;;  %v2191_v37 = vmul.f32 %v6862_v4, %v6881_v10  ;;  %v2192_v51 = vmul.f32 %v6864_v25, %v6882_v13  ;;  %v2193_v55 = vmul.f32 %v6866_v48, %v6883_v3  ;;  %v6885_v35 = vld [vmem:[#allocation47_spill] sm:$0xff]  ;;  %v6888_v26 = vld [vmem:[#allocation56_spill] sm:$0xff]  ;;  %v6891_v31 = vld [vmem:[#allocation57_spill] sm:$0xff] }
 0x203   :  { %v2194_v57 = vmul.f32 %v6860_v56, %v6884_v18  ;;  %v2195_v2 = vmul.f32 %v6862_v4, %v6885_v35  ;;  %v2196_v59 = vmul.f32 %v6864_v25, %v6886_v60  ;;  %v6887_v11 = vld [vmem:[#allocation51_spill] sm:$0xff]  ;;  %v2198_v13 = vmul.f32 %v6860_v56, %v6888_v26  ;;  %v6893_v19 = vld [vmem:[#allocation64_spill] sm:$0xff] }
 0x204   :  { %v2197_v10 = vmul.f32 %v6866_v48, %v6887_v11  ;;  %v6889_v22 = vld [vmem:[#allocation55_spill] sm:$0xff]  ;;  %v2200_v3 = vmul.f32 %v6864_v25, %v6890_v6  ;;  %v2201_v18 = vmul.f32 %v6866_v48, %v6891_v31  ;;  %v2203_v60 = vmul.f32 %v6862_v4, %v6893_v19  ;;  %v6897_v6 = vld [vmem:[#allocation68_spill] sm:$0xff]  ;;  %v6898_v31 = vld [vmem:[#allocation34_spill] sm:$0xff] }
 0x205   :  { %v2199_v33 = vmul.f32 %v6862_v4, %v6889_v22  ;;  %v6892_v46 = vld [vmem:[#allocation75_spill] sm:$0xff]  ;;  %v2204_v11 = vmul.f32 %v6864_v25, %v6894_v12  ;;  %v2205_v26 = vmul.f32 %v6866_v48, %v6895_v54  ;;  %v5469_v22 = vmul.f32 %v6860_v56, %v6896_v21  ;;  %v6902_v12 = vld [vmem:[#allocation60_spill] sm:$0xff] }
 0x206   :  { %v2202_v35 = vmul.f32 %v6860_v56, %v6892_v46  ;;  %v5473_v29 = vmul.f32 %v6862_v4, %v6897_v6  ;;  %v5477_v46 = vmul.f32 %v6864_v25, %v6898_v31  ;;  %v5481_v19 = vmul.f32 %v6866_v48, %v6900_v24  ;;  %v6903_v54 = vld [vmem:[#allocation59_spill] sm:$0xff] }
 0x207   :  { %v5485_v23 = vmul.f32 %v6860_v56, %v6902_v12  ;;  %v5489_v21 = vmul.f32 %v6862_v4, %v6903_v54  ;;  %v5493_v6 = vmul.f32 %v6864_v25, %v6904_v61  ;;  %v5497_v31 = vmul.f32 %v6866_v48, %v6906_v44  ;;  %v6910_v50 = vld [vmem:[#allocation63_spill] sm:$0xff] }
 0x208   :  { %6899 = vst [vmem:[#allocation86_spill] sm:$0xff] %v5477_v46  ;;  %6901 = vst [vmem:[#allocation17_spill] sm:$0xff] %v5481_v19  ;;  %v5501_v24 = vmul.f32 %v6860_v56, %v6908_v16  ;;  %v5505_v12 = vmul.f32 %v6862_v4, %v6910_v50  ;;  %v5509_v54 = vmul.f32 %v6864_v25, %v6912_v39  ;;  %v6928_v19 = vld [vmem:[#allocation79_spill] sm:$0xff]  ;;  %v6938_v46 = vld [vmem:[#allocation66_spill] sm:$0xff] }
 0x209   :  { %6905 = vst [vmem:[#allocation22_spill] sm:$0xff] %v5493_v6  ;;  %6907 = vst [vmem:[#allocation24_spill] sm:$0xff] %v5497_v31  ;;  %v5513_v61 = vmul.f32 %v6866_v48, %v6914_v45  ;;  %v5517_v44 = vmul.f32 %v6860_v56, %v6916_v52  ;;  %v5521_v16 = vmul.f32 %v6862_v4, %v6918_v8  ;;  %v6924_v31 = vld [vmem:[#allocation73_spill] sm:$0xff]  ;;  %v6936_v6 = vld [vmem:[#allocation74_spill] sm:$0xff] }
 0x20a   :  { %6909 = vst [vmem:[#allocation110_spill] sm:$0xff] %v5501_v24  ;;  %6911 = vst [vmem:[#allocation115_spill] sm:$0xff] %v5505_v12  ;;  %v5525_v50 = vmul.f32 %v6864_v25, %v6920_v36  ;;  %v5529_v39 = vmul.f32 %v6866_v48, %v6922_v49  ;;  %v5533_v45 = vmul.f32 %v6860_v56, %v6924_v31 }
 0x20b   :  { %6913 = vst [vmem:[#allocation20_spill] sm:$0xff] %v5509_v54  ;;  %6915 = vst [vmem:[#allocation18_spill] sm:$0xff] %v5513_v61  ;;  %v6926_v61 = vld [vmem:[#allocation45_spill] sm:$0xff]  ;;  %v5541_v8 = vmul.f32 %v6864_v25, %v6928_v19  ;;  %v5561_v19 = vmul.f32 %v6866_v48, %v6938_v46 }
 0x20c   :  { %6917 = vst [vmem:[#allocation23_spill] sm:$0xff] %v5517_v44  ;;  %6919 = vst [vmem:[#allocation29_spill] sm:$0xff] %v5521_v16  ;;  %v5537_v52 = vmul.f32 %v6862_v4, %v6926_v61  ;;  %v6930_v54 = vld [vmem:[#allocation65_spill] sm:$0xff]  ;;  %v5557_v61 = vmul.f32 %v6864_v25, %v6936_v6  ;;  %v2292_v6 = vadd.f32 %v2199_v33, %v2198_v13 }
 0x20d   :  { %6921 = vst [vmem:[#allocation113_spill] sm:$0xff] %v5525_v50  ;;  %6923 = vst [vmem:[#allocation116_spill] sm:$0xff] %v5529_v39  ;;  %v5545_v36 = vmul.f32 %v6866_v48, %v6930_v54  ;;  %v6932_v50 = vld [vmem:[#allocation46_spill] sm:$0xff]  ;;  %v6934_v39 = vld [vmem:[#allocation77_spill] sm:$0xff] }
 0x20e   :  { %6925 = vst [vmem:[#allocation15_spill] sm:$0xff] %v5533_v45  ;;  %6927 = vst [vmem:[#allocation16_spill] sm:$0xff] %v5537_v52  ;;  %v5549_v49 = vmul.f32 %v6860_v56, %v6932_v50  ;;  %v5553_v31 = vmul.f32 %v6862_v4, %v6934_v39  ;;  %v5569_v50 = vmul.f32 %v6862_v4, %v6813_v5 }
 0x20f   :  { %6929 = vst [vmem:[#allocation19_spill] sm:$0xff] %v5541_v8  ;;  %6931 = vst [vmem:[#allocation114_spill] sm:$0xff] %v5545_v36  ;;  %v6940_v8 = vld [vmem:[#allocation78_spill] sm:$0xff]  ;;  %v2238_v36 = vadd.f32 %v2175_v1, %v2174_v63  ;;  %v2256_v39 = vadd.f32 %v2183_v17, %v2182_v0  ;;  %v2274_v52 = vadd.f32 %v2191_v37, %v2190_v62 }
 0x210   :  { %6933 = vst [vmem:[#allocation105_spill] sm:$0xff] %v5549_v49  ;;  %6935 = vst [vmem:[#allocation117_spill] sm:$0xff] %v5553_v31  ;;  %v5565_v54 = vmul.f32 %v6860_v56, %v6940_v8  ;;  %v2247_v49 = vadd.f32 %v2179_v30, %v2178_v32  ;;  %v2265_v31 = vadd.f32 %v2187_v42, %v2186_v7 }
 0x211   :  { %6937 = vst [vmem:[#allocation118_spill] sm:$0xff] %v5557_v61  ;;  %6939 = vst [vmem:[#allocation119_spill] sm:$0xff] %v5561_v19  ;;  %v2283_v45 = vadd.f32 %v2195_v2, %v2194_v57  ;;  %v2301_v61 = vadd.f32 %v2203_v60, %v2202_v35  ;;  %v2239_v16 = vadd.f32 %v2238_v36, %v5396_v43 }
 0x212   :  { %6941 = vst [vmem:[#allocation120_spill] sm:$0xff] %v5565_v54  ;;  %v2248_v46 = vadd.f32 %v2247_v49, %v2180_v15  ;;  %v2257_v19 = vadd.f32 %v2256_v39, %v2184_v47  ;;  %v2266_v44 = vadd.f32 %v2265_v31, %v2188_v40  ;;  %v2275_v12 = vadd.f32 %v2274_v52, %v2192_v51 }
 0x213   :  { %v2284_v8 = vadd.f32 %v2283_v45, %v2196_v59  ;;  %v2293_v54 = vadd.f32 %v2292_v6, %v2200_v3  ;;  %v2302_v24 = vadd.f32 %v2301_v61, %v2204_v11  ;;  %v2240_v5 = vadd.f32 %v2239_v16, %v5400_v9 }
 0x214   :  { %v2249_v63 = vadd.f32 %v2248_v46, %v5412_v58  ;;  %v2258_v1 = vadd.f32 %v2257_v19, %v5422_v28  ;;  %v2267_v42 = vadd.f32 %v2266_v44, %v5432_v38  ;;  %v2276_v57 = vadd.f32 %v2275_v12, %v2193_v55 }
 0x215   :  { %v2285_v7 = vadd.f32 %v2284_v8, %v2197_v10  ;;  %v2294_v60 = vadd.f32 %v2293_v54, %v2201_v18  ;;  %v2303_v2 = vadd.f32 %v2302_v24, %v2205_v26  ;;  %v2241_v36 = vrot.slane %v2240_v5, 4 }
 0x216   :  { %v2250_v49 = vrot.slane %v2249_v63, 4  ;;  %v2259_v39 = vrot.slane %v2258_v1, 4  ;;  %v2268_v40 = vrot.slane %v2267_v42, 4  ;;  %v2277_v52 = vrot.slane %v2276_v57, 4 }
 0x217   :  { %v2286_v45 = vrot.slane %v2285_v7, 4  ;;  %v2295_v6 = vrot.slane %v2294_v60, 4  ;;  %v2304_v61 = vrot.slane %v2303_v2, 4  ;;  %v2242_v11 = vadd.f32 %v2241_v36, %v2240_v5 }
 0x218   :  { %v2251_v16 = vadd.f32 %v2250_v49, %v2249_v63  ;;  %v2260_v43 = vadd.f32 %v2259_v39, %v2258_v1  ;;  %v2269_v46 = vadd.f32 %v2268_v40, %v2267_v42  ;;  %v2278_v35 = vadd.f32 %v2277_v52, %v2276_v57  ;;  %v6942_v49 = vld [vmem:[#allocation110_spill] sm:$0xff]  ;;  %v6943_v39 = vld [vmem:[#allocation115_spill] sm:$0xff] }
 0x219   :  { %v2287_v19 = vadd.f32 %v2286_v45, %v2285_v7  ;;  %v2296_v9 = vadd.f32 %v2295_v6, %v2294_v60  ;;  %v2305_v44 = vadd.f32 %v2304_v61, %v2303_v2  ;;  %v2243_v55 = vrot.slane %v2242_v11, 2  ;;  %v6944_v52 = vld [vmem:[#allocation23_spill] sm:$0xff]  ;;  %v6945_v45 = vld [vmem:[#allocation29_spill] sm:$0xff] }
 0x21a   :  { %v2252_v8 = vrot.slane %v2251_v16, 2  ;;  %v2261_v54 = vrot.slane %v2260_v43, 2  ;;  %v2270_v24 = vrot.slane %v2269_v46, 2  ;;  %v2279_v12 = vrot.slane %v2278_v35, 2  ;;  %v6946_v61 = vld [vmem:[#allocation15_spill] sm:$0xff] }
 0x21b   :  { %v2288_v26 = vrot.slane %v2287_v19, 2  ;;  %v2297_v18 = vrot.slane %v2296_v9, 2  ;;  %v2306_v31 = vrot.slane %v2305_v44, 2  ;;  %v5576_v3 = vadd.f32 %v2243_v55, %v2242_v11  ;;  %v6947_v11 = vld [vmem:[#allocation16_spill] sm:$0xff]  ;;  %v6952_v55 = vld [vmem:[#allocation22_spill] sm:$0xff] }
 0x21c   :  { %v2253_v32 = vadd.f32 %v2252_v8, %v2251_v16  ;;  %v2262_v51 = vadd.f32 %v2261_v54, %v2260_v43  ;;  %v5578_v5 = vadd.f32 %v2270_v24, %v2269_v46  ;;  %v5580_v30 = vadd.f32 %v2279_v12, %v2278_v35  ;;  %v6948_v43 = vld [vmem:[#allocation105_spill] sm:$0xff]  ;;  %v6955_v12 = vld [vmem:[#allocation19_spill] sm:$0xff] }
 0x21d   :  { %v5582_v13 = vadd.f32 %v2288_v26, %v2287_v19  ;;  %v5584_v15 = vadd.f32 %v2297_v18, %v2296_v9  ;;  %v5586_v10 = vadd.f32 %v2306_v31, %v2305_v44  ;;  %v2232_v58 = vmul.f32 %v6864_v25, %v6814_v20  ;;  %v6949_v46 = vld [vmem:[#allocation117_spill] sm:$0xff]  ;;  %v6950_v19 = vld [vmem:[#allocation120_spill] sm:$0xff]  ;;  %v6956_v18 = vld [vmem:[#allocation118_spill] sm:$0xff] }
 0x21e   :  { %v2233_v38 = vmul.f32 %v6866_v48, %v6815_v27  ;;  %v2254_v0 = vrot.slane %v2253_v32, 1  ;;  %v2263_v59 = vrot.slane %v2262_v51, 1  ;;  %v2234_v17 = vmul.f32 %v6860_v56, %v6816_v34  ;;  %v6954_v54 = vld [vmem:[#allocation113_spill] sm:$0xff]  ;;  %v7008_v56 = vld [vmem:[#allocation42_spill] sm:$0xff] }
 0x21f   :  { %v2235_v62 = vmul.f32 %v6862_v4, %v6817_v41  ;;  %v2236_v47 = vmul.f32 %v6864_v25, %v6818_v53  ;;  %v2237_v37 = vmul.f32 %v6866_v48, %v6819_v14  ;;  %v2245_v28 = vrot.slane %v5576_v3, 1  ;;  %v7007_v25 = vld [vmem:[#allocation35_spill] sm:$0xff] }
 0x220   :  { %v2272_v33 = vrot.slane %v5578_v5, 1  ;;  %v2281_v63 = vrot.slane %v5580_v30, 1  ;;  %v2290_v1 = vrot.slane %v5582_v13, 1  ;;  %v5604_v42 = vadd.f32 %v2254_v0, %v2253_v32  ;;  %v6957_v0 = vld [vmem:[#allocation17_spill] sm:$0xff] }
 0x221   :  { %v5606_v57 = vadd.f32 %v2263_v59, %v2262_v51  ;;  %v2299_v7 = vrot.slane %v5584_v15, 1  ;;  %v2308_v60 = vrot.slane %v5586_v10, 1  ;;  %v2310_v2 = vadd.f32 %v5473_v29, %v5469_v22  ;;  %v6951_v29 = vld [vmem:[#allocation86_spill] sm:$0xff] }
 0x222   :  { %v2319_v36 = vadd.f32 %v5489_v21, %v5485_v23  ;;  %v2328_v40 = vadd.f32 %v6943_v39, %v6942_v49  ;;  %v2337_v6 = vadd.f32 %v6945_v45, %v6944_v52  ;;  %v2346_v16 = vadd.f32 %v6947_v11, %v6946_v61  ;;  %v6953_v21 = vld [vmem:[#allocation20_spill] sm:$0xff]  ;;  %v6961_v52 = vld [vmem:[#allocation114_spill] sm:$0xff]  ;;  %v6962_v45 = vld [vmem:[#allocation119_spill] sm:$0xff] }
 0x223   :  { %v2355_v35 = vadd.f32 %v6949_v46, %v6948_v43  ;;  %v2364_v9 = vadd.f32 %v5569_v50, %v6950_v19  ;;  %v2373_v44 = vadd.f32 %v2235_v62, %v2234_v17  ;;  %v2311_v22 = vadd.f32 %v2310_v2, %v6951_v29  ;;  %v6958_v49 = vld [vmem:[#allocation24_spill] sm:$0xff]  ;;  %v6959_v50 = vld [vmem:[#allocation18_spill] sm:$0xff] }
 0x224   :  { %v2320_v23 = vadd.f32 %v2319_v36, %v6952_v55  ;;  %v2329_v8 = vadd.f32 %v2328_v40, %v6953_v21  ;;  %v2338_v24 = vadd.f32 %v2337_v6, %v6954_v54  ;;  %v2347_v26 = vadd.f32 %v2346_v16, %v6955_v12  ;;  %v6960_v62 = vld [vmem:[#allocation116_spill] sm:$0xff] }
 0x225   :  { %v2356_v31 = vadd.f32 %v2355_v35, %v6956_v18  ;;  %v2365_v32 = vadd.f32 %v2364_v9, %v2232_v58  ;;  %v2374_v51 = vadd.f32 %v2373_v44, %v2236_v47  ;;  %v2312_v59 = vadd.f32 %v2311_v22, %v6957_v0 }
 0x226   :  { %v2321_v39 = vadd.f32 %v2320_v23, %v6958_v49  ;;  %v2330_v17 = vadd.f32 %v2329_v8, %v6959_v50  ;;  %v2339_v2 = vadd.f32 %v2338_v24, %v6960_v62  ;;  %v2348_v36 = vadd.f32 %v2347_v26, %v6961_v52 }
 0x227   :  { %v2357_v40 = vadd.f32 %v2356_v31, %v6962_v45  ;;  %v2366_v61 = vadd.f32 %v2365_v32, %v2233_v38  ;;  %v2375_v6 = vadd.f32 %v2374_v51, %v2237_v37  ;;  %v2313_v11 = vrot.slane %v2312_v59, 4 }
 0x228   :  { %v2322_v16 = vrot.slane %v2321_v39, 4  ;;  %v2331_v43 = vrot.slane %v2330_v17, 4  ;;  %v2340_v46 = vrot.slane %v2339_v2, 4  ;;  %v2349_v58 = vrot.slane %v2348_v36, 4 }
 0x229   :  { %v2358_v47 = vrot.slane %v2357_v40, 4  ;;  %v2367_v35 = vrot.slane %v2366_v61, 4  ;;  %v2376_v19 = vrot.slane %v2375_v6, 4  ;;  %v2314_v9 = vadd.f32 %v2313_v11, %v2312_v59 }
 0x22a   :  { %v2323_v44 = vadd.f32 %v2322_v16, %v2321_v39  ;;  %v2332_v29 = vadd.f32 %v2331_v43, %v2330_v17  ;;  %v2341_v22 = vadd.f32 %v2340_v46, %v2339_v2  ;;  %v2350_v55 = vadd.f32 %v2349_v58, %v2348_v36 }
 0x22b   :  { %v2359_v23 = vadd.f32 %v2358_v47, %v2357_v40  ;;  %v2368_v21 = vadd.f32 %v2367_v35, %v2366_v61  ;;  %v2377_v8 = vadd.f32 %v2376_v19, %v2375_v6  ;;  %v2315_v54 = vrot.slane %v2314_v9, 2 }
 0x22c   :  { %v2324_v24 = vrot.slane %v2323_v44, 2  ;;  %v2333_v38 = vrot.slane %v2332_v29, 2  ;;  %v2342_v37 = vrot.slane %v2341_v22, 2  ;;  %v2351_v12 = vrot.slane %v2350_v55, 2 }
 0x22d   :  { %v2360_v26 = vrot.slane %v2359_v23, 2  ;;  %v2369_v18 = vrot.slane %v2368_v21, 2  ;;  %v2378_v31 = vrot.slane %v2377_v8, 2  ;;  %v2316_v32 = vadd.f32 %v2315_v54, %v2314_v9  ;;  %v6964_v54 = vld [vmem:[#allocation98_spill] sm:$0xff] }
 0x22e   :  { %v2325_v51 = vadd.f32 %v2324_v24, %v2323_v44  ;;  %v2334_v0 = vadd.f32 %v2333_v38, %v2332_v29  ;;  %v2343_v49 = vadd.f32 %v2342_v37, %v2341_v22  ;;  %v2352_v59 = vadd.f32 %v2351_v12, %v2350_v55  ;;  %v6965_v12 = vld [vmem:[#allocation94_spill] sm:$0xff] }
 0x22f   :  { %v2361_v39 = vadd.f32 %v2360_v26, %v2359_v23  ;;  %v2370_v50 = vadd.f32 %v2369_v18, %v2368_v21  ;;  %v2379_v17 = vadd.f32 %v2378_v31, %v2377_v8  ;;  %v2317_v62 = vrot.slane %v2316_v32, 1  ;;  %v6966_v18 = vld [vmem:[#allocation99_spill] sm:$0xff] }
 0x230   :  { %v2326_v2 = vrot.slane %v2325_v51, 1  ;;  %v2335_v52 = vrot.slane %v2334_v0, 1  ;;  %v2344_v36 = vrot.slane %v2343_v49, 1  ;;  %v2353_v45 = vrot.slane %v2352_v59, 1 }
 0x231   :  { %v2362_v40 = vrot.slane %v2361_v39, 1  ;;  %v2371_v61 = vrot.slane %v2370_v50, 1  ;;  %v2380_v6 = vrot.slane %v2379_v17, 1  ;;  %v2246_v11 = vadd.f32 %v2245_v28, %v5576_v3 }
 0x232   :  { %v2273_v16 = vadd.f32 %v2272_v33, %v5578_v5  ;;  %v2327_v43 = vadd.f32 %v2326_v2, %v2325_v51  ;;  %v2336_v46 = vadd.f32 %v2335_v52, %v2334_v0  ;;  %v2282_v58 = vadd.f32 %v2281_v63, %v5580_v30  ;;  %v6968_v0 = vld [vmem:[#allocation90_spill] sm:$0xff]  ;;  %v6972_v52 = vld [vmem:[#allocation91_spill] sm:$0xff] }
 0x233   :  { %v2291_v47 = vadd.f32 %v2290_v1, %v5582_v13  ;;  %v2300_v35 = vadd.f32 %v2299_v7, %v5584_v15  ;;  %v2345_v19 = vadd.f32 %v2344_v36, %v2343_v49  ;;  %v2309_v3 = vadd.f32 %v2308_v60, %v5586_v10  ;;  %v6963_v10 = vld [vmem:[#allocation97_spill] sm:$0xff] }
 0x234   :  { %v2354_v5 = vadd.f32 %v2353_v45, %v2352_v59  ;;  %v2383_v28 = vmax.f32 %v5604_v42, 0.0  ;;  %v2384_v33 = vmax.f32 %v5606_v57, 0.0  ;;  %v2318_v9 = vadd.f32 %v2317_v62, %v2316_v32  ;;  %v6967_v32 = vld [vmem:[#allocation89_spill] sm:$0xff]  ;;  %v6969_v59 = vld [vmem:[#allocation100_spill] sm:$0xff]  ;;  %v6971_v62 = vld [vmem:[#allocation102_spill] sm:$0xff] }
 0x235   :  { %v2363_v30 = vadd.f32 %v2362_v40, %v2361_v39  ;;  %v2372_v63 = vadd.f32 %v2371_v61, %v2370_v50  ;;  %v2381_v44 = vadd.f32 %v2380_v6, %v2379_v17  ;;  %v2382_v29 = vmax.f32 %v2246_v11, 0.0  ;;  %v6970_v50 = vld [vmem:[#allocation101_spill] sm:$0xff]  ;;  %v6973_v45 = vld [vmem:[#allocation103_spill] sm:$0xff]  ;;  %v6974_v61 = vld [vmem:[#allocation92_spill] sm:$0xff] }
 0x236   :  { %v2385_v13 = vmax.f32 %v2273_v16, 0.0  ;;  %v2391_v1 = vmax.f32 %v2327_v43, 0.0  ;;  %v2392_v22 = vmax.f32 %v2336_v46, 0.0  ;;  %v2386_v55 = vmax.f32 %v2282_v58, 0.0  ;;  %v6975_v43 = vld [vmem:[#allocation88_spill] sm:$0xff]  ;;  %v6976_v58 = vld [vmem:[#allocation93_spill] sm:$0xff] }
 0x237   :  { %v2387_v15 = vmax.f32 %v2291_v47, 0.0  ;;  %v2388_v7 = vmax.f32 %v2300_v35, 0.0  ;;  %v2393_v23 = vmax.f32 %v2345_v19, 0.0  ;;  %v2389_v21 = vmax.f32 %v2309_v3, 0.0  ;;  %v6977_v35 = vld [vmem:[#allocation95_spill] sm:$0xff] }
 0x238   :  { %v2394_v8 = vmax.f32 %v2354_v5, 0.0  ;;  %v2399_v60 = vmul.f32 %v2383_v28, %v6963_v10  ;;  %v2400_v42 = vmul.f32 %v2384_v33, %v6964_v54  ;;  %v2390_v24 = vmax.f32 %v2318_v9, 0.0  ;;  %v6978_v5 = vld [vmem:[#allocation96_spill] sm:$0xff]  ;;  %v7051_v10 = vld [vmem:[#allocation73_spill] sm:$0xff] }
 0x239   :  { %v2395_v57 = vmax.f32 %v2363_v30, 0.0  ;;  %v2396_v38 = vmax.f32 %v2372_v63, 0.0  ;;  %v2397_v37 = vmax.f32 %v2381_v44, 0.0  ;;  %v2398_v26 = vmul.f32 %v2382_v29, %v6965_v12  ;;  %v7047_v12 = vld [vmem:[#allocation25_spill] sm:$0xff]  ;;  %v7049_v54 = vld [vmem:[#allocation80_spill] sm:$0xff] }
 0x23a   :  { %v2401_v31 = vmul.f32 %v2385_v13, %v6966_v18  ;;  %v2407_v51 = vmul.f32 %v2391_v1, %v6967_v32  ;;  %v2408_v49 = vmul.f32 %v2392_v22, %v6968_v0  ;;  %v2402_v39 = vmul.f32 %v2386_v55, %v6969_v59  ;;  %v7038_v0 = vld [vmem:[#allocation63_spill] sm:$0xff]  ;;  %v7039_v32 = vld [vmem:[#allocation72_spill] sm:$0xff]  ;;  %v7043_v59 = vld [vmem:[#allocation70_spill] sm:$0xff] }
 0x23b   :  { %v2403_v17 = vmul.f32 %v2387_v15, %v6970_v50  ;;  %v2404_v2 = vmul.f32 %v2388_v7, %v6971_v62  ;;  %v2409_v36 = vmul.f32 %v2393_v23, %v6972_v52  ;;  %v2405_v40 = vmul.f32 %v2389_v21, %v6973_v45  ;;  %v7033_v52 = vld [vmem:[#allocation71_spill] sm:$0xff]  ;;  %v7035_v45 = vld [vmem:[#allocation76_spill] sm:$0xff] }
 0x23c   :  { %v2410_v6 = vmul.f32 %v2394_v8, %v6974_v61  ;;  %v2430_v11 = vrot.slane %v2399_v60, 7  ;;  %v2432_v16 = vrot.slane %v2400_v42, 6  ;;  %v2406_v46 = vmul.f32 %v2390_v24, %v6975_v43  ;;  %v7029_v61 = vld [vmem:[#allocation61_spill] sm:$0xff]  ;;  %v7037_v62 = vld [vmem:[#allocation67_spill] sm:$0xff]  ;;  %v7045_v18 = vld [vmem:[#allocation32_spill] sm:$0xff] }
 0x23d   :  { %v2411_v47 = vmul.f32 %v2395_v57, %v6976_v58  ;;  %v2412_v19 = vmul.f32 %v2396_v38, %v6977_v35  ;;  %v2444_v3 = vrot.slane %v2407_v51, 7  ;;  %v2413_v28 = vmul.f32 %v2397_v37, %v6978_v5  ;;  %v6979_v38 = vld [vmem:[#allocation104_spill] sm:$0xff]  ;;  %v6980_v37 = vld [vmem:[#allocation106_spill] sm:$0xff]  ;;  %v7041_v50 = vld [vmem:[#allocation27_spill] sm:$0xff] }
 0x23e   :  { %v2431_v33 = vsel %vm2059_vm1, %v2430_v11, %v2398_v26  ;;  %v2434_v9 = vrot.slane %v2401_v31, 5  ;;  %v2446_v30 = vrot.slane %v2408_v49, 6  ;;  %v2436_v44 = vrot.slane %v2402_v39, 4  ;;  %v6982_v39 = vld [vmem:[#allocation84_spill] sm:$0xff]  ;;  %v7023_v35 = vld [vmem:[#allocation62_spill] sm:$0xff] }
 0x23f   :  { %v2433_v63 = vsel %vm2062_vm2, %v2432_v16, %v2431_v33  ;;  %v2445_v29 = vsel %vm2059_vm1, %v2444_v3, %v2406_v46  ;;  %v2448_v13 = vrot.slane %v2409_v36, 5  ;;  %v2438_v22 = vrot.slane %v2403_v17, 3  ;;  %v6983_v17 = vld [vmem:[#allocation107_spill] sm:$0xff]  ;;  %v6985_v36 = vld [vmem:[#allocation85_spill] sm:$0xff]  ;;  %v7022_v5 = vld [vmem:[#allocation64_spill] sm:$0xff] }
 0x240   :  { %v2435_v1 = vsel %vm2065_vm3, %v2434_v9, %v2433_v63  ;;  %v2447_v55 = vsel %vm2062_vm2, %v2446_v30, %v2445_v29  ;;  %v2450_v15 = vrot.slane %v2410_v6, 4  ;;  %v2440_v23 = vrot.slane %v2404_v2, 2  ;;  %v6990_v33 = vld [vmem:[#allocation5_spill] sm:$0xff]  ;;  %v6992_v30 = vld [vmem:[#allocation8_spill] sm:$0xff]  ;;  %v6993_v63 = vld [vmem:[#allocation111_spill] sm:$0xff] }
 0x241   :  { %v2437_v7 = vsel %vm2068_vm4, %v2436_v44, %v2435_v1  ;;  %v2449_v21 = vsel %vm2065_vm3, %v2448_v13, %v2447_v55  ;;  %v2452_v8 = vrot.slane %v2411_v47, 3  ;;  %v2442_v42 = vrot.slane %v2405_v40, 1  ;;  %v6988_v47 = vld [vmem:[#allocation6_spill] sm:$0xff]  ;;  %v6994_v13 = vld [vmem:[#allocation7_spill] sm:$0xff]  ;;  %v6995_v1 = vld [vmem:[#allocation112_spill] sm:$0xff] }
 0x242   :  { %v2439_v60 = vsel %vm2071_vm5, %v2438_v22, %v2437_v7  ;;  %v2451_v24 = vsel %vm2068_vm4, %v2450_v15, %v2449_v21  ;;  %v2454_v57 = vrot.slane %v2412_v19, 2  ;;  %v5683_v26 = vmul.f32 %v6980_v37, %v6979_v38  ;;  %v6989_v19 = vld [vmem:[#allocation21_spill] sm:$0xff]  ;;  %v6996_v55 = vld [vmem:[#allocation10_spill] sm:$0xff]  ;;  %v6998_v21 = vld [vmem:[#allocation12_spill] sm:$0xff] }
 0x243   :  { %v2441_v31 = vsel %vm2074_vm6, %v2440_v23, %v2439_v60  ;;  %v2453_v51 = vsel %vm2071_vm5, %v2452_v8, %v2451_v24  ;;  %v2456_v49 = vrot.slane %v2413_v28, 1  ;;  %v5689_v2 = vmul.f32 %v6983_v17, %v6982_v39  ;;  %v6991_v28 = vld [vmem:[#allocation109_spill] sm:$0xff]  ;;  %v6999_v60 = vld [vmem:[#allocation11_spill] sm:$0xff]  ;;  %v7000_v24 = vld [vmem:[#allocation14_spill] sm:$0xff] }
 0x244   :  { %6981 = vst [vmem:[#allocation110_spill] sm:$0xff] %v5683_v26  ;;  %v6986_v6 = vrot.slane %v6985_v36, 4  ;;  %v2443_v11 = vsel %vm2077_vm7, %v2442_v42, %v2441_v31  ;;  %v2455_v16 = vsel %vm2074_vm6, %v2454_v57, %v2453_v51  ;;  %v2539_v3 = vmul.f32 %v6989_v19, %v6988_v47  ;;  %v6997_v7 = vld [vmem:[#allocation9_spill] sm:$0xff]  ;;  %v7002_v51 = vld [vmem:[#allocation28_spill] sm:$0xff]  ;;  %v7003_v39 = vld [vmem:[#allocation26_spill] sm:$0xff] }
 0x245   :  { %6984 = vst [vmem:[#allocation115_spill] sm:$0xff] %v5689_v2  ;;  %v2457_v46 = vsel %vm2077_vm7, %v2456_v49, %v2455_v16  ;;  %v2540_v9 = vmul.f32 %v6991_v28, %v6990_v33  ;;  %v5705_v44 = vmul.f32 %v6993_v63, %v6992_v30  ;;  %v5709_v22 = vmul.f32 %v6995_v1, %v6994_v13  ;;  %v7001_v38 = vld [vmem:[#allocation13_spill] sm:$0xff]  ;;  %v7015_v2 = vld [vmem:[#allocation51_spill] sm:$0xff]  ;;  %v7016_v30 = vld [vmem:[#allocation56_spill] sm:$0xff] }
 0x246   :  { %v5694_v40 = vadd.f32 %v6986_v6, %v6985_v36  ;;  %v2460_v29 = vadd.f32 %v2457_v46, %v2443_v11  ;;  %v2543_v15 = vmul.f32 %v6989_v19, %v6996_v55  ;;  %v2544_v23 = vmul.f32 %v6991_v28, %v6997_v7  ;;  %v7004_v36 = vld [vmem:[#allocation31_spill] sm:$0xff]  ;;  %v7005_v11 = vld [vmem:[#allocation30_spill] sm:$0xff]  ;;  %v7006_v46 = vld [vmem:[#allocation36_spill] sm:$0xff] }
 0x247   :  { %v5717_v8 = vmul.f32 %v6993_v63, %v6998_v21  ;;  %v5721_v42 = vmul.f32 %v6995_v1, %v6999_v60  ;;  %v2547_v57 = vmul.f32 %v6989_v19, %v7000_v24  ;;  %v2548_v37 = vmul.f32 %v6991_v28, %v7001_v38  ;;  %v7009_v38 = vld [vmem:[#allocation40_spill] sm:$0xff]  ;;  %v7019_v33 = vld [vmem:[#allocation58_spill] sm:$0xff]  ;;  %v7020_v47 = vld [vmem:[#allocation57_spill] sm:$0xff] }
 0x248   :  { %6987 = vst [vmem:[#allocation23_spill] sm:$0xff] %v5694_v40  ;;  %v2461_v31 = vrot.slane %v2460_v29, 4  ;;  %v2549_v49 = vmul.f32 %v6993_v63, %v7002_v51  ;;  %v5731_v17 = vmul.f32 %v6995_v1, %v7003_v39  ;;  %v2551_v6 = vmul.f32 %v6989_v19, %v7004_v36  ;;  %v7010_v24 = vld [vmem:[#allocation44_spill] sm:$0xff]  ;;  %v7011_v36 = vld [vmem:[#allocation43_spill] sm:$0xff] }
 0x249   :  { %v2552_v16 = vmul.f32 %v6991_v28, %v7005_v11  ;;  %v2553_v48 = vmul.f32 %v6993_v63, %v7006_v46  ;;  %v5741_v4 = vmul.f32 %v6995_v1, %v7007_v25  ;;  %v2555_v51 = vmul.f32 %v6989_v19, %v7008_v56  ;;  %v7012_v11 = vld [vmem:[#allocation48_spill] sm:$0xff]  ;;  %v7013_v46 = vld [vmem:[#allocation47_spill] sm:$0xff]  ;;  %v7014_v25 = vld [vmem:[#allocation54_spill] sm:$0xff] }
 0x24a   :  { %v2556_v39 = vmul.f32 %v6991_v28, %v7009_v38  ;;  %v2557_v60 = vmul.f32 %v6993_v63, %v7010_v24  ;;  %v2558_v21 = vmul.f32 %v6995_v1, %v7011_v36  ;;  %v2559_v7 = vmul.f32 %v6989_v19, %v7012_v11  ;;  %v7018_v24 = vld [vmem:[#allocation55_spill] sm:$0xff] }
 0x24b   :  { %v2560_v55 = vmul.f32 %v6991_v28, %v7013_v46  ;;  %v2561_v13 = vmul.f32 %v6993_v63, %v7014_v25  ;;  %v2562_v56 = vmul.f32 %v6995_v1, %v7015_v2  ;;  %v2563_v38 = vmul.f32 %v6989_v19, %v7016_v30  ;;  %v7021_v40 = vld [vmem:[#allocation75_spill] sm:$0xff] }
 0x24c   :  { %v5761_v26 = vadd.f32 %v2461_v31, %v2460_v29  ;;  %v2564_v36 = vmul.f32 %v6991_v28, %v7018_v24  ;;  %v2565_v11 = vmul.f32 %v6993_v63, %v7019_v33  ;;  %v2566_v46 = vmul.f32 %v6995_v1, %v7020_v47  ;;  %v7024_v29 = vld [vmem:[#allocation87_spill] sm:$0xff]  ;;  %v7026_v33 = vld [vmem:[#allocation68_spill] sm:$0xff]  ;;  %v7027_v47 = vld [vmem:[#allocation34_spill] sm:$0xff] }
 0x24d   :  { %v2567_v25 = vmul.f32 %v6989_v19, %v7021_v40  ;;  %v2568_v2 = vmul.f32 %v6991_v28, %v7022_v5  ;;  %v2569_v30 = vmul.f32 %v6993_v63, %v7023_v35  ;;  %v2570_v31 = vmul.f32 %v6995_v1, %v7024_v29  ;;  %v7031_v35 = vld [vmem:[#allocation60_spill] sm:$0xff]  ;;  %v7032_v29 = vld [vmem:[#allocation59_spill] sm:$0xff] }
 0x24e   :  { %7017 = vst [vmem:[#allocation29_spill] sm:$0xff] %v5761_v26  ;;  %v7025_v26 = vld [vmem:[#allocation69_spill] sm:$0xff]  ;;  %v5783_v58 = vmul.f32 %v6991_v28, %v7026_v33  ;;  %v5787_v40 = vmul.f32 %v6993_v63, %v7027_v47  ;;  %v5791_v5 = vmul.f32 %v6995_v1, %v7029_v61  ;;  %v5795_v43 = vmul.f32 %v6989_v19, %v7031_v35 }
 0x24f   :  { %v5779_v24 = vmul.f32 %v6989_v19, %v7025_v26  ;;  %v5799_v26 = vmul.f32 %v6991_v28, %v7032_v29  ;;  %v5803_v33 = vmul.f32 %v6993_v63, %v7033_v52  ;;  %v5807_v47 = vmul.f32 %v6995_v1, %v7035_v45 }
 0x250   :  { %7028 = vst [vmem:[#allocation15_spill] sm:$0xff] %v5787_v40  ;;  %7030 = vst [vmem:[#allocation16_spill] sm:$0xff] %v5791_v5  ;;  %v5811_v61 = vmul.f32 %v6989_v19, %v7037_v62  ;;  %v5815_v35 = vmul.f32 %v6991_v28, %v7038_v0  ;;  %v5819_v29 = vmul.f32 %v6993_v63, %v7039_v32  ;;  %v7057_v5 = vld [vmem:[#allocation65_spill] sm:$0xff] }
 0x251   :  { %7034 = vst [vmem:[#allocation105_spill] sm:$0xff] %v5803_v33  ;;  %7036 = vst [vmem:[#allocation117_spill] sm:$0xff] %v5807_v47  ;;  %v5823_v52 = vmul.f32 %v6995_v1, %v7041_v50  ;;  %v5827_v45 = vmul.f32 %v6989_v19, %v7043_v59  ;;  %v5831_v62 = vmul.f32 %v6991_v28, %v7045_v18  ;;  %v7055_v47 = vld [vmem:[#allocation79_spill] sm:$0xff]  ;;  %v7065_v33 = vld [vmem:[#allocation66_spill] sm:$0xff] }
 0x252   :  { %7040 = vst [vmem:[#allocation120_spill] sm:$0xff] %v5819_v29  ;;  %v5835_v0 = vmul.f32 %v6993_v63, %v7047_v12  ;;  %v5839_v32 = vmul.f32 %v6995_v1, %v7049_v54  ;;  %v5843_v50 = vmul.f32 %v6989_v19, %v7051_v10  ;;  %v5851_v18 = vmul.f32 %v6993_v63, %v7055_v47  ;;  %v7063_v29 = vld [vmem:[#allocation74_spill] sm:$0xff] }
 0x253   :  { %7042 = vst [vmem:[#allocation86_spill] sm:$0xff] %v5823_v52  ;;  %7044 = vst [vmem:[#allocation22_spill] sm:$0xff] %v5827_v45  ;;  %v7053_v52 = vld [vmem:[#allocation45_spill] sm:$0xff]  ;;  %v5855_v12 = vmul.f32 %v6995_v1, %v7057_v5  ;;  %v5871_v47 = vmul.f32 %v6995_v1, %v7065_v33  ;;  %v2639_v40 = vadd.f32 %v2556_v39, %v2555_v51 }
 0x254   :  { %7046 = vst [vmem:[#allocation20_spill] sm:$0xff] %v5831_v62  ;;  %7048 = vst [vmem:[#allocation113_spill] sm:$0xff] %v5835_v0  ;;  %v5847_v59 = vmul.f32 %v6991_v28, %v7053_v52  ;;  %v7059_v0 = vld [vmem:[#allocation46_spill] sm:$0xff]  ;;  %v5867_v52 = vmul.f32 %v6993_v63, %v7063_v29  ;;  %v2621_v29 = vadd.f32 %v2548_v37, %v2547_v57 }
 0x255   :  { %7050 = vst [vmem:[#allocation19_spill] sm:$0xff] %v5839_v32  ;;  %7052 = vst [vmem:[#allocation118_spill] sm:$0xff] %v5843_v50  ;;  %v5859_v54 = vmul.f32 %v6989_v19, %v7059_v0  ;;  %v7061_v32 = vld [vmem:[#allocation77_spill] sm:$0xff]  ;;  %v2666_v50 = vadd.f32 %v2568_v2, %v2567_v25  ;;  %v2598_v39 = vmul.f32 %v6995_v1, %v6815_v27 }
 0x256   :  { %7054 = vst [vmem:[#allocation17_spill] sm:$0xff] %v5847_v59  ;;  %7056 = vst [vmem:[#allocation24_spill] sm:$0xff] %v5851_v18  ;;  %v5863_v10 = vmul.f32 %v6991_v28, %v7061_v32  ;;  %v7067_v18 = vld [vmem:[#allocation78_spill] sm:$0xff]  ;;  %v5883_v32 = vmul.f32 %v6993_v63, %v6814_v20  ;;  %v2657_v59 = vadd.f32 %v2564_v36, %v2563_v38 }
 0x257   :  { %7058 = vst [vmem:[#allocation18_spill] sm:$0xff] %v5855_v12  ;;  %7060 = vst [vmem:[#allocation116_spill] sm:$0xff] %v5859_v54  ;;  %v5875_v5 = vmul.f32 %v6989_v19, %v7067_v18  ;;  %v7069_v12 = vld [vmem:[#allocation33_spill] sm:$0xff]  ;;  %v2612_v54 = vadd.f32 %v2544_v23, %v2543_v15 }
 0x258   :  { %7062 = vst [vmem:[#allocation114_spill] sm:$0xff] %v5863_v10  ;;  %7064 = vst [vmem:[#allocation119_spill] sm:$0xff] %v5867_v52  ;;  %v5879_v0 = vmul.f32 %v6991_v28, %v7069_v12  ;;  %v2603_v10 = vadd.f32 %v2540_v9, %v2539_v3  ;;  %v2630_v52 = vadd.f32 %v2552_v16, %v2551_v6 }
 0x259   :  { %7066 = vst [vmem:[#allocation104_spill] sm:$0xff] %v5871_v47  ;;  %7068 = vst [vmem:[#allocation106_spill] sm:$0xff] %v5875_v5  ;;  %v2648_v47 = vadd.f32 %v2560_v55, %v2559_v7  ;;  %v2613_v18 = vadd.f32 %v2612_v54, %v5717_v8  ;;  %v2622_v5 = vadd.f32 %v2621_v29, %v2549_v49 }
 0x25a   :  { %7070 = vst [vmem:[#allocation84_spill] sm:$0xff] %v5879_v0  ;;  %7071 = vst [vmem:[#allocation107_spill] sm:$0xff] %v5883_v32  ;;  %v2604_v33 = vadd.f32 %v2603_v10, %v5705_v44  ;;  %v2631_v62 = vadd.f32 %v2630_v52, %v2553_v48  ;;  %v2640_v12 = vadd.f32 %v2639_v40, %v2557_v60 }
 0x25b   :  { %v2649_v45 = vadd.f32 %v2648_v47, %v2561_v13  ;;  %v2658_v20 = vadd.f32 %v2657_v59, %v2565_v11  ;;  %v2667_v32 = vadd.f32 %v2666_v50, %v2569_v30  ;;  %v2614_v3 = vadd.f32 %v2613_v18, %v5721_v42 }
 0x25c   :  { %v2605_v0 = vadd.f32 %v2604_v33, %v5709_v22  ;;  %v2623_v9 = vadd.f32 %v2622_v5, %v5731_v17  ;;  %v2632_v15 = vadd.f32 %v2631_v62, %v5741_v4  ;;  %v2641_v10 = vadd.f32 %v2640_v12, %v2558_v21 }
 0x25d   :  { %v2650_v55 = vadd.f32 %v2649_v45, %v2562_v56  ;;  %v2659_v25 = vadd.f32 %v2658_v20, %v2566_v46  ;;  %v2668_v2 = vadd.f32 %v2667_v32, %v2570_v31  ;;  %v2615_v54 = vrot.slane %v2614_v3, 4 }
 0x25e   :  { %v2606_v44 = vrot.slane %v2605_v0, 4  ;;  %v2624_v7 = vrot.slane %v2623_v9, 4  ;;  %v2633_v48 = vrot.slane %v2632_v15, 4  ;;  %v2642_v52 = vrot.slane %v2641_v10, 4 }
 0x25f   :  { %v2651_v33 = vrot.slane %v2650_v55, 4  ;;  %v2660_v47 = vrot.slane %v2659_v25, 4  ;;  %v2669_v59 = vrot.slane %v2668_v2, 4  ;;  %v2616_v50 = vadd.f32 %v2615_v54, %v2614_v3 }
 0x260   :  { %v2607_v40 = vadd.f32 %v2606_v44, %v2605_v0  ;;  %v2625_v30 = vadd.f32 %v2624_v7, %v2623_v9  ;;  %v2634_v18 = vadd.f32 %v2633_v48, %v2632_v15  ;;  %v2643_v13 = vadd.f32 %v2642_v52, %v2641_v10  ;;  %v7072_v7 = vld [vmem:[#allocation22_spill] sm:$0xff]  ;;  %v7073_v48 = vld [vmem:[#allocation20_spill] sm:$0xff] }
 0x261   :  { %v2652_v22 = vadd.f32 %v2651_v33, %v2650_v55  ;;  %v2661_v4 = vadd.f32 %v2660_v47, %v2659_v25  ;;  %v2670_v12 = vadd.f32 %v2669_v59, %v2668_v2  ;;  %v2617_v62 = vrot.slane %v2616_v50, 2  ;;  %v7075_v33 = vld [vmem:[#allocation17_spill] sm:$0xff]  ;;  %v7076_v59 = vld [vmem:[#allocation15_spill] sm:$0xff] }
 0x262   :  { %v2608_v5 = vrot.slane %v2607_v40, 2  ;;  %v2626_v56 = vrot.slane %v2625_v30, 2  ;;  %v2635_v20 = vrot.slane %v2634_v18, 2  ;;  %v2644_v32 = vrot.slane %v2643_v13, 2 }
 0x263   :  { %v2653_v23 = vrot.slane %v2652_v22, 2  ;;  %v2662_v21 = vrot.slane %v2661_v4, 2  ;;  %v2671_v8 = vrot.slane %v2670_v12, 2  ;;  %v2618_v0 = vadd.f32 %v2617_v62, %v2616_v50  ;;  %v7084_v62 = vld [vmem:[#allocation24_spill] sm:$0xff] }
 0x264   :  { %v2609_v45 = vadd.f32 %v2608_v5, %v2607_v40  ;;  %v2627_v60 = vadd.f32 %v2626_v56, %v2625_v30  ;;  %v5891_v42 = vadd.f32 %v2635_v20, %v2634_v18  ;;  %v5893_v57 = vadd.f32 %v2644_v32, %v2643_v13  ;;  %v7074_v40 = vld [vmem:[#allocation118_spill] sm:$0xff]  ;;  %v7077_v30 = vld [vmem:[#allocation116_spill] sm:$0xff] }
 0x265   :  { %v5895_v37 = vadd.f32 %v2653_v23, %v2652_v22  ;;  %v5897_v51 = vadd.f32 %v2662_v21, %v2661_v4  ;;  %v5899_v49 = vadd.f32 %v2671_v8, %v2670_v12  ;;  %v2599_v17 = vmul.f32 %v6989_v19, %v6816_v34  ;;  %v7078_v18 = vld [vmem:[#allocation114_spill] sm:$0xff]  ;;  %v7080_v22 = vld [vmem:[#allocation84_spill] sm:$0xff]  ;;  %v7081_v4 = vld [vmem:[#allocation105_spill] sm:$0xff] }
 0x266   :  { %v2610_v38 = vrot.slane %v2609_v45, 1  ;;  %v2619_v36 = vrot.slane %v2618_v0, 1  ;;  %v2628_v6 = vrot.slane %v2627_v60, 1  ;;  %v2600_v11 = vmul.f32 %v6991_v28, %v6817_v41  ;;  %v7079_v5 = vld [vmem:[#allocation106_spill] sm:$0xff]  ;;  %v7085_v20 = vld [vmem:[#allocation16_spill] sm:$0xff]  ;;  %v7087_v21 = vld [vmem:[#allocation107_spill] sm:$0xff] }
 0x267   :  { %v2601_v16 = vmul.f32 %v6993_v63, %v6818_v53  ;;  %v2602_v46 = vmul.f32 %v6995_v1, %v6819_v14  ;;  %v2637_v29 = vrot.slane %v5891_v42, 1  ;;  %v2646_v3 = vrot.slane %v5893_v57, 1  ;;  %v7140_v1 = vld [vmem:[#allocation56_spill] sm:$0xff]  ;;  %v7143_v28 = vld [vmem:[#allocation58_spill] sm:$0xff]  ;;  %v7144_v19 = vld [vmem:[#allocation57_spill] sm:$0xff] }
 0x268   :  { %v5912_v31 = vadd.f32 %v2610_v38, %v2609_v45  ;;  %v2655_v9 = vrot.slane %v5895_v37, 1  ;;  %v2664_v15 = vrot.slane %v5897_v51, 1  ;;  %v5917_v10 = vadd.f32 %v2619_v36, %v2618_v0  ;;  %v7086_v45 = vld [vmem:[#allocation119_spill] sm:$0xff]  ;;  %v7089_v36 = vld [vmem:[#allocation86_spill] sm:$0xff] }
 0x269   :  { %v5919_v44 = vadd.f32 %v2628_v6, %v2627_v60  ;;  %v2673_v55 = vrot.slane %v5899_v49, 1  ;;  %v2675_v25 = vadd.f32 %v5783_v58, %v5779_v24  ;;  %v2684_v2 = vadd.f32 %v5799_v26, %v5795_v43  ;;  %v7082_v26 = vld [vmem:[#allocation120_spill] sm:$0xff]  ;;  %v7088_v60 = vld [vmem:[#allocation117_spill] sm:$0xff] }
 0x26a   :  { %v2693_v54 = vadd.f32 %v5815_v35, %v5811_v61  ;;  %v2702_v52 = vadd.f32 %v7073_v48, %v7072_v7  ;;  %v2711_v47 = vadd.f32 %v7075_v33, %v7074_v40  ;;  %v2720_v13 = vadd.f32 %v7078_v18, %v7077_v30  ;;  %v7083_v61 = vld [vmem:[#allocation113_spill] sm:$0xff]  ;;  %v7092_v7 = vld [vmem:[#allocation104_spill] sm:$0xff] }
 0x26b   :  { %v2676_v50 = vadd.f32 %v2675_v25, %v7076_v59  ;;  %v2729_v58 = vadd.f32 %v7080_v22, %v7079_v5  ;;  %v2738_v24 = vadd.f32 %v2600_v11, %v2599_v17  ;;  %v2685_v43 = vadd.f32 %v2684_v2, %v7081_v4  ;;  %v7090_v17 = vld [vmem:[#allocation19_spill] sm:$0xff]  ;;  %v7091_v25 = vld [vmem:[#allocation18_spill] sm:$0xff] }
 0x26c   :  { %v2694_v12 = vadd.f32 %v2693_v54, %v7082_v26  ;;  %v2703_v35 = vadd.f32 %v2702_v52, %v7083_v61  ;;  %v2712_v56 = vadd.f32 %v2711_v47, %v7084_v62  ;;  %v2721_v23 = vadd.f32 %v2720_v13, %v7086_v45 }
 0x26d   :  { %v2677_v32 = vadd.f32 %v2676_v50, %v7085_v20  ;;  %v2730_v8 = vadd.f32 %v2729_v58, %v7087_v21  ;;  %v2739_v0 = vadd.f32 %v2738_v24, %v2601_v16  ;;  %v2686_v38 = vadd.f32 %v2685_v43, %v7088_v60 }
 0x26e   :  { %v2695_v6 = vadd.f32 %v2694_v12, %v7089_v36  ;;  %v2704_v11 = vadd.f32 %v2703_v35, %v7090_v17  ;;  %v2713_v2 = vadd.f32 %v2712_v56, %v7091_v25  ;;  %v2722_v48 = vadd.f32 %v2721_v23, %v7092_v7 }
 0x26f   :  { %v2678_v54 = vrot.slane %v2677_v32, 4  ;;  %v2731_v52 = vadd.f32 %v2730_v8, %v2598_v39  ;;  %v2740_v40 = vadd.f32 %v2739_v0, %v2602_v46  ;;  %v2687_v33 = vrot.slane %v2686_v38, 4 }
 0x270   :  { %v2696_v47 = vrot.slane %v2695_v6, 4  ;;  %v2705_v59 = vrot.slane %v2704_v11, 4  ;;  %v2714_v50 = vrot.slane %v2713_v2, 4  ;;  %v2723_v18 = vrot.slane %v2722_v48, 4 }
 0x271   :  { %v2679_v30 = vadd.f32 %v2678_v54, %v2677_v32  ;;  %v2732_v16 = vrot.slane %v2731_v52, 4  ;;  %v2741_v13 = vrot.slane %v2740_v40, 4  ;;  %v2688_v5 = vadd.f32 %v2687_v33, %v2686_v38 }
 0x272   :  { %v2697_v22 = vadd.f32 %v2696_v47, %v2695_v6  ;;  %v2706_v58 = vadd.f32 %v2705_v59, %v2704_v11  ;;  %v2715_v24 = vadd.f32 %v2714_v50, %v2713_v2  ;;  %v2724_v43 = vadd.f32 %v2723_v18, %v2722_v48 }
 0x273   :  { %v2680_v4 = vrot.slane %v2679_v30, 2  ;;  %v2733_v26 = vadd.f32 %v2732_v16, %v2731_v52  ;;  %v2742_v12 = vadd.f32 %v2741_v13, %v2740_v40  ;;  %v2689_v61 = vrot.slane %v2688_v5, 2 }
 0x274   :  { %v2698_v35 = vrot.slane %v2697_v22, 2  ;;  %v2707_v39 = vrot.slane %v2706_v58, 2  ;;  %v2716_v46 = vrot.slane %v2715_v24, 2  ;;  %v2725_v56 = vrot.slane %v2724_v43, 2 }
 0x275   :  { %v2681_v62 = vadd.f32 %v2680_v4, %v2679_v30  ;;  %v2734_v20 = vrot.slane %v2733_v26, 2  ;;  %v2743_v45 = vrot.slane %v2742_v12, 2  ;;  %v2690_v32 = vadd.f32 %v2689_v61, %v2688_v5 }
 0x276   :  { %v2699_v23 = vadd.f32 %v2698_v35, %v2697_v22  ;;  %v2708_v21 = vadd.f32 %v2707_v39, %v2706_v58  ;;  %v2717_v8 = vadd.f32 %v2716_v46, %v2715_v24  ;;  %v2726_v60 = vadd.f32 %v2725_v56, %v2724_v43  ;;  %v7095_v39 = vld [vmem:[#allocation94_spill] sm:$0xff]  ;;  %v7097_v56 = vld [vmem:[#allocation100_spill] sm:$0xff] }
 0x277   :  { %v2682_v0 = vrot.slane %v2681_v62, 1  ;;  %v2735_v38 = vadd.f32 %v2734_v20, %v2733_v26  ;;  %v2744_v36 = vadd.f32 %v2743_v45, %v2742_v12  ;;  %v2691_v6 = vrot.slane %v2690_v32, 1  ;;  %v7093_v26 = vld [vmem:[#allocation97_spill] sm:$0xff] }
 0x278   :  { %v2700_v17 = vrot.slane %v2699_v23, 1  ;;  %v2709_v11 = vrot.slane %v2708_v21, 1  ;;  %v2718_v25 = vrot.slane %v2717_v8, 1  ;;  %v2638_v2 = vadd.f32 %v2637_v29, %v5891_v42  ;;  %v7098_v45 = vld [vmem:[#allocation101_spill] sm:$0xff] }
 0x279   :  { %v2727_v54 = vrot.slane %v2726_v60, 1  ;;  %v2736_v7 = vrot.slane %v2735_v38, 1  ;;  %v2745_v48 = vrot.slane %v2744_v36, 1  ;;  %v2647_v52 = vadd.f32 %v2646_v3, %v5893_v57 }
 0x27a   :  { %v2656_v40 = vadd.f32 %v2655_v9, %v5895_v37  ;;  %v2692_v33 = vadd.f32 %v2691_v6, %v2690_v32  ;;  %v2701_v47 = vadd.f32 %v2700_v17, %v2699_v23  ;;  %v2665_v59 = vadd.f32 %v2664_v15, %v5897_v51  ;;  %v7099_v23 = vld [vmem:[#allocation89_spill] sm:$0xff]  ;;  %v7103_v17 = vld [vmem:[#allocation91_spill] sm:$0xff] }
 0x27b   :  { %v2674_v42 = vadd.f32 %v2673_v55, %v5899_v49  ;;  %v2683_v29 = vadd.f32 %v2682_v0, %v2681_v62  ;;  %v2710_v50 = vadd.f32 %v2709_v11, %v2708_v21  ;;  %v2719_v30 = vadd.f32 %v2718_v25, %v2717_v8  ;;  %v7100_v8 = vld [vmem:[#allocation90_spill] sm:$0xff] }
 0x27c   :  { %v2728_v18 = vadd.f32 %v2727_v54, %v2726_v60  ;;  %v2748_v57 = vmax.f32 %v5917_v10, 0.0  ;;  %v2749_v3 = vmax.f32 %v5919_v44, 0.0  ;;  %v2737_v16 = vadd.f32 %v2736_v7, %v2735_v38  ;;  %v7094_v10 = vld [vmem:[#allocation98_spill] sm:$0xff]  ;;  %v7105_v7 = vld [vmem:[#allocation92_spill] sm:$0xff] }
 0x27d   :  { %v2746_v37 = vadd.f32 %v2745_v48, %v2744_v36  ;;  %v2747_v9 = vmax.f32 %v5912_v31, 0.0  ;;  %v2750_v13 = vmax.f32 %v2638_v2, 0.0  ;;  %v2751_v5 = vmax.f32 %v2647_v52, 0.0  ;;  %v7096_v31 = vld [vmem:[#allocation99_spill] sm:$0xff]  ;;  %v7101_v60 = vld [vmem:[#allocation102_spill] sm:$0xff]  ;;  %v7104_v2 = vld [vmem:[#allocation88_spill] sm:$0xff] }
 0x27e   :  { %v2752_v22 = vmax.f32 %v2656_v40, 0.0  ;;  %v2756_v51 = vmax.f32 %v2692_v33, 0.0  ;;  %v2757_v15 = vmax.f32 %v2701_v47, 0.0  ;;  %v2753_v58 = vmax.f32 %v2665_v59, 0.0  ;;  %v7102_v36 = vld [vmem:[#allocation103_spill] sm:$0xff]  ;;  %v7106_v52 = vld [vmem:[#allocation93_spill] sm:$0xff] }
 0x27f   :  { %v2754_v24 = vmax.f32 %v2674_v42, 0.0  ;;  %v2755_v49 = vmax.f32 %v2683_v29, 0.0  ;;  %v2758_v55 = vmax.f32 %v2710_v50, 0.0  ;;  %v2759_v4 = vmax.f32 %v2719_v30, 0.0  ;;  %v7107_v47 = vld [vmem:[#allocation95_spill] sm:$0xff]  ;;  %v7108_v30 = vld [vmem:[#allocation96_spill] sm:$0xff] }
 0x280   :  { %v2760_v43 = vmax.f32 %v2728_v18, 0.0  ;;  %v2764_v12 = vmul.f32 %v2748_v57, %v7093_v26  ;;  %v2765_v61 = vmul.f32 %v2749_v3, %v7094_v10  ;;  %v2761_v44 = vmax.f32 %v2737_v16, 0.0  ;;  %v7175_v10 = vld [vmem:[#allocation73_spill] sm:$0xff] }
 0x281   :  { %v2762_v35 = vmax.f32 %v2746_v37, 0.0  ;;  %v2763_v46 = vmul.f32 %v2747_v9, %v7095_v39  ;;  %v2766_v62 = vmul.f32 %v2750_v13, %v7096_v31  ;;  %v2767_v20 = vmul.f32 %v2751_v5, %v7097_v56  ;;  %v7167_v56 = vld [vmem:[#allocation70_spill] sm:$0xff]  ;;  %v7169_v39 = vld [vmem:[#allocation32_spill] sm:$0xff]  ;;  %v7177_v26 = vld [vmem:[#allocation45_spill] sm:$0xff] }
 0x282   :  { %v2768_v32 = vmul.f32 %v2752_v22, %v7098_v45  ;;  %v2772_v21 = vmul.f32 %v2756_v51, %v7099_v23  ;;  %v2773_v0 = vmul.f32 %v2757_v15, %v7100_v8  ;;  %v2769_v38 = vmul.f32 %v2753_v58, %v7101_v60  ;;  %v7162_v60 = vld [vmem:[#allocation63_spill] sm:$0xff]  ;;  %v7163_v8 = vld [vmem:[#allocation72_spill] sm:$0xff]  ;;  %v7171_v23 = vld [vmem:[#allocation25_spill] sm:$0xff] }
 0x283   :  { %v2770_v6 = vmul.f32 %v2754_v24, %v7102_v36  ;;  %v2774_v11 = vmul.f32 %v2758_v55, %v7103_v17  ;;  %v2795_v25 = vrot.slane %v2764_v12, 7  ;;  %v2771_v54 = vmul.f32 %v2755_v49, %v7104_v2  ;;  %v7110_v12 = vld [vmem:[#allocation108_spill] sm:$0xff]  ;;  %v7157_v2 = vld [vmem:[#allocation71_spill] sm:$0xff] }
 0x284   :  { %v2775_v48 = vmul.f32 %v2759_v4, %v7105_v7  ;;  %v2776_v40 = vmul.f32 %v2760_v43, %v7106_v52  ;;  %v2797_v33 = vrot.slane %v2765_v61, 6  ;;  %v2777_v59 = vmul.f32 %v2761_v44, %v7107_v47  ;;  %v7109_v43 = vld [vmem:[#allocation82_spill] sm:$0xff]  ;;  %v7153_v52 = vld [vmem:[#allocation61_spill] sm:$0xff]  ;;  %v7159_v36 = vld [vmem:[#allocation76_spill] sm:$0xff] }
 0x285   :  { %v2796_v42 = vsel %vm2059_vm1, %v2795_v25, %v2763_v46  ;;  %v2799_v29 = vrot.slane %v2766_v62, 5  ;;  %v2809_v50 = vrot.slane %v2772_v21, 7  ;;  %v2778_v18 = vmul.f32 %v2762_v35, %v7108_v30  ;;  %v7145_v21 = vld [vmem:[#allocation75_spill] sm:$0xff]  ;;  %v7147_v30 = vld [vmem:[#allocation62_spill] sm:$0xff]  ;;  %v7173_v31 = vld [vmem:[#allocation80_spill] sm:$0xff] }
 0x286   :  { %v2798_v57 = vsel %vm2062_vm2, %v2797_v33, %v2796_v42  ;;  %v2801_v3 = vrot.slane %v2767_v20, 4  ;;  %v2811_v16 = vrot.slane %v2773_v0, 6  ;;  %v2803_v9 = vrot.slane %v2768_v32, 3  ;;  %v7115_v33 = vld [vmem:[#allocation5_spill] sm:$0xff]  ;;  %v7116_v42 = vld [vmem:[#allocation110_spill] sm:$0xff]  ;;  %v7161_v17 = vld [vmem:[#allocation67_spill] sm:$0xff] }
 0x287   :  { %v2800_v37 = vsel %vm2065_vm3, %v2799_v29, %v2798_v57  ;;  %v2810_v13 = vsel %vm2059_vm1, %v2809_v50, %v2771_v54  ;;  %v2813_v5 = vrot.slane %v2774_v11, 5  ;;  %v2805_v51 = vrot.slane %v2769_v38, 2  ;;  %v7113_v54 = vld [vmem:[#allocation6_spill] sm:$0xff]  ;;  %v7118_v50 = vld [vmem:[#allocation115_spill] sm:$0xff]  ;;  %v7146_v38 = vld [vmem:[#allocation64_spill] sm:$0xff] }
 0x288   :  { %v2802_v22 = vsel %vm2068_vm4, %v2801_v3, %v2800_v37  ;;  %v2812_v15 = vsel %vm2062_vm2, %v2811_v16, %v2810_v13  ;;  %v2815_v58 = vrot.slane %v2775_v48, 4  ;;  %v2807_v49 = vrot.slane %v2770_v6, 1  ;;  %v7114_v48 = vld [vmem:[#allocation81_spill] sm:$0xff]  ;;  %v7120_v37 = vld [vmem:[#allocation10_spill] sm:$0xff]  ;;  %v7139_v6 = vld [vmem:[#allocation51_spill] sm:$0xff] }
 0x289   :  { %v2804_v24 = vsel %vm2071_vm5, %v2803_v9, %v2802_v22  ;;  %v2814_v55 = vsel %vm2065_vm3, %v2813_v5, %v2812_v15  ;;  %v2817_v4 = vrot.slane %v2776_v40, 3  ;;  %v5993_v61 = vmul.f32 %v7110_v12, %v7109_v43  ;;  %v7121_v13 = vld [vmem:[#allocation9_spill] sm:$0xff]  ;;  %v7122_v22 = vld [vmem:[#allocation12_spill] sm:$0xff]  ;;  %v7123_v15 = vld [vmem:[#allocation11_spill] sm:$0xff] }
 0x28a   :  { %v2806_v44 = vsel %vm2074_vm6, %v2805_v51, %v2804_v24  ;;  %v2816_v35 = vsel %vm2068_vm4, %v2815_v58, %v2814_v55  ;;  %v2819_v46 = vrot.slane %v2777_v59, 2  ;;  %v2821_v32 = vrot.slane %v2778_v18, 1  ;;  %v7117_v59 = vld [vmem:[#allocation8_spill] sm:$0xff]  ;;  %v7119_v18 = vld [vmem:[#allocation7_spill] sm:$0xff]  ;;  %v7124_v24 = vld [vmem:[#allocation14_spill] sm:$0xff] }
 0x28b   :  { %v2808_v62 = vsel %vm2077_vm7, %v2807_v49, %v2806_v44  ;;  %v2818_v20 = vsel %vm2071_vm5, %v2817_v4, %v2816_v35  ;;  %v2900_v40 = vmul.f32 %v7114_v48, %v7113_v54  ;;  %v2901_v29 = vmul.f32 %v7116_v42, %v7115_v33  ;;  %v7125_v55 = vld [vmem:[#allocation13_spill] sm:$0xff]  ;;  %v7126_v12 = vld [vmem:[#allocation28_spill] sm:$0xff]  ;;  %v7127_v35 = vld [vmem:[#allocation26_spill] sm:$0xff] }
 0x28c   :  { %v2820_v11 = vsel %vm2074_vm6, %v2819_v46, %v2818_v20  ;;  %v6009_v57 = vmul.f32 %v7118_v50, %v7117_v59  ;;  %v6013_v16 = vmul.f32 %v5993_v61, %v7119_v18  ;;  %v2904_v9 = vmul.f32 %v7114_v48, %v7120_v37  ;;  %v7131_v33 = vld [vmem:[#allocation35_spill] sm:$0xff]  ;;  %v7132_v18 = vld [vmem:[#allocation42_spill] sm:$0xff] }
 0x28d   :  { %v2822_v25 = vsel %vm2077_vm7, %v2821_v32, %v2820_v11  ;;  %v2905_v5 = vmul.f32 %v7116_v42, %v7121_v13  ;;  %v2906_v51 = vmul.f32 %v7118_v50, %v7122_v22  ;;  %v6023_v58 = vmul.f32 %v5993_v61, %v7123_v15  ;;  %v7129_v32 = vld [vmem:[#allocation30_spill] sm:$0xff]  ;;  %v7133_v13 = vld [vmem:[#allocation40_spill] sm:$0xff]  ;;  %v7165_v45 = vld [vmem:[#allocation27_spill] sm:$0xff] }
 0x28e   :  { %v2825_v3 = vadd.f32 %v2822_v25, %v2808_v62  ;;  %v2908_v49 = vmul.f32 %v7114_v48, %v7124_v24  ;;  %v2909_v4 = vmul.f32 %v7116_v42, %v7125_v55  ;;  %v2910_v44 = vmul.f32 %v7118_v50, %v7126_v12  ;;  %v7128_v62 = vld [vmem:[#allocation31_spill] sm:$0xff]  ;;  %v7130_v25 = vld [vmem:[#allocation36_spill] sm:$0xff] }
 0x28f   :  { %v6033_v46 = vmul.f32 %v5993_v61, %v7127_v35  ;;  %v2912_v20 = vmul.f32 %v7114_v48, %v7128_v62  ;;  %v2913_v11 = vmul.f32 %v7116_v42, %v7129_v32  ;;  %v2914_v54 = vmul.f32 %v7118_v50, %v7130_v25  ;;  %v7134_v15 = vld [vmem:[#allocation44_spill] sm:$0xff]  ;;  %v7135_v55 = vld [vmem:[#allocation43_spill] sm:$0xff] }
 0x290   :  { %v2826_v43 = vrot.slane %v2825_v3, 4  ;;  %v6043_v59 = vmul.f32 %v5993_v61, %v7131_v33  ;;  %v2916_v37 = vmul.f32 %v7114_v48, %v7132_v18  ;;  %v2917_v22 = vmul.f32 %v7116_v42, %v7133_v13  ;;  %v7136_v35 = vld [vmem:[#allocation48_spill] sm:$0xff]  ;;  %v7137_v32 = vld [vmem:[#allocation47_spill] sm:$0xff]  ;;  %v7138_v33 = vld [vmem:[#allocation54_spill] sm:$0xff] }
 0x291   :  { %v2918_v24 = vmul.f32 %v7118_v50, %v7134_v15  ;;  %v2919_v12 = vmul.f32 %v5993_v61, %v7135_v55  ;;  %v2920_v62 = vmul.f32 %v7114_v48, %v7136_v35  ;;  %v2921_v25 = vmul.f32 %v7116_v42, %v7137_v32  ;;  %v7142_v15 = vld [vmem:[#allocation55_spill] sm:$0xff] }
 0x292   :  { %v2922_v0 = vmul.f32 %v7118_v50, %v7138_v33  ;;  %v2923_v18 = vmul.f32 %v5993_v61, %v7139_v6  ;;  %v2924_v13 = vmul.f32 %v7114_v48, %v7140_v1  ;;  %v6063_v63 = vadd.f32 %v2826_v43, %v2825_v3  ;;  %v7148_v3 = vld [vmem:[#allocation87_spill] sm:$0xff] }
 0x293   :  { %v2925_v55 = vmul.f32 %v7116_v42, %v7142_v15  ;;  %v2926_v35 = vmul.f32 %v7118_v50, %v7143_v28  ;;  %v2927_v32 = vmul.f32 %v5993_v61, %v7144_v19  ;;  %v2928_v33 = vmul.f32 %v7114_v48, %v7145_v21  ;;  %v7150_v28 = vld [vmem:[#allocation68_spill] sm:$0xff]  ;;  %v7151_v19 = vld [vmem:[#allocation34_spill] sm:$0xff] }
 0x294   :  { %7141 = vst [vmem:[#allocation85_spill] sm:$0xff] %v6063_v63  ;;  %v2929_v6 = vmul.f32 %v7116_v42, %v7146_v38  ;;  %v2930_v1 = vmul.f32 %v7118_v50, %v7147_v30  ;;  %v2931_v43 = vmul.f32 %v5993_v61, %v7148_v3  ;;  %v7149_v63 = vld [vmem:[#allocation69_spill] sm:$0xff]  ;;  %v6085_v47 = vmul.f32 %v7116_v42, %v7150_v28  ;;  %v7155_v30 = vld [vmem:[#allocation60_spill] sm:$0xff]  ;;  %v7156_v3 = vld [vmem:[#allocation59_spill] sm:$0xff] }
 0x295   :  { %v6081_v15 = vmul.f32 %v7114_v48, %v7149_v63  ;;  %v6089_v21 = vmul.f32 %v7118_v50, %v7151_v19  ;;  %v6093_v38 = vmul.f32 %v5993_v61, %v7153_v52  ;;  %v6097_v7 = vmul.f32 %v7114_v48, %v7155_v30 }
 0x296   :  { %v6101_v63 = vmul.f32 %v7116_v42, %v7156_v3  ;;  %v6105_v28 = vmul.f32 %v7118_v50, %v7157_v2  ;;  %v6109_v19 = vmul.f32 %v5993_v61, %v7159_v36  ;;  %v6113_v52 = vmul.f32 %v7114_v48, %v7161_v17 }
 0x297   :  { %7152 = vst [vmem:[#allocation22_spill] sm:$0xff] %v6089_v21  ;;  %7154 = vst [vmem:[#allocation20_spill] sm:$0xff] %v6093_v38  ;;  %v6117_v30 = vmul.f32 %v7116_v42, %v7162_v60  ;;  %v6121_v3 = vmul.f32 %v7118_v50, %v7163_v8  ;;  %v6125_v2 = vmul.f32 %v5993_v61, %v7165_v45  ;;  %v7183_v38 = vld [vmem:[#allocation46_spill] sm:$0xff] }
 0x298   :  { %7158 = vst [vmem:[#allocation118_spill] sm:$0xff] %v6105_v28  ;;  %7160 = vst [vmem:[#allocation17_spill] sm:$0xff] %v6109_v19  ;;  %v6129_v36 = vmul.f32 %v7114_v48, %v7167_v56  ;;  %v6133_v17 = vmul.f32 %v7116_v42, %v7169_v39  ;;  %v6137_v60 = vmul.f32 %v7118_v50, %v7171_v23  ;;  %v7181_v19 = vld [vmem:[#allocation65_spill] sm:$0xff] }
 0x299   :  { %7164 = vst [vmem:[#allocation15_spill] sm:$0xff] %v6121_v3  ;;  %7166 = vst [vmem:[#allocation116_spill] sm:$0xff] %v6125_v2  ;;  %v6141_v8 = vmul.f32 %v5993_v61, %v7173_v31  ;;  %v6145_v45 = vmul.f32 %v7114_v48, %v7175_v10  ;;  %v6149_v56 = vmul.f32 %v7116_v42, %v7177_v26  ;;  %v7179_v2 = vld [vmem:[#allocation79_spill] sm:$0xff]  ;;  %v7189_v3 = vld [vmem:[#allocation66_spill] sm:$0xff] }
 0x29a   :  { %7168 = vst [vmem:[#allocation114_spill] sm:$0xff] %v6129_v36  ;;  %7170 = vst [vmem:[#allocation106_spill] sm:$0xff] %v6133_v17  ;;  %v6153_v39 = vmul.f32 %v7118_v50, %v7179_v2  ;;  %v6157_v23 = vmul.f32 %v5993_v61, %v7181_v19  ;;  %v6161_v31 = vmul.f32 %v7114_v48, %v7183_v38 }
 0x29b   :  { %7172 = vst [vmem:[#allocation84_spill] sm:$0xff] %v6137_v60  ;;  %7174 = vst [vmem:[#allocation105_spill] sm:$0xff] %v6141_v8  ;;  %v7185_v8 = vld [vmem:[#allocation77_spill] sm:$0xff]  ;;  %v7187_v60 = vld [vmem:[#allocation74_spill] sm:$0xff]  ;;  %v6173_v2 = vmul.f32 %v5993_v61, %v7189_v3  ;;  %v2964_v28 = vadd.f32 %v2901_v29, %v2900_v40  ;;  %v2973_v21 = vadd.f32 %v2905_v5, %v2904_v9 }
 0x29c   :  { %7176 = vst [vmem:[#allocation120_spill] sm:$0xff] %v6145_v45  ;;  %7178 = vst [vmem:[#allocation113_spill] sm:$0xff] %v6149_v56  ;;  %v6165_v10 = vmul.f32 %v7116_v42, %v7185_v8  ;;  %v6169_v26 = vmul.f32 %v7118_v50, %v7187_v60  ;;  %v2982_v8 = vadd.f32 %v2909_v4, %v2908_v49 }
 0x29d   :  { %7180 = vst [vmem:[#allocation24_spill] sm:$0xff] %v6153_v39  ;;  %7182 = vst [vmem:[#allocation16_spill] sm:$0xff] %v6157_v23  ;;  %v7191_v39 = vld [vmem:[#allocation78_spill] sm:$0xff]  ;;  %v7193_v23 = vld [vmem:[#allocation33_spill] sm:$0xff]  ;;  %v3009_v56 = vadd.f32 %v2921_v25, %v2920_v62  ;;  %v2965_v60 = vadd.f32 %v2964_v28, %v6009_v57  ;;  %v3018_v45 = vadd.f32 %v2925_v55, %v2924_v13 }
 0x29e   :  { %7184 = vst [vmem:[#allocation119_spill] sm:$0xff] %v6161_v31  ;;  %7186 = vst [vmem:[#allocation107_spill] sm:$0xff] %v6165_v10  ;;  %v6177_v19 = vmul.f32 %v7114_v48, %v7191_v39  ;;  %v6181_v38 = vmul.f32 %v7116_v42, %v7193_v23  ;;  %v2991_v10 = vadd.f32 %v2913_v11, %v2912_v20 }
 0x29f   :  { %7188 = vst [vmem:[#allocation117_spill] sm:$0xff] %v6169_v26  ;;  %7190 = vst [vmem:[#allocation86_spill] sm:$0xff] %v6173_v2  ;;  %v3000_v31 = vadd.f32 %v2917_v22, %v2916_v37  ;;  %v2974_v26 = vadd.f32 %v2973_v21, %v2906_v51  ;;  %v3027_v3 = vadd.f32 %v2929_v6, %v2928_v33 }
 0x2a0   :  { %7192 = vst [vmem:[#allocation19_spill] sm:$0xff] %v6177_v19  ;;  %7194 = vst [vmem:[#allocation18_spill] sm:$0xff] %v6181_v38  ;;  %v2983_v2 = vadd.f32 %v2982_v8, %v2910_v44  ;;  %v2992_v17 = vadd.f32 %v2991_v10, %v2914_v54  ;;  %v3010_v39 = vadd.f32 %v3009_v56, %v2922_v0  ;;  %v7195_v56 = vld [vmem:[#allocation83_spill] sm:$0xff] }
 0x2a1   :  { %v3001_v36 = vadd.f32 %v3000_v31, %v2918_v24  ;;  %v2966_v19 = vadd.f32 %v2965_v60, %v6013_v16  ;;  %v2975_v23 = vadd.f32 %v2974_v26, %v6023_v58  ;;  %v3019_v38 = vadd.f32 %v3018_v45, %v2926_v35 }
 0x2a2   :  { %v3028_v40 = vadd.f32 %v3027_v3, %v2930_v1  ;;  %v2984_v29 = vadd.f32 %v2983_v2, %v6033_v46  ;;  %v2993_v9 = vadd.f32 %v2992_v17, %v6043_v59  ;;  %v3011_v49 = vadd.f32 %v3010_v39, %v2923_v18 }
 0x2a3   :  { %v3002_v5 = vadd.f32 %v3001_v36, %v2919_v12  ;;  %v2967_v57 = vrot.slane %v2966_v19, 4  ;;  %v2976_v51 = vrot.slane %v2975_v23, 4  ;;  %v3020_v4 = vadd.f32 %v3019_v38, %v2927_v32 }
 0x2a4   :  { %v3029_v20 = vadd.f32 %v3028_v40, %v2931_v43  ;;  %v2985_v44 = vrot.slane %v2984_v29, 4  ;;  %v2994_v11 = vrot.slane %v2993_v9, 4  ;;  %v3012_v0 = vrot.slane %v3011_v49, 4 }
 0x2a5   :  { %v3003_v54 = vrot.slane %v3002_v5, 4  ;;  %v2968_v37 = vadd.f32 %v2967_v57, %v2966_v19  ;;  %v2977_v16 = vadd.f32 %v2976_v51, %v2975_v23  ;;  %v3021_v22 = vrot.slane %v3020_v4, 4  ;;  %v7196_v57 = vld [vmem:[#allocation114_spill] sm:$0xff] }
 0x2a6   :  { %v3030_v58 = vrot.slane %v3029_v20, 4  ;;  %v2986_v24 = vadd.f32 %v2985_v44, %v2984_v29  ;;  %v2995_v62 = vadd.f32 %v2994_v11, %v2993_v9  ;;  %v3013_v46 = vadd.f32 %v3012_v0, %v3011_v49  ;;  %v7197_v51 = vld [vmem:[#allocation106_spill] sm:$0xff]  ;;  %v7199_v44 = vld [vmem:[#allocation113_spill] sm:$0xff]  ;;  %v7201_v0 = vld [vmem:[#allocation107_spill] sm:$0xff] }
 0x2a7   :  { %v3004_v25 = vadd.f32 %v3003_v54, %v3002_v5  ;;  %v2969_v13 = vrot.slane %v2968_v37, 2  ;;  %v2978_v59 = vrot.slane %v2977_v16, 2  ;;  %v3022_v12 = vadd.f32 %v3021_v22, %v3020_v4  ;;  %v7200_v54 = vld [vmem:[#allocation119_spill] sm:$0xff] }
 0x2a8   :  { %v3031_v18 = vadd.f32 %v3030_v58, %v3029_v20  ;;  %v2987_v55 = vrot.slane %v2986_v24, 2  ;;  %v2996_v35 = vrot.slane %v2995_v62, 2  ;;  %v3014_v33 = vrot.slane %v3013_v46, 2  ;;  %v7198_v20 = vld [vmem:[#allocation120_spill] sm:$0xff]  ;;  %v7203_v58 = vld [vmem:[#allocation118_spill] sm:$0xff] }
 0x2a9   :  { %v3005_v32 = vrot.slane %v3004_v25, 2  ;;  %v6188_v6 = vadd.f32 %v2969_v13, %v2968_v37  ;;  %v2979_v1 = vadd.f32 %v2978_v59, %v2977_v16  ;;  %v3023_v43 = vrot.slane %v3022_v12, 2  ;;  %v7202_v16 = vld [vmem:[#allocation22_spill] sm:$0xff]  ;;  %v7209_v59 = vld [vmem:[#allocation117_spill] sm:$0xff] }
 0x2aa   :  { %v3032_v21 = vrot.slane %v3031_v18, 2  ;;  %v2988_v28 = vadd.f32 %v2987_v55, %v2986_v24  ;;  %v6190_v36 = vadd.f32 %v2996_v35, %v2995_v62  ;;  %v6194_v45 = vadd.f32 %v3014_v33, %v3013_v46  ;;  %v7208_v46 = vld [vmem:[#allocation24_spill] sm:$0xff]  ;;  %v7211_v35 = vld [vmem:[#allocation17_spill] sm:$0xff] }
 0x2ab   :  { %v6192_v17 = vadd.f32 %v3005_v32, %v3004_v25  ;;  %v2958_v31 = vmul.f32 %v7118_v50, %v7195_v56  ;;  %v2980_v10 = vrot.slane %v2979_v1, 1  ;;  %v6198_v26 = vadd.f32 %v3023_v43, %v3022_v12  ;;  %v7212_v43 = vld [vmem:[#allocation116_spill] sm:$0xff] }
 0x2ac   :  { %v6200_v2 = vadd.f32 %v3032_v21, %v3031_v18  ;;  %v2959_v19 = vmul.f32 %v5993_v61, %v6815_v27  ;;  %v2960_v38 = vmul.f32 %v7114_v48, %v6816_v34  ;;  %v2961_v8 = vmul.f32 %v7116_v42, %v6817_v41  ;;  %v7210_v18 = vld [vmem:[#allocation20_spill] sm:$0xff] }
 0x2ad   :  { %v2989_v60 = vrot.slane %v2988_v28, 1  ;;  %v2962_v3 = vmul.f32 %v7118_v50, %v6818_v53  ;;  %v2963_v39 = vmul.f32 %v5993_v61, %v6819_v14  ;;  %v2971_v23 = vrot.slane %v6188_v6, 1 }
 0x2ae   :  { %v2998_v40 = vrot.slane %v6190_v36, 1  ;;  %v6214_v29 = vadd.f32 %v2980_v10, %v2979_v1  ;;  %v3007_v27 = vrot.slane %v6192_v17, 1  ;;  %v3016_v34 = vrot.slane %v6194_v45, 1  ;;  %v7214_v10 = vld [vmem:[#allocation16_spill] sm:$0xff] }
 0x2af   :  { %v3025_v9 = vrot.slane %v6198_v26, 1  ;;  %v6219_v41 = vadd.f32 %v2989_v60, %v2988_v28  ;;  %v3034_v5 = vrot.slane %v6200_v2, 1  ;;  %v3036_v53 = vadd.f32 %v6085_v47, %v6081_v15  ;;  %v7204_v47 = vld [vmem:[#allocation19_spill] sm:$0xff]  ;;  %v7205_v15 = vld [vmem:[#allocation18_spill] sm:$0xff]  ;;  %v7213_v28 = vld [vmem:[#allocation105_spill] sm:$0xff] }
 0x2b0   :  { %v3045_v14 = vadd.f32 %v6101_v63, %v6097_v7  ;;  %v3054_v49 = vadd.f32 %v6117_v30, %v6113_v52  ;;  %v3063_v4 = vadd.f32 %v7197_v51, %v7196_v57  ;;  %v3072_v11 = vadd.f32 %v7199_v44, %v7198_v20  ;;  %v7206_v63 = vld [vmem:[#allocation15_spill] sm:$0xff]  ;;  %v7207_v52 = vld [vmem:[#allocation84_spill] sm:$0xff] }
 0x2b1   :  { %v3081_v37 = vadd.f32 %v7201_v0, %v7200_v54  ;;  %v3037_v22 = vadd.f32 %v3036_v53, %v7202_v16  ;;  %v3090_v62 = vadd.f32 %v7205_v15, %v7204_v47  ;;  %v3099_v7 = vadd.f32 %v2961_v8, %v2960_v38  ;;  %v7215_v8 = vld [vmem:[#allocation86_spill] sm:$0xff] }
 0x2b2   :  { %v3046_v24 = vadd.f32 %v3045_v14, %v7203_v58  ;;  %v3055_v25 = vadd.f32 %v3054_v49, %v7206_v63  ;;  %v3064_v30 = vadd.f32 %v3063_v4, %v7207_v52  ;;  %v3073_v13 = vadd.f32 %v3072_v11, %v7208_v46 }
 0x2b3   :  { %v3082_v12 = vadd.f32 %v3081_v37, %v7209_v59  ;;  %v3038_v55 = vadd.f32 %v3037_v22, %v7210_v18  ;;  %v3091_v33 = vadd.f32 %v3090_v62, %v2958_v31  ;;  %v3100_v1 = vadd.f32 %v3099_v7, %v2962_v3 }
 0x2b4   :  { %v3047_v32 = vadd.f32 %v3046_v24, %v7211_v35  ;;  %v3056_v21 = vadd.f32 %v3055_v25, %v7212_v43  ;;  %v3065_v56 = vadd.f32 %v3064_v30, %v7213_v28  ;;  %v3074_v38 = vadd.f32 %v3073_v13, %v7214_v10 }
 0x2b5   :  { %v3083_v60 = vadd.f32 %v3082_v12, %v7215_v8  ;;  %v3039_v53 = vrot.slane %v3038_v55, 4  ;;  %v3092_v49 = vadd.f32 %v3091_v33, %v2959_v19  ;;  %v3101_v57 = vadd.f32 %v3100_v1, %v2963_v39 }
 0x2b6   :  { %v3048_v14 = vrot.slane %v3047_v32, 4  ;;  %v3057_v51 = vrot.slane %v3056_v21, 4  ;;  %v3066_v4 = vrot.slane %v3065_v56, 4  ;;  %v3075_v20 = vrot.slane %v3074_v38, 4 }
 0x2b7   :  { %v3084_v44 = vrot.slane %v3083_v60, 4  ;;  %v3040_v11 = vadd.f32 %v3039_v53, %v3038_v55  ;;  %v3093_v31 = vrot.slane %v3092_v49, 4  ;;  %v3102_v3 = vrot.slane %v3101_v57, 4 }
 0x2b8   :  { %v3049_v54 = vadd.f32 %v3048_v14, %v3047_v32  ;;  %v3058_v0 = vadd.f32 %v3057_v51, %v3056_v21  ;;  %v3067_v37 = vadd.f32 %v3066_v4, %v3065_v56  ;;  %v3076_v16 = vadd.f32 %v3075_v20, %v3074_v38 }
 0x2b9   :  { %v3085_v22 = vadd.f32 %v3084_v44, %v3083_v60  ;;  %v3041_v58 = vrot.slane %v3040_v11, 2  ;;  %v3094_v47 = vadd.f32 %v3093_v31, %v3092_v49  ;;  %v3103_v15 = vadd.f32 %v3102_v3, %v3101_v57 }
 0x2ba   :  { %v3050_v24 = vrot.slane %v3049_v54, 2  ;;  %v3059_v62 = vrot.slane %v3058_v0, 2  ;;  %v3068_v7 = vrot.slane %v3067_v37, 2  ;;  %v3077_v19 = vrot.slane %v3076_v16, 2 }
 0x2bb   :  { %v3086_v39 = vrot.slane %v3085_v22, 2  ;;  %v3042_v63 = vadd.f32 %v3041_v58, %v3040_v11  ;;  %v3095_v52 = vrot.slane %v3094_v47, 2  ;;  %v3104_v30 = vrot.slane %v3103_v15, 2  ;;  %v7218_v58 = vld [vmem:[#allocation99_spill] sm:$0xff] }
 0x2bc   :  { %v3051_v25 = vadd.f32 %v3050_v24, %v3049_v54  ;;  %v3060_v46 = vadd.f32 %v3059_v62, %v3058_v0  ;;  %v3069_v13 = vadd.f32 %v3068_v7, %v3067_v37  ;;  %v3078_v59 = vadd.f32 %v3077_v19, %v3076_v16  ;;  %v7217_v37 = vld [vmem:[#allocation98_spill] sm:$0xff]  ;;  %v7221_v19 = vld [vmem:[#allocation100_spill] sm:$0xff] }
 0x2bd   :  { %v3087_v12 = vadd.f32 %v3086_v39, %v3085_v22  ;;  %v3043_v18 = vrot.slane %v3042_v63, 1  ;;  %v3096_v35 = vadd.f32 %v3095_v52, %v3094_v47  ;;  %v3105_v32 = vadd.f32 %v3104_v30, %v3103_v15  ;;  %v7219_v47 = vld [vmem:[#allocation89_spill] sm:$0xff]  ;;  %v7220_v62 = vld [vmem:[#allocation94_spill] sm:$0xff] }
 0x2be   :  { %v3052_v55 = vrot.slane %v3051_v25, 1  ;;  %v3061_v33 = vrot.slane %v3060_v46, 1  ;;  %v3070_v1 = vrot.slane %v3069_v13, 1  ;;  %v3079_v43 = vrot.slane %v3078_v59, 1  ;;  %v7223_v52 = vld [vmem:[#allocation90_spill] sm:$0xff] }
 0x2bf   :  { %v3088_v21 = vrot.slane %v3087_v12, 1  ;;  %v2999_v28 = vadd.f32 %v2998_v40, %v6190_v36  ;;  %v3097_v10 = vrot.slane %v3096_v35, 1  ;;  %v3106_v38 = vrot.slane %v3105_v32, 1 }
 0x2c0   :  { %v3053_v56 = vadd.f32 %v3052_v55, %v3051_v25  ;;  %v2972_v8 = vadd.f32 %v2971_v23, %v6188_v6  ;;  %v3008_v60 = vadd.f32 %v3007_v27, %v6192_v17  ;;  %v3017_v53 = vadd.f32 %v3016_v34, %v6194_v45 }
 0x2c1   :  { %v3062_v14 = vadd.f32 %v3061_v33, %v3060_v46  ;;  %v3026_v36 = vadd.f32 %v3025_v9, %v6198_v26  ;;  %v3035_v40 = vadd.f32 %v3034_v5, %v6200_v2  ;;  %v3071_v49 = vadd.f32 %v3070_v1, %v3069_v13  ;;  %v7216_v2 = vld [vmem:[#allocation97_spill] sm:$0xff]  ;;  %v7224_v46 = vld [vmem:[#allocation102_spill] sm:$0xff]  ;;  %v7227_v33 = vld [vmem:[#allocation88_spill] sm:$0xff] }
 0x2c2   :  { %v3109_v6 = vmax.f32 %v6214_v29, 0.0  ;;  %v3044_v23 = vadd.f32 %v3043_v18, %v3042_v63  ;;  %v3080_v57 = vadd.f32 %v3079_v43, %v3078_v59  ;;  %v3089_v51 = vadd.f32 %v3088_v21, %v3087_v12  ;;  %v7222_v63 = vld [vmem:[#allocation101_spill] sm:$0xff]  ;;  %v7225_v59 = vld [vmem:[#allocation91_spill] sm:$0xff]  ;;  %v7228_v43 = vld [vmem:[#allocation92_spill] sm:$0xff] }
 0x2c3   :  { %v3110_v17 = vmax.f32 %v6219_v41, 0.0  ;;  %v3098_v27 = vadd.f32 %v3097_v10, %v3096_v35  ;;  %v3107_v4 = vadd.f32 %v3106_v38, %v3105_v32  ;;  %v3111_v45 = vmax.f32 %v2999_v28, 0.0  ;;  %v7226_v35 = vld [vmem:[#allocation103_spill] sm:$0xff]  ;;  %v7229_v28 = vld [vmem:[#allocation93_spill] sm:$0xff] }
 0x2c4   :  { %v3117_v34 = vmax.f32 %v3053_v56, 0.0  ;;  %v3108_v20 = vmax.f32 %v2972_v8, 0.0  ;;  %v3112_v44 = vmax.f32 %v3008_v60, 0.0  ;;  %v3113_v11 = vmax.f32 %v3017_v53, 0.0  ;;  %v7230_v53 = vld [vmem:[#allocation95_spill] sm:$0xff] }
 0x2c5   :  { %v3118_v26 = vmax.f32 %v3062_v14, 0.0  ;;  %v3114_v9 = vmax.f32 %v3026_v36, 0.0  ;;  %v3115_v54 = vmax.f32 %v3035_v40, 0.0  ;;  %v3119_v31 = vmax.f32 %v3071_v49, 0.0  ;;  %v7231_v36 = vld [vmem:[#allocation96_spill] sm:$0xff] }
 0x2c6   :  { %v3125_v5 = vmul.f32 %v3109_v6, %v7216_v2  ;;  %v3116_v3 = vmax.f32 %v3044_v23, 0.0  ;;  %v3120_v29 = vmax.f32 %v3080_v57, 0.0  ;;  %v3121_v0 = vmax.f32 %v3089_v51, 0.0 }
 0x2c7   :  { %v3126_v16 = vmul.f32 %v3110_v17, %v7217_v37  ;;  %v3122_v22 = vmax.f32 %v3098_v27, 0.0  ;;  %v3123_v41 = vmax.f32 %v3107_v4, 0.0  ;;  %v3127_v24 = vmul.f32 %v3111_v45, %v7218_v58  ;;  %v7233_v37 = vld [vmem:[#allocation29_spill] sm:$0xff] }
 0x2c8   :  { %v3133_v15 = vmul.f32 %v3117_v34, %v7219_v47  ;;  %v3124_v7 = vmul.f32 %v3108_v20, %v7220_v62  ;;  %v3128_v39 = vmul.f32 %v3112_v44, %v7221_v19  ;;  %v3129_v25 = vmul.f32 %v3113_v11, %v7222_v63 }
 0x2c9   :  { %v3134_v30 = vmul.f32 %v3118_v26, %v7223_v52  ;;  %v3130_v13 = vmul.f32 %v3114_v9, %v7224_v46  ;;  %v3135_v12 = vmul.f32 %v3119_v31, %v7225_v59  ;;  %v3156_v18 = vrot.slane %v3125_v5, 7  ;;  %v7232_v9 = vld [vmem:[#allocation85_spill] sm:$0xff] }
 0x2ca   :  { %v3158_v55 = vrot.slane %v3126_v16, 6  ;;  %v3131_v32 = vmul.f32 %v3115_v54, %v7226_v35  ;;  %v3132_v1 = vmul.f32 %v3116_v3, %v7227_v33  ;;  %v3136_v21 = vmul.f32 %v3120_v29, %v7228_v43 }
 0x2cb   :  { %v3137_v56 = vmul.f32 %v3121_v0, %v7229_v28  ;;  %v3157_v10 = vsel %vm2059_vm1, %v3156_v18, %v3124_v7  ;;  %v3160_v38 = vrot.slane %v3127_v24, 5  ;;  %v3170_v8 = vrot.slane %v3133_v15, 7  ;;  %v7235_v24 = vld [vmem:[#allocation23_spill] sm:$0xff] }
 0x2cc   :  { %v3172_v60 = vrot.slane %v3134_v30, 6  ;;  %v3138_v14 = vmul.f32 %v3122_v22, %v7230_v53  ;;  %v3139_v40 = vmul.f32 %v3123_v41, %v7231_v36  ;;  %v3159_v49 = vsel %vm2062_vm2, %v3158_v55, %v3157_v10 }
 0x2cd   :  { %v3162_v6 = vrot.slane %v3128_v39, 4  ;;  %v3161_v23 = vsel %vm2065_vm3, %v3160_v38, %v3159_v49  ;;  %v3164_v57 = vrot.slane %v3129_v25, 3  ;;  %v3171_v51 = vsel %vm2059_vm1, %v3170_v8, %v3132_v1 }
 0x2ce   :  { %v3174_v17 = vrot.slane %v3135_v12, 5  ;;  %v3166_v4 = vrot.slane %v3130_v13, 2  ;;  %v3173_v45 = vsel %vm2062_vm2, %v3172_v60, %v3171_v51  ;;  %v3176_v34 = vrot.slane %v3136_v21, 4 }
 0x2cf   :  { %v3163_v27 = vsel %vm2068_vm4, %v3162_v6, %v3161_v23  ;;  %v3168_v44 = vrot.slane %v3131_v32, 1  ;;  %v3178_v26 = vrot.slane %v3137_v56, 3  ;;  %v2828_v54 = vrot.slane %v7232_v9, 2 }
 0x2d0   :  { %v3165_v20 = vsel %vm2071_vm5, %v3164_v57, %v3163_v27  ;;  %v3175_v11 = vsel %vm2065_vm3, %v3174_v17, %v3173_v45  ;;  %v3180_v5 = vrot.slane %v3138_v14, 2  ;;  %v3182_v0 = vrot.slane %v3139_v40, 1 }
 0x2d1   :  { %v3167_v31 = vsel %vm2074_vm6, %v3166_v4, %v3165_v20  ;;  %v3177_v2 = vsel %vm2068_vm4, %v3176_v34, %v3175_v11  ;;  %v7234_v16 = vrot.slane %v7233_v37, 2  ;;  %v7236_v47 = vrot.slane %v7235_v24, 2  ;;  %v7237_v4 = vld [vmem:[#allocation39_spill] sm:$0xff]  ;;  %v7238_v34 = vld [vmem:[#allocation41_spill] sm:$0xff] }
 0x2d2   :  { %v3169_v3 = vsel %vm2077_vm7, %v3168_v44, %v3167_v31  ;;  %v3179_v29 = vsel %vm2071_vm5, %v3178_v26, %v3177_v2  ;;  %v2829_v62 = vadd.f32 %v2828_v54, %v7232_v9  ;;  %v3211_v60 = vlaneseq  ;;  %v7239_v44 = vld [vmem:[#allocation52_spill] sm:$0xff]  ;;  %v7240_v26 = vld [vmem:[#allocation37_spill] sm:$0xff]  ;;  %v7242_v2 = vld [vmem:[#allocation38_spill] sm:$0xff] }
 0x2d3   :  { %v2464_v22 = vadd.f32 %v7234_v16, %v7233_v37  ;;  %v3181_v41 = vsel %vm2074_vm6, %v3180_v5, %v3179_v29  ;;  %v2099_v15 = vadd.f32 %v7236_v47, %v7235_v24  ;;  %v7241_v54 = vld [vmem:[#allocation53_spill] sm:$0xff] }
 0x2d4   :  { %v3183_v58 = vsel %vm2077_vm7, %v3182_v0, %v3181_v41  ;;  %v2830_v25 = vrot.slane %v2829_v62, 1  ;;  %v3212_v53 = vshrl.u32 %v3211_v60, 7  ;;  %v7244_v0 = vld [vmem:[#allocation50_spill] sm:$0xff]  ;;  %v7245_v47 = vld [vmem:[#allocation21_spill] sm:$0xff] }
 0x2d5   :  { %v3186_v7 = vadd.f32 %v3183_v58, %v3169_v3  ;;  %v2465_v19 = vrot.slane %v2464_v22, 1  ;;  %v2100_v63 = vrot.slane %v2099_v15, 1  ;;  %v7243_v3 = vld [vmem:[#allocation49_spill] sm:$0xff] }
 0x2d6   :  { %v2831_v59 = vadd.f32 %v2830_v25, %v2829_v62  ;;  %v3213_v36 = vsub.s32 0, %v3212_v53  ;;  %v7248_v25 = vld [vmem:[#allocation112_spill] sm:$0xff] }
 0x2d7   :  { %v3187_v39 = vrot.slane %v3186_v7, 4  ;;  %v2466_v30 = vadd.f32 %v2465_v19, %v2464_v22  ;;  %v2101_v13 = vadd.f32 %v2100_v63, %v2099_v15 }
 0x2d9   :  { %v3188_v52 = vadd.f32 %v3187_v39, %v3186_v7  ;;  %v3193_v55 = vmax.f32 %v2101_v13, %v2466_v30  ;;  %v7246_v7 = vld [vmem:[#allocation109_spill] sm:$0xff]  ;;  %v7247_v39 = vld [vmem:[#allocation111_spill] sm:$0xff] }
 0x2db   :  { %v3189_v46 = vrot.slane %v3188_v52, 2  ;;  %v3194_v32 = vmax.f32 %v3193_v55, %v2831_v59 }
 0x2dd   :  { %v3190_v12 = vadd.f32 %v3189_v46, %v3188_v52 }
 0x2df   :  { %v3191_v18 = vrot.slane %v3190_v12, 1 }
 0x2e1   :  { %v3192_v35 = vadd.f32 %v3191_v18, %v3190_v12 }
 0x2e3   :  { %v3195_v33 = vmax.f32 %v3194_v32, %v3192_v35 }
 0x2e5   :  { %v3196_v1 = vsub.f32 %v2101_v13, %v3195_v33  ;;  %v3199_v43 = vsub.f32 %v2466_v30, %v3195_v33  ;;  %v3202_v21 = vsub.f32 %v2831_v59, %v3195_v33  ;;  %v3205_v28 = vsub.f32 %v3192_v35, %v3195_v33 }
 0x2e7   :  { %v3197_v56 = vmul.f32 1.442695, %v3196_v1  ;;  %v3200_v10 = vmul.f32 1.442695, %v3199_v43  ;;  %v3203_v38 = vmul.f32 1.442695, %v3202_v21 }
 0x2e8   :  { %v3206_v8 = vmul.f32 1.442695, %v3205_v28 }
 0x2e9   :  { %3623 = vpow2.f32 %v3197_v56 }
 0x2ea   :  { %3625 = vpow2.f32 %v3200_v10 }
 0x2eb   :  { %3627 = vpow2.f32 %v3203_v38 }
 0x2ec   :  { %3629 = vpow2.f32 %v3206_v8 }
 0x2f3   :  { %v3624_v14 = vpop.eup %3623 }
 0x2f4   :  { %v3626_v40 = vpop.eup %3625  ;;  %v3214_v57 = vrot.slane %v3624_v14, %v3213_v36 }
 0x2f5   :  { %v3208_v49 = vadd.f32 %v3626_v40, %v3624_v14  ;;  %v3628_v6 = vpop.eup %3627  ;;  %v3222_v51 = vrot.slane %v3626_v40, %v3213_v36 }
 0x2f6   :  { %v3630_v17 = vpop.eup %3629  ;;  %v3215_v45 = vmul.f32 %v3214_v57, %v7237_v4  ;;  %v3216_v20 = vmul.f32 %v3214_v57, %v7238_v34  ;;  %v3217_v11 = vmul.f32 %v3214_v57, %v7239_v44  ;;  %v3218_v31 = vmul.f32 %v3214_v57, %v7241_v54 }
 0x2f7   :  { %v3209_v23 = vadd.f32 %v3628_v6, %v3208_v49  ;;  %v3223_v9 = vmul.f32 %v3222_v51, %v7240_v26  ;;  %v3224_v5 = vmul.f32 %v3222_v51, %v7242_v2  ;;  %v3225_v29 = vmul.f32 %v3222_v51, %v7243_v3 }
 0x2f8   :  { %v3226_v37 = vmul.f32 %v3222_v51, %v7244_v0  ;;  %v3234_v16 = vrot.slane %v3628_v6, %v3213_v36  ;;  %v3246_v62 = vrot.slane %v3630_v17, %v3213_v36 }
 0x2f9   :  { %v3210_v27 = vadd.f32 %v3630_v17, %v3209_v23  ;;  %v3227_v22 = vadd.f32 %v3223_v9, %v3215_v45  ;;  %v3228_v41 = vadd.f32 %v3224_v5, %v3216_v20  ;;  %v3229_v58 = vadd.f32 %v3225_v29, %v3217_v11 }
 0x2fa   :  { %v3230_v24 = vadd.f32 %v3226_v37, %v3218_v31  ;;  %v3235_v15 = vmul.f32 %v3234_v16, %v7245_v47  ;;  %v3236_v19 = vmul.f32 %v3234_v16, %v7246_v7  ;;  %v3237_v63 = vmul.f32 %v3234_v16, %v7247_v39 }
 0x2fb   :  { %3631 = vrcp.f32 %v3210_v27  ;;  %v3238_v52 = vmul.f32 %v3234_v16, %v7248_v25  ;;  %v3247_v12 = vmul.f32 %v3246_v62, %v7114_v48  ;;  %v3248_v18 = vmul.f32 %v3246_v62, %v7116_v42 }
 0x2fc   :  { %v3239_v30 = vadd.f32 %v3235_v15, %v3227_v22  ;;  %v3240_v46 = vadd.f32 %v3236_v19, %v3228_v41  ;;  %v3241_v13 = vadd.f32 %v3237_v63, %v3229_v58  ;;  %v3249_v55 = vmul.f32 %v3246_v62, %v7118_v50 }
 0x2fd   :  { %v3242_v59 = vadd.f32 %v3238_v52, %v3230_v24  ;;  %v3250_v35 = vmul.f32 %v3246_v62, %v5993_v61 }
 0x2fe   :  { %v3251_v33 = vadd.f32 %v3247_v12, %v3239_v30  ;;  %v3252_v1 = vadd.f32 %v3248_v18, %v3240_v46  ;;  %v3253_v43 = vadd.f32 %v3249_v55, %v3241_v13 }
 0x2ff   :  { %v3254_v21 = vadd.f32 %v3250_v35, %v3242_v59 }
 0x305   :  { %v3632_v32 = vpop.eup %3631 }
 0x306   :  { %v3260_v28 = vrot.slane %v3632_v32, %v3213_v36 }
 0x308   :  { %v3261_v56 = vmul.f32 %v3260_v28, %v3251_v33  ;;  %v3262_v10 = vmul.f32 %v3260_v28, %v3252_v1  ;;  %v3263_v38 = vmul.f32 %v3260_v28, %v3253_v43  ;;  %v3264_v8 = vmul.f32 %v3260_v28, %v3254_v21 }
 0x30a   :  { %3265 = vst [vmem:[#allocation2] sm:$0xff] %v3261_v56  ;;  %3266 = vst [vmem:[#allocation2 + $0x8] sm:$0xff] %v3262_v10 }
 0x30b   :  { %3267 = vst [vmem:[#allocation2 + $0x10] sm:$0xff] %v3263_v38  ;;  %3268 = vst [vmem:[#allocation2 + $0x18] sm:$0xff] %v3264_v8 }
 0x30c   :  { %3654 = shalt.err (!%p3651_p4)
}
 0x30d   :  { %s3655_s15 = scalar_lea.hbm %s6339_s5, 512 }
 0x30e   :  { %p3656_p5 = scmp.ne.s32.totalorder %s6339_s5, %s3655_s15  ;;  %p3659_p6 = scmp.lt.u32.totalorder %s3655_s15, %s6339_s5 }
 0x310   :  { %p3661_p7 = pnand %p3659_p6, %p3656_p5 }
 0x312   :  { %3664 = shalt.err (!%p3661_p7)
}
 0x313   :  { %s3669_s3 = smov 128   ;;  %s3670_s4 = smov 8  }
 0x314   :  { %3280 = dma.vmem_to_hbm [thread:$0]  %s3275_s11, 512, %s6339_s5, [#allocation3], %s3669_s3, %s3669_s3, %s3670_s4  }
 0x315   :  { %3665 = dma.done.wait [#allocation3], 512  }
 0x316   :  { %3666 = vsyncadd [#allocation3], 4294966784 }
 0x317   :  { %3284 = vsyncpa [#allocation3], 1 }

</bundles_post_ra>
